<compile_context>
chip_gen: v6e
topology: v6e:2x2x1
jax: 0.10.0
libtpu: 0.0.40
codegen_flags: <defaults>
</compile_context>

<pallas_src>
import math
from functools import partial

import jax
import jax.numpy as jnp
from jax import lax
from jax.experimental import pallas as pl
from jax.experimental.pallas import tpu as pltpu

LANE = 128
SUBLANE = 8


def _round_up(x, m):
    return ((x + m - 1) // m) * m


# ----------------------------------------------------------------------------
# Fused kernel builder.
# Ref layout (all VMEM):
#   refs[0]                       x        (T*b_blk, D_in)            bf16
#   refs[1+3l : 4+3l]             wih_t (Din_l, 4H_l) bf16, whh_t (H_l, 4H_l) bf16,
#                                 bias (1, 4H_l) f32   -- gate order (i,f,o,g), lane-padded
#   refs[1+3L], refs[2+3L]        fc_w_t (H_last, out_pad) bf16, fc_b (1, out_pad) f32
#   refs[3+3L]                    out      (T*b_blk, out_pad)          f32
#   refs[4+3L]                    gx_scr   (T*b_blk, 4*H_max)          f32  scratch
#   refs[5+3L]                    act_scr  (T*b_blk, H_max)            bf16 scratch
# ----------------------------------------------------------------------------
def _make_fused_lstm_kernel(T, b_blk, hidden_pads):
    num_layers = len(hidden_pads)

    def kernel(*refs):
        x_ref = refs[0]
        layer_refs = [(refs[1 + 3 * l], refs[2 + 3 * l], refs[3 + 3 * l])
                      for l in range(num_layers)]
        fcw_ref = refs[1 + 3 * num_layers]
        fcb_ref = refs[2 + 3 * num_layers]
        out_ref = refs[3 + 3 * num_layers]
        gx_scr = refs[4 + 3 * num_layers]
        act_scr = refs[5 + 3 * num_layers]

        cur = x_ref[...]                                   # (T*b_blk, D_in) bf16
        for l in range(num_layers):
            wih_ref, whh_ref, b_ref = layer_refs[l]
            H = hidden_pads[l]                             # lane-padded hidden
            whh = whh_ref[...]                             # (H, 4H) bf16, resident

            # Hoisted non-recurrent input projection for ALL timesteps:
            # one (T*b_blk, Din) x (Din, 4H) bf16 MXU matmul, f32 accumulation,
            # written into the explicit reusable VMEM scratch.  After this,
            # `cur` (the previous layer's activations) is no longer needed,
            # so the recurrence below can overwrite act_scr in place.
            gx_scr[:, :4 * H] = (
                jnp.dot(cur, wih_ref[...], preferred_element_type=jnp.float32)
                + b_ref[...])

            def step(t, carry, H=H, whh=whh):
                h, c = carry                               # f32 (b_blk, H)
                row = pl.multiple_of(t * b_blk, b_blk)
                gates = gx_scr[pl.ds(row, b_blk), :4 * H] + jnp.dot(
                    h.astype(jnp.bfloat16), whh,
                    preferred_element_type=jnp.float32)
                # gates packed (i, f, o, g): one wide sigmoid + one tanh.
                sig = jax.nn.sigmoid(gates[:, :3 * H])
                i_g = sig[:, 0 * H:1 * H]
                f_g = sig[:, 1 * H:2 * H]
                o_g = sig[:, 2 * H:3 * H]
                g_g = jnp.tanh(gates[:, 3 * H:4 * H])
                c = f_g * c + i_g * g_g
                h = o_g * jnp.tanh(c)
                # (8,128)-aligned store of this step's hidden state.
                act_scr[pl.ds(row, b_blk), :H] = h.astype(act_scr.dtype)
                return h, c

            h0 = jnp.zeros((b_blk, H), jnp.float32)
            c0 = jnp.zeros((b_blk, H), jnp.float32)
            _ = lax.fori_loop(0, T, step, (h0, c0), unroll=min(T, 8))

            cur = act_scr[:, :H]                           # (T*b_blk, H) bf16

        # Fused fc head: single bf16 matmul, lane-dense (out_pad % 128 == 0)
        # store of the whole output slab.
        out = (jnp.dot(cur, fcw_ref[...], preferred_element_type=jnp.float32)
               + fcb_ref[...])
        out_ref[...] = out.astype(out_ref.dtype)

    return kernel


# ----------------------------------------------------------------------------
# Parameter construction (PyTorch nn.LSTM / nn.Linear conventions).
# ----------------------------------------------------------------------------
def init_params(key, input_size, hidden_sizes, output_size):
    params = {"lstm": [], "fc": None}
    in_sz = input_size
    for h in hidden_sizes:
        k = 1.0 / math.sqrt(h)
        key, k1, k2, k3, k4 = jax.random.split(key, 5)
        params["lstm"].append({
            "w_ih": jax.random.uniform(k1, (4 * h, in_sz), jnp.float32, -k, k),
            "w_hh": jax.random.uniform(k2, (4 * h, h), jnp.float32, -k, k),
            "b_ih": jax.random.uniform(k3, (4 * h,), jnp.float32, -k, k),
            "b_hh": jax.random.uniform(k4, (4 * h,), jnp.float32, -k, k),
        })
        in_sz = h
    k = 1.0 / math.sqrt(hidden_sizes[-1])
    key, k1, k2 = jax.random.split(key, 3)
    params["fc"] = {
        "w": jax.random.uniform(k1, (output_size, hidden_sizes[-1]),
                                jnp.float32, -k, k),
        "b": jax.random.uniform(k2, (output_size,), jnp.float32, -k, k),
    }
    return params


def pack_params(params):
    """One-time repack to kernel layout.

    * transpose weights, fuse b_ih + b_hh
    * reorder gates (i,f,g,o) -> (i,f,o,g)
    * zero-pad every gate block / hidden width / fc output to 128 lanes
    * cast matmul operands to bf16 (bias stays f32)
    Padding is numerically inert: padded gate pre-activations are 0, so
    i=f=o=0.5, g=0, and with c0=h0=0 the padded hidden lanes stay exactly 0.
    """
    hs = [int(layer["w_hh"].shape[1]) for layer in params["lstm"]]
    hp = [_round_up(h, LANE) for h in hs]
    packed = {"layers": []}
    for li, layer in enumerate(params["lstm"]):
        H, Hp = hs[li], hp[li]
        w_ih, w_hh = layer["w_ih"], layer["w_hh"]
        b = layer["b_ih"] + layer["b_hh"]
        d_in = int(w_ih.shape[1])
        d_in_p = d_in if li == 0 else hp[li - 1]

        def regate(w, cols_pad):
            # rows (4H, .) in PyTorch order (i,f,g,o) -> padded (4Hp, cols_pad)
            # in order (i,f,o,g), each gate block padded H -> Hp with zeros.
            blocks = [w[0:H], w[H:2 * H], w[3 * H:4 * H], w[2 * H:3 * H]]
            out = jnp.zeros((4 * Hp, cols_pad), jnp.float32)
            for gi, blk in enumerate(blocks):
                out = out.at[gi * Hp:gi * Hp + H, :blk.shape[1]].set(blk)
            return out

        w_ih_p = regate(w_ih, d_in_p)          # (4Hp, Din_p)
        w_hh_p = regate(w_hh, Hp)              # (4Hp, Hp)
        b_blocks = [b[0:H], b[H:2 * H], b[3 * H:4 * H], b[2 * H:3 * H]]
        b_p = jnp.zeros((4 * Hp,), jnp.float32)
        for gi, blk in enumerate(b_blocks):
            b_p = b_p.at[gi * Hp:gi * Hp + H].set(blk)

        packed["layers"].append((
            jnp.asarray(w_ih_p.T, jnp.bfloat16),        # (Din_p, 4Hp)
            jnp.asarray(w_hh_p.T, jnp.bfloat16),        # (Hp, 4Hp)
            jnp.asarray(b_p[None, :], jnp.float32),     # (1, 4Hp)
        ))

    H_last, Hp_last = hs[-1], hp[-1]
    out_size = int(params["fc"]["w"].shape[0])
    out_pad = _round_up(out_size, LANE)
    fc_w = jnp.zeros((Hp_last, out_pad), jnp.float32)
    fc_w = fc_w.at[:H_last, :out_size].set(params["fc"]["w"].T)
    fc_b = jnp.zeros((out_pad,), jnp.float32).at[:out_size].set(params["fc"]["b"])
    packed["fc_w_t"] = fc_w.astype(jnp.bfloat16)        # (Hp_last, out_pad)
    packed["fc_b"] = fc_b[None, :]                       # (1, out_pad)
    packed["out_size"] = out_size
    return packed


# ----------------------------------------------------------------------------
# Forward: single fused pallas_call for the whole stacked-LSTM + fc model.
# ----------------------------------------------------------------------------
@partial(jax.jit, static_argnames=("out_size",))
def lstm_model_forward(layer_params, fc_w_t, fc_b, x, *, out_size):
    """x: (seq_len, batch, input_size) -> (seq_len, batch, out_size)."""
    T, B, D_in = x.shape
    hidden_pads = [int(whh.shape[0]) for (_, whh, _) in layer_params]
    H_max = max(hidden_pads)
    out_pad = int(fc_w_t.shape[1])

    # Pad batch to 8 sublanes; shard it across a "parallel" grid axis when big
    # enough (v7x has 2 TensorCores), else one fully-resident program.
    B_pad = _round_up(B, SUBLANE)
    n_shards = 2 if (B_pad >= 16 and B_pad % 16 == 0) else 1
    b_blk = B_pad // n_shards

    # Shard-major, time-major, batch-minor 2D layout: shard s owns contiguous
    # rows [s*T*b_blk, (s+1)*T*b_blk) and each timestep is an aligned 8-sublane
    # group within the shard.
    x_p = jnp.pad(x, ((0, 0), (0, B_pad - B), (0, 0)))
    x2d = (x_p.reshape(T, n_shards, b_blk, D_in)
              .transpose(1, 0, 2, 3)
              .reshape(n_shards * T * b_blk, D_in)
              .astype(jnp.bfloat16))

    inputs = [x2d]
    in_specs = [pl.BlockSpec((T * b_blk, D_in), lambda s: (s, 0))]
    for (wih, whh, bias) in layer_params:
        inputs += [wih, whh, bias]
        in_specs += [
            pl.BlockSpec(wih.shape, lambda s: (0, 0)),
            pl.BlockSpec(whh.shape, lambda s: (0, 0)),
            pl.BlockSpec(bias.shape, lambda s: (0, 0)),
        ]
    inputs += [fc_w_t, fc_b]
    in_specs += [
        pl.BlockSpec(fc_w_t.shape, lambda s: (0, 0)),
        pl.BlockSpec(fc_b.shape, lambda s: (0, 0)),
    ]

    # Explicit, reused scratch: gx (f32) + one in-place activation buffer (bf16).
    scratch_shapes = [
        pltpu.VMEM((T * b_blk, 4 * H_max), jnp.float32),
        pltpu.VMEM((T * b_blk, H_max), jnp.bfloat16),
    ]

    # vmem_limit_bytes from the actual resident set (x2 for double buffering).
    weight_bytes = sum(int(w.size) * w.dtype.itemsize
                       for lp in layer_params for w in lp)
    weight_bytes += int(fc_w_t.size) * fc_w_t.dtype.itemsize
    weight_bytes += int(fc_b.size) * fc_b.dtype.itemsize
    io_block_bytes = T * b_blk * (D_in * 2 + out_pad * 4)
    scratch_bytes = T * b_blk * (4 * H_max * 4 + H_max * 2)
    resident = 2 * (weight_bytes + io_block_bytes) + scratch_bytes
    vmem_limit = int(min(100 * 2**20, max(32 * 2**20, 2 * resident)))

    out2d = pl.pallas_call(
        _make_fused_lstm_kernel(T, b_blk, hidden_pads),
        out_shape=jax.ShapeDtypeStruct((n_shards * T * b_blk, out_pad),
                                       jnp.float32),
        grid_spec=pltpu.PrefetchScalarGridSpec(
            num_scalar_prefetch=0,
            grid=(n_shards,),
            in_specs=in_specs,
            out_specs=pl.BlockSpec((T * b_blk, out_pad), lambda s: (s, 0)),
            scratch_shapes=scratch_shapes),
        compiler_params=pltpu.CompilerParams(
            dimension_semantics=("parallel",),
            vmem_limit_bytes=vmem_limit),
    )(*inputs)

    out = (out2d.reshape(n_shards, T, b_blk, out_pad)
                .transpose(1, 0, 2, 3)
                .reshape(T, B_pad, out_pad))
    return out[:, :B, :out_size]


# ----------------------------------------------------------------------------
# Pure-JAX f32 reference (mirrors PyTorch LSTMModel.forward) for verification.
# ----------------------------------------------------------------------------
def lstm_model_reference(params, x):
    h_seq = x
    for layer in params["lstm"]:
        w_ih, w_hh = layer["w_ih"], layer["w_hh"]
        b = layer["b_ih"] + layer["b_hh"]
        B = h_seq.shape[1]
        H = w_hh.shape[1]

        def step(carry, x_t, w_ih=w_ih, w_hh=w_hh, b=b, H=H):
            h, c = carry
            gates = x_t @ w_ih.T + h @ w_hh.T + b
            i = jax.nn.sigmoid(gates[:, 0 * H:1 * H])
            f = jax.nn.sigmoid(gates[:, 1 * H:2 * H])
            g = jnp.tanh(gates[:, 2 * H:3 * H])
            o = jax.nn.sigmoid(gates[:, 3 * H:4 * H])
            c = f * c + i * g
            h = o * jnp.tanh(c)
            return (h, c), h

        init = (jnp.zeros((B, H), jnp.float32), jnp.zeros((B, H), jnp.float32))
        _, h_seq = jax.lax.scan(step, init, h_seq)
    return h_seq @ params["fc"]["w"].T + params["fc"]["b"]


if __name__ == "__main__":
    # Small module-consistent shapes: seq=8, batch=2, input=4, hidden=[32,32], out=4
    seq_len, batch, input_size = 8, 2, 4
    hidden_sizes = [32, 32]
    output_size = 4

    key = jax.random.PRNGKey(0)
    key, kp, kx = jax.random.split(key, 3)
    params = init_params(kp, input_size, hidden_sizes, output_size)
    packed = pack_params(params)
    x = jax.random.normal(kx, (seq_len, batch, input_size), jnp.float32)

    y = lstm_model_forward(tuple(packed["layers"]), packed["fc_w_t"],
                           packed["fc_b"], x, out_size=packed["out_size"])
    jax.block_until_ready(y)
    assert y.shape == (seq_len, batch, output_size)

    y_ref = lstm_model_reference(params, x)
    max_err = float(jnp.max(jnp.abs(y - y_ref)))
    # bf16 MXU operands (f32 accumulation / f32 gate math) -> mixed-precision tol.
    assert jnp.allclose(y, y_ref, atol=2e-2, rtol=2e-2), max_err

    print("KERNEL_OK")
</pallas_src>

<mosaic_0001>
module attributes {stable_mosaic.version = 11 : i64} {
  func.func @kernel(%arg0: i32, %arg1: memref<64x4xbf16, #tpu.memory_space<vmem>>, %arg2: memref<4x512xbf16, #tpu.memory_space<vmem>>, %arg3: memref<128x512xbf16, #tpu.memory_space<vmem>>, %arg4: memref<1x512xf32, #tpu.memory_space<vmem>>, %arg5: memref<128x512xbf16, #tpu.memory_space<vmem>>, %arg6: memref<128x512xbf16, #tpu.memory_space<vmem>>, %arg7: memref<1x512xf32, #tpu.memory_space<vmem>>, %arg8: memref<128x128xbf16, #tpu.memory_space<vmem>>, %arg9: memref<1x128xf32, #tpu.memory_space<vmem>>, %arg10: memref<64x128xf32, #tpu.memory_space<vmem>>, %arg11: memref<64x512xf32, #tpu.memory_space<vmem>>, %arg12: memref<64x128xbf16, #tpu.memory_space<vmem>>) attributes {dimension_semantics = [#tpu.dimension_semantics<parallel>], iteration_bounds = array<i64: 1>, scalar_prefetch = 0 : i64, scratch_operands = 2 : i64, tpu.core_type = #tpu.core_type<tc>, window_params = [{transform_indices = @transform_0, window_bounds = array<i64: 64, 4>}, {pipeline_mode = #tpu.pipeline_mode<synchronous>, transform_indices = @transform_1, window_bounds = array<i64: 4, 512>}, {pipeline_mode = #tpu.pipeline_mode<synchronous>, transform_indices = @transform_2, window_bounds = array<i64: 128, 512>}, {pipeline_mode = #tpu.pipeline_mode<synchronous>, transform_indices = @transform_3, window_bounds = array<i64: 1, 512>}, {pipeline_mode = #tpu.pipeline_mode<synchronous>, transform_indices = @transform_4, window_bounds = array<i64: 128, 512>}, {pipeline_mode = #tpu.pipeline_mode<synchronous>, transform_indices = @transform_5, window_bounds = array<i64: 128, 512>}, {pipeline_mode = #tpu.pipeline_mode<synchronous>, transform_indices = @transform_6, window_bounds = array<i64: 1, 512>}, {pipeline_mode = #tpu.pipeline_mode<synchronous>, transform_indices = @transform_7, window_bounds = array<i64: 128, 128>}, {pipeline_mode = #tpu.pipeline_mode<synchronous>, transform_indices = @transform_8, window_bounds = array<i64: 1, 128>}, {transform_indices = @transform_9, window_bounds = array<i64: 64, 128>}]} {
    %c0 = arith.constant 0 : index
    %c0_0 = arith.constant 0 : index
    %0 = vector.load %arg1[%c0, %c0_0] : memref<64x4xbf16, #tpu.memory_space<vmem>>, vector<64x4xbf16>
    %c0_1 = arith.constant 0 : index
    %c0_2 = arith.constant 0 : index
    %1 = vector.load %arg3[%c0_1, %c0_2] : memref<128x512xbf16, #tpu.memory_space<vmem>>, vector<128x512xbf16>
    %c0_3 = arith.constant 0 : index
    %c0_4 = arith.constant 0 : index
    %2 = vector.load %arg2[%c0_3, %c0_4] : memref<4x512xbf16, #tpu.memory_space<vmem>>, vector<4x512xbf16>
    %cst = arith.constant dense<0.000000e+00> : vector<64x512xf32>
    %3 = tpu.matmul %0, %2, %cst {dimension_numbers = #tpu.dot_dimension_numbers<[1], [0], [0], [1], [0, 0, 1, 1], [], []>} : vector<64x4xbf16>, vector<4x512xbf16>, vector<64x512xf32> -> vector<64x512xf32>
    %c0_5 = arith.constant 0 : index
    %c0_6 = arith.constant 0 : index
    %4 = vector.load %arg4[%c0_5, %c0_6] : memref<1x512xf32, #tpu.memory_space<vmem>>, vector<1x512xf32>
    %5 = vector.broadcast %4 : vector<1x512xf32> to vector<64x512xf32>
    %6 = arith.addf %3, %5 : vector<64x512xf32>
    %c0_7 = arith.constant 0 : index
    %c0_8 = arith.constant 0 : index
    %7 = vector.load %arg11[%c0_7, %c0_8] : memref<64x512xf32, #tpu.memory_space<vmem>>, vector<64x512xf32>
    tpu.vector_store %arg11[%c0_7, %c0_8], %6 {strides = array<i32>} : memref<64x512xf32, #tpu.memory_space<vmem>>, vector<64x512xf32>,
    %cst_9 = arith.constant 0.000000e+00 : f32
    %8 = vector.broadcast %cst_9 : f32 to vector<8x128xf32>
    %cst_10 = arith.constant 0.000000e+00 : f32
    %9 = vector.broadcast %cst_10 : f32 to vector<8x128xf32>
    %c0_i32 = arith.constant 0 : i32
    %c8_i32 = arith.constant 8 : i32
    %10 = arith.muli %c0_i32, %c8_i32 : i32
    %11 = tpu.assume_multiple %10, 8 : i32
    %12 = arith.index_cast %11 : i32 to index
    %c0_11 = arith.constant 0 : index
    %13 = vector.load %arg11[%12, %c0_11] : memref<64x512xf32, #tpu.memory_space<vmem>>, vector<8x512xf32>
    %14 = arith.truncf %8 : vector<8x128xf32> to vector<8x128xbf16>
    %cst_12 = arith.constant dense<0.000000e+00> : vector<8x512xf32>
    %15 = tpu.matmul %14, %1, %cst_12 {dimension_numbers = #tpu.dot_dimension_numbers<[1], [0], [0], [1], [0, 0, 1, 1], [], []>} : vector<8x128xbf16>, vector<128x512xbf16>, vector<8x512xf32> -> vector<8x512xf32>
    %16 = arith.addf %13, %15 : vector<8x512xf32>
    %17 = vector.extract_strided_slice %16 {offsets = [0, 0], sizes = [8, 384], strides = [1, 1]} : vector<8x512xf32> to vector<8x384xf32>
    %18 = arith.negf %17 : vector<8x384xf32>
    %19 = math.exp %18 : vector<8x384xf32>
    %cst_13 = arith.constant 1.000000e+00 : f32
    %20 = vector.broadcast %cst_13 : f32 to vector<8x384xf32>
    %21 = arith.addf %20, %19 : vector<8x384xf32>
    %22 = arith.divf %20, %21 : vector<8x384xf32>
    %23 = vector.extract_strided_slice %22 {offsets = [0, 0], sizes = [8, 128], strides = [1, 1]} : vector<8x384xf32> to vector<8x128xf32>
    %24 = vector.extract_strided_slice %22 {offsets = [0, 128], sizes = [8, 128], strides = [1, 1]} : vector<8x384xf32> to vector<8x128xf32>
    %25 = vector.extract_strided_slice %22 {offsets = [0, 256], sizes = [8, 128], strides = [1, 1]} : vector<8x384xf32> to vector<8x128xf32>
    %26 = vector.extract_strided_slice %16 {offsets = [0, 384], sizes = [8, 128], strides = [1, 1]} : vector<8x512xf32> to vector<8x128xf32>
    %27 = math.tanh %26 : vector<8x128xf32>
    %28 = arith.mulf %24, %9 : vector<8x128xf32>
    %29 = arith.mulf %23, %27 : vector<8x128xf32>
    %30 = arith.addf %28, %29 : vector<8x128xf32>
    %31 = math.tanh %30 : vector<8x128xf32>
    %32 = arith.mulf %25, %31 : vector<8x128xf32>
    %33 = arith.truncf %32 : vector<8x128xf32> to vector<8x128xbf16>
    %34 = arith.index_cast %11 : i32 to index
    %c0_14 = arith.constant 0 : index
    %35 = vector.load %arg12[%34, %c0_14] : memref<64x128xbf16, #tpu.memory_space<vmem>>, vector<8x128xbf16>
    tpu.vector_store %arg12[%34, %c0_14], %33 {strides = array<i32>} : memref<64x128xbf16, #tpu.memory_space<vmem>>, vector<8x128xbf16>,
    %c1_i32 = arith.constant 1 : i32
    %c8_i32_15 = arith.constant 8 : i32
    %36 = arith.muli %c1_i32, %c8_i32_15 : i32
    %37 = tpu.assume_multiple %36, 8 : i32
    %38 = arith.index_cast %37 : i32 to index
    %c0_16 = arith.constant 0 : index
    %39 = vector.load %arg11[%38, %c0_16] : memref<64x512xf32, #tpu.memory_space<vmem>>, vector<8x512xf32>
    %40 = arith.truncf %32 : vector<8x128xf32> to vector<8x128xbf16>
    %cst_17 = arith.constant dense<0.000000e+00> : vector<8x512xf32>
    %41 = tpu.matmul %40, %1, %cst_17 {dimension_numbers = #tpu.dot_dimension_numbers<[1], [0], [0], [1], [0, 0, 1, 1], [], []>} : vector<8x128xbf16>, vector<128x512xbf16>, vector<8x512xf32> -> vector<8x512xf32>
    %42 = arith.addf %39, %41 : vector<8x512xf32>
    %43 = vector.extract_strided_slice %42 {offsets = [0, 0], sizes = [8, 384], strides = [1, 1]} : vector<8x512xf32> to vector<8x384xf32>
    %44 = arith.negf %43 : vector<8x384xf32>
    %45 = math.exp %44 : vector<8x384xf32>
    %cst_18 = arith.constant 1.000000e+00 : f32
    %46 = vector.broadcast %cst_18 : f32 to vector<8x384xf32>
    %47 = arith.addf %46, %45 : vector<8x384xf32>
    %48 = arith.divf %46, %47 : vector<8x384xf32>
    %49 = vector.extract_strided_slice %48 {offsets = [0, 0], sizes = [8, 128], strides = [1, 1]} : vector<8x384xf32> to vector<8x128xf32>
    %50 = vector.extract_strided_slice %48 {offsets = [0, 128], sizes = [8, 128], strides = [1, 1]} : vector<8x384xf32> to vector<8x128xf32>
    %51 = vector.extract_strided_slice %48 {offsets = [0, 256], sizes = [8, 128], strides = [1, 1]} : vector<8x384xf32> to vector<8x128xf32>
    %52 = vector.extract_strided_slice %42 {offsets = [0, 384], sizes = [8, 128], strides = [1, 1]} : vector<8x512xf32> to vector<8x128xf32>
    %53 = math.tanh %52 : vector<8x128xf32>
    %54 = arith.mulf %50, %30 : vector<8x128xf32>
    %55 = arith.mulf %49, %53 : vector<8x128xf32>
    %56 = arith.addf %54, %55 : vector<8x128xf32>
    %57 = math.tanh %56 : vector<8x128xf32>
    %58 = arith.mulf %51, %57 : vector<8x128xf32>
    %59 = arith.truncf %58 : vector<8x128xf32> to vector<8x128xbf16>
    %60 = arith.index_cast %37 : i32 to index
    %c0_19 = arith.constant 0 : index
    %61 = vector.load %arg12[%60, %c0_19] : memref<64x128xbf16, #tpu.memory_space<vmem>>, vector<8x128xbf16>
    tpu.vector_store %arg12[%60, %c0_19], %59 {strides = array<i32>} : memref<64x128xbf16, #tpu.memory_space<vmem>>, vector<8x128xbf16>,
    %c2_i32 = arith.constant 2 : i32
    %c8_i32_20 = arith.constant 8 : i32
    %62 = arith.muli %c2_i32, %c8_i32_20 : i32
    %63 = tpu.assume_multiple %62, 8 : i32
    %64 = arith.index_cast %63 : i32 to index
    %c0_21 = arith.constant 0 : index
    %65 = vector.load %arg11[%64, %c0_21] : memref<64x512xf32, #tpu.memory_space<vmem>>, vector<8x512xf32>
    %66 = arith.truncf %58 : vector<8x128xf32> to vector<8x128xbf16>
    %cst_22 = arith.constant dense<0.000000e+00> : vector<8x512xf32>
    %67 = tpu.matmul %66, %1, %cst_22 {dimension_numbers = #tpu.dot_dimension_numbers<[1], [0], [0], [1], [0, 0, 1, 1], [], []>} : vector<8x128xbf16>, vector<128x512xbf16>, vector<8x512xf32> -> vector<8x512xf32>
    %68 = arith.addf %65, %67 : vector<8x512xf32>
    %69 = vector.extract_strided_slice %68 {offsets = [0, 0], sizes = [8, 384], strides = [1, 1]} : vector<8x512xf32> to vector<8x384xf32>
    %70 = arith.negf %69 : vector<8x384xf32>
    %71 = math.exp %70 : vector<8x384xf32>
    %cst_23 = arith.constant 1.000000e+00 : f32
    %72 = vector.broadcast %cst_23 : f32 to vector<8x384xf32>
    %73 = arith.addf %72, %71 : vector<8x384xf32>
    %74 = arith.divf %72, %73 : vector<8x384xf32>
    %75 = vector.extract_strided_slice %74 {offsets = [0, 0], sizes = [8, 128], strides = [1, 1]} : vector<8x384xf32> to vector<8x128xf32>
    %76 = vector.extract_strided_slice %74 {offsets = [0, 128], sizes = [8, 128], strides = [1, 1]} : vector<8x384xf32> to vector<8x128xf32>
    %77 = vector.extract_strided_slice %74 {offsets = [0, 256], sizes = [8, 128], strides = [1, 1]} : vector<8x384xf32> to vector<8x128xf32>
    %78 = vector.extract_strided_slice %68 {offsets = [0, 384], sizes = [8, 128], strides = [1, 1]} : vector<8x512xf32> to vector<8x128xf32>
    %79 = math.tanh %78 : vector<8x128xf32>
    %80 = arith.mulf %76, %56 : vector<8x128xf32>
    %81 = arith.mulf %75, %79 : vector<8x128xf32>
    %82 = arith.addf %80, %81 : vector<8x128xf32>
    %83 = math.tanh %82 : vector<8x128xf32>
    %84 = arith.mulf %77, %83 : vector<8x128xf32>
    %85 = arith.truncf %84 : vector<8x128xf32> to vector<8x128xbf16>
    %86 = arith.index_cast %63 : i32 to index
    %c0_24 = arith.constant 0 : index
    %87 = vector.load %arg12[%86, %c0_24] : memref<64x128xbf16, #tpu.memory_space<vmem>>, vector<8x128xbf16>
    tpu.vector_store %arg12[%86, %c0_24], %85 {strides = array<i32>} : memref<64x128xbf16, #tpu.memory_space<vmem>>, vector<8x128xbf16>,
    %c3_i32 = arith.constant 3 : i32
    %c8_i32_25 = arith.constant 8 : i32
    %88 = arith.muli %c3_i32, %c8_i32_25 : i32
    %89 = tpu.assume_multiple %88, 8 : i32
    %90 = arith.index_cast %89 : i32 to index
    %c0_26 = arith.constant 0 : index
    %91 = vector.load %arg11[%90, %c0_26] : memref<64x512xf32, #tpu.memory_space<vmem>>, vector<8x512xf32>
    %92 = arith.truncf %84 : vector<8x128xf32> to vector<8x128xbf16>
    %cst_27 = arith.constant dense<0.000000e+00> : vector<8x512xf32>
    %93 = tpu.matmul %92, %1, %cst_27 {dimension_numbers = #tpu.dot_dimension_numbers<[1], [0], [0], [1], [0, 0, 1, 1], [], []>} : vector<8x128xbf16>, vector<128x512xbf16>, vector<8x512xf32> -> vector<8x512xf32>
    %94 = arith.addf %91, %93 : vector<8x512xf32>
    %95 = vector.extract_strided_slice %94 {offsets = [0, 0], sizes = [8, 384], strides = [1, 1]} : vector<8x512xf32> to vector<8x384xf32>
    %96 = arith.negf %95 : vector<8x384xf32>
    %97 = math.exp %96 : vector<8x384xf32>
    %cst_28 = arith.constant 1.000000e+00 : f32
    %98 = vector.broadcast %cst_28 : f32 to vector<8x384xf32>
    %99 = arith.addf %98, %97 : vector<8x384xf32>
    %100 = arith.divf %98, %99 : vector<8x384xf32>
    %101 = vector.extract_strided_slice %100 {offsets = [0, 0], sizes = [8, 128], strides = [1, 1]} : vector<8x384xf32> to vector<8x128xf32>
    %102 = vector.extract_strided_slice %100 {offsets = [0, 128], sizes = [8, 128], strides = [1, 1]} : vector<8x384xf32> to vector<8x128xf32>
    %103 = vector.extract_strided_slice %100 {offsets = [0, 256], sizes = [8, 128], strides = [1, 1]} : vector<8x384xf32> to vector<8x128xf32>
    %104 = vector.extract_strided_slice %94 {offsets = [0, 384], sizes = [8, 128], strides = [1, 1]} : vector<8x512xf32> to vector<8x128xf32>
    %105 = math.tanh %104 : vector<8x128xf32>
    %106 = arith.mulf %102, %82 : vector<8x128xf32>
    %107 = arith.mulf %101, %105 : vector<8x128xf32>
    %108 = arith.addf %106, %107 : vector<8x128xf32>
    %109 = math.tanh %108 : vector<8x128xf32>
    %110 = arith.mulf %103, %109 : vector<8x128xf32>
    %111 = arith.truncf %110 : vector<8x128xf32> to vector<8x128xbf16>
    %112 = arith.index_cast %89 : i32 to index
    %c0_29 = arith.constant 0 : index
    %113 = vector.load %arg12[%112, %c0_29] : memref<64x128xbf16, #tpu.memory_space<vmem>>, vector<8x128xbf16>
    tpu.vector_store %arg12[%112, %c0_29], %111 {strides = array<i32>} : memref<64x128xbf16, #tpu.memory_space<vmem>>, vector<8x128xbf16>,
    %c4_i32 = arith.constant 4 : i32
    %c8_i32_30 = arith.constant 8 : i32
    %114 = arith.muli %c4_i32, %c8_i32_30 : i32
    %115 = tpu.assume_multiple %114, 8 : i32
    %116 = arith.index_cast %115 : i32 to index
    %c0_31 = arith.constant 0 : index
    %117 = vector.load %arg11[%116, %c0_31] : memref<64x512xf32, #tpu.memory_space<vmem>>, vector<8x512xf32>
    %118 = arith.truncf %110 : vector<8x128xf32> to vector<8x128xbf16>
    %cst_32 = arith.constant dense<0.000000e+00> : vector<8x512xf32>
    %119 = tpu.matmul %118, %1, %cst_32 {dimension_numbers = #tpu.dot_dimension_numbers<[1], [0], [0], [1], [0, 0, 1, 1], [], []>} : vector<8x128xbf16>, vector<128x512xbf16>, vector<8x512xf32> -> vector<8x512xf32>
    %120 = arith.addf %117, %119 : vector<8x512xf32>
    %121 = vector.extract_strided_slice %120 {offsets = [0, 0], sizes = [8, 384], strides = [1, 1]} : vector<8x512xf32> to vector<8x384xf32>
    %122 = arith.negf %121 : vector<8x384xf32>
    %123 = math.exp %122 : vector<8x384xf32>
    %cst_33 = arith.constant 1.000000e+00 : f32
    %124 = vector.broadcast %cst_33 : f32 to vector<8x384xf32>
    %125 = arith.addf %124, %123 : vector<8x384xf32>
    %126 = arith.divf %124, %125 : vector<8x384xf32>
    %127 = vector.extract_strided_slice %126 {offsets = [0, 0], sizes = [8, 128], strides = [1, 1]} : vector<8x384xf32> to vector<8x128xf32>
    %128 = vector.extract_strided_slice %126 {offsets = [0, 128], sizes = [8, 128], strides = [1, 1]} : vector<8x384xf32> to vector<8x128xf32>
    %129 = vector.extract_strided_slice %126 {offsets = [0, 256], sizes = [8, 128], strides = [1, 1]} : vector<8x384xf32> to vector<8x128xf32>
    %130 = vector.extract_strided_slice %120 {offsets = [0, 384], sizes = [8, 128], strides = [1, 1]} : vector<8x512xf32> to vector<8x128xf32>
    %131 = math.tanh %130 : vector<8x128xf32>
    %132 = arith.mulf %128, %108 : vector<8x128xf32>
    %133 = arith.mulf %127, %131 : vector<8x128xf32>
    %134 = arith.addf %132, %133 : vector<8x128xf32>
    %135 = math.tanh %134 : vector<8x128xf32>
    %136 = arith.mulf %129, %135 : vector<8x128xf32>
    %137 = arith.truncf %136 : vector<8x128xf32> to vector<8x128xbf16>
    %138 = arith.index_cast %115 : i32 to index
    %c0_34 = arith.constant 0 : index
    %139 = vector.load %arg12[%138, %c0_34] : memref<64x128xbf16, #tpu.memory_space<vmem>>, vector<8x128xbf16>
    tpu.vector_store %arg12[%138, %c0_34], %137 {strides = array<i32>} : memref<64x128xbf16, #tpu.memory_space<vmem>>, vector<8x128xbf16>,
    %c5_i32 = arith.constant 5 : i32
    %c8_i32_35 = arith.constant 8 : i32
    %140 = arith.muli %c5_i32, %c8_i32_35 : i32
    %141 = tpu.assume_multiple %140, 8 : i32
    %142 = arith.index_cast %141 : i32 to index
    %c0_36 = arith.constant 0 : index
    %143 = vector.load %arg11[%142, %c0_36] : memref<64x512xf32, #tpu.memory_space<vmem>>, vector<8x512xf32>
    %144 = arith.truncf %136 : vector<8x128xf32> to vector<8x128xbf16>
    %cst_37 = arith.constant dense<0.000000e+00> : vector<8x512xf32>
    %145 = tpu.matmul %144, %1, %cst_37 {dimension_numbers = #tpu.dot_dimension_numbers<[1], [0], [0], [1], [0, 0, 1, 1], [], []>} : vector<8x128xbf16>, vector<128x512xbf16>, vector<8x512xf32> -> vector<8x512xf32>
    %146 = arith.addf %143, %145 : vector<8x512xf32>
    %147 = vector.extract_strided_slice %146 {offsets = [0, 0], sizes = [8, 384], strides = [1, 1]} : vector<8x512xf32> to vector<8x384xf32>
    %148 = arith.negf %147 : vector<8x384xf32>
    %149 = math.exp %148 : vector<8x384xf32>
    %cst_38 = arith.constant 1.000000e+00 : f32
    %150 = vector.broadcast %cst_38 : f32 to vector<8x384xf32>
    %151 = arith.addf %150, %149 : vector<8x384xf32>
    %152 = arith.divf %150, %151 : vector<8x384xf32>
    %153 = vector.extract_strided_slice %152 {offsets = [0, 0], sizes = [8, 128], strides = [1, 1]} : vector<8x384xf32> to vector<8x128xf32>
    %154 = vector.extract_strided_slice %152 {offsets = [0, 128], sizes = [8, 128], strides = [1, 1]} : vector<8x384xf32> to vector<8x128xf32>
    %155 = vector.extract_strided_slice %152 {offsets = [0, 256], sizes = [8, 128], strides = [1, 1]} : vector<8x384xf32> to vector<8x128xf32>
    %156 = vector.extract_strided_slice %146 {offsets = [0, 384], sizes = [8, 128], strides = [1, 1]} : vector<8x512xf32> to vector<8x128xf32>
    %157 = math.tanh %156 : vector<8x128xf32>
    %158 = arith.mulf %154, %134 : vector<8x128xf32>
    %159 = arith.mulf %153, %157 : vector<8x128xf32>
    %160 = arith.addf %158, %159 : vector<8x128xf32>
    %161 = math.tanh %160 : vector<8x128xf32>
    %162 = arith.mulf %155, %161 : vector<8x128xf32>
    %163 = arith.truncf %162 : vector<8x128xf32> to vector<8x128xbf16>
    %164 = arith.index_cast %141 : i32 to index
    %c0_39 = arith.constant 0 : index
    %165 = vector.load %arg12[%164, %c0_39] : memref<64x128xbf16, #tpu.memory_space<vmem>>, vector<8x128xbf16>
    tpu.vector_store %arg12[%164, %c0_39], %163 {strides = array<i32>} : memref<64x128xbf16, #tpu.memory_space<vmem>>, vector<8x128xbf16>,
    %c6_i32 = arith.constant 6 : i32
    %c8_i32_40 = arith.constant 8 : i32
    %166 = arith.muli %c6_i32, %c8_i32_40 : i32
    %167 = tpu.assume_multiple %166, 8 : i32
    %168 = arith.index_cast %167 : i32 to index
    %c0_41 = arith.constant 0 : index
    %169 = vector.load %arg11[%168, %c0_41] : memref<64x512xf32, #tpu.memory_space<vmem>>, vector<8x512xf32>
    %170 = arith.truncf %162 : vector<8x128xf32> to vector<8x128xbf16>
    %cst_42 = arith.constant dense<0.000000e+00> : vector<8x512xf32>
    %171 = tpu.matmul %170, %1, %cst_42 {dimension_numbers = #tpu.dot_dimension_numbers<[1], [0], [0], [1], [0, 0, 1, 1], [], []>} : vector<8x128xbf16>, vector<128x512xbf16>, vector<8x512xf32> -> vector<8x512xf32>
    %172 = arith.addf %169, %171 : vector<8x512xf32>
    %173 = vector.extract_strided_slice %172 {offsets = [0, 0], sizes = [8, 384], strides = [1, 1]} : vector<8x512xf32> to vector<8x384xf32>
    %174 = arith.negf %173 : vector<8x384xf32>
    %175 = math.exp %174 : vector<8x384xf32>
    %cst_43 = arith.constant 1.000000e+00 : f32
    %176 = vector.broadcast %cst_43 : f32 to vector<8x384xf32>
    %177 = arith.addf %176, %175 : vector<8x384xf32>
    %178 = arith.divf %176, %177 : vector<8x384xf32>
    %179 = vector.extract_strided_slice %178 {offsets = [0, 0], sizes = [8, 128], strides = [1, 1]} : vector<8x384xf32> to vector<8x128xf32>
    %180 = vector.extract_strided_slice %178 {offsets = [0, 128], sizes = [8, 128], strides = [1, 1]} : vector<8x384xf32> to vector<8x128xf32>
    %181 = vector.extract_strided_slice %178 {offsets = [0, 256], sizes = [8, 128], strides = [1, 1]} : vector<8x384xf32> to vector<8x128xf32>
    %182 = vector.extract_strided_slice %172 {offsets = [0, 384], sizes = [8, 128], strides = [1, 1]} : vector<8x512xf32> to vector<8x128xf32>
    %183 = math.tanh %182 : vector<8x128xf32>
    %184 = arith.mulf %180, %160 : vector<8x128xf32>
    %185 = arith.mulf %179, %183 : vector<8x128xf32>
    %186 = arith.addf %184, %185 : vector<8x128xf32>
    %187 = math.tanh %186 : vector<8x128xf32>
    %188 = arith.mulf %181, %187 : vector<8x128xf32>
    %189 = arith.truncf %188 : vector<8x128xf32> to vector<8x128xbf16>
    %190 = arith.index_cast %167 : i32 to index
    %c0_44 = arith.constant 0 : index
    %191 = vector.load %arg12[%190, %c0_44] : memref<64x128xbf16, #tpu.memory_space<vmem>>, vector<8x128xbf16>
    tpu.vector_store %arg12[%190, %c0_44], %189 {strides = array<i32>} : memref<64x128xbf16, #tpu.memory_space<vmem>>, vector<8x128xbf16>,
    %c7_i32 = arith.constant 7 : i32
    %c8_i32_45 = arith.constant 8 : i32
    %192 = arith.muli %c7_i32, %c8_i32_45 : i32
    %193 = tpu.assume_multiple %192, 8 : i32
    %194 = arith.index_cast %193 : i32 to index
    %c0_46 = arith.constant 0 : index
    %195 = vector.load %arg11[%194, %c0_46] : memref<64x512xf32, #tpu.memory_space<vmem>>, vector<8x512xf32>
    %196 = arith.truncf %188 : vector<8x128xf32> to vector<8x128xbf16>
    %cst_47 = arith.constant dense<0.000000e+00> : vector<8x512xf32>
    %197 = tpu.matmul %196, %1, %cst_47 {dimension_numbers = #tpu.dot_dimension_numbers<[1], [0], [0], [1], [0, 0, 1, 1], [], []>} : vector<8x128xbf16>, vector<128x512xbf16>, vector<8x512xf32> -> vector<8x512xf32>
    %198 = arith.addf %195, %197 : vector<8x512xf32>
    %199 = vector.extract_strided_slice %198 {offsets = [0, 0], sizes = [8, 384], strides = [1, 1]} : vector<8x512xf32> to vector<8x384xf32>
    %200 = arith.negf %199 : vector<8x384xf32>
    %201 = math.exp %200 : vector<8x384xf32>
    %cst_48 = arith.constant 1.000000e+00 : f32
    %202 = vector.broadcast %cst_48 : f32 to vector<8x384xf32>
    %203 = arith.addf %202, %201 : vector<8x384xf32>
    %204 = arith.divf %202, %203 : vector<8x384xf32>
    %205 = vector.extract_strided_slice %204 {offsets = [0, 0], sizes = [8, 128], strides = [1, 1]} : vector<8x384xf32> to vector<8x128xf32>
    %206 = vector.extract_strided_slice %204 {offsets = [0, 128], sizes = [8, 128], strides = [1, 1]} : vector<8x384xf32> to vector<8x128xf32>
    %207 = vector.extract_strided_slice %204 {offsets = [0, 256], sizes = [8, 128], strides = [1, 1]} : vector<8x384xf32> to vector<8x128xf32>
    %208 = vector.extract_strided_slice %198 {offsets = [0, 384], sizes = [8, 128], strides = [1, 1]} : vector<8x512xf32> to vector<8x128xf32>
    %209 = math.tanh %208 : vector<8x128xf32>
    %210 = arith.mulf %206, %186 : vector<8x128xf32>
    %211 = arith.mulf %205, %209 : vector<8x128xf32>
    %212 = arith.addf %210, %211 : vector<8x128xf32>
    %213 = math.tanh %212 : vector<8x128xf32>
    %214 = arith.mulf %207, %213 : vector<8x128xf32>
    %215 = arith.truncf %214 : vector<8x128xf32> to vector<8x128xbf16>
    %216 = arith.index_cast %193 : i32 to index
    %c0_49 = arith.constant 0 : index
    %217 = vector.load %arg12[%216, %c0_49] : memref<64x128xbf16, #tpu.memory_space<vmem>>, vector<8x128xbf16>
    tpu.vector_store %arg12[%216, %c0_49], %215 {strides = array<i32>} : memref<64x128xbf16, #tpu.memory_space<vmem>>, vector<8x128xbf16>,
    %c8_i32_50 = arith.constant 8 : i32
    %c0_51 = arith.constant 0 : index
    %c0_52 = arith.constant 0 : index
    %218 = vector.load %arg12[%c0_51, %c0_52] : memref<64x128xbf16, #tpu.memory_space<vmem>>, vector<64x128xbf16>
    %c0_53 = arith.constant 0 : index
    %c0_54 = arith.constant 0 : index
    %219 = vector.load %arg6[%c0_53, %c0_54] : memref<128x512xbf16, #tpu.memory_space<vmem>>, vector<128x512xbf16>
    %c0_55 = arith.constant 0 : index
    %c0_56 = arith.constant 0 : index
    %220 = vector.load %arg5[%c0_55, %c0_56] : memref<128x512xbf16, #tpu.memory_space<vmem>>, vector<128x512xbf16>
    %cst_57 = arith.constant dense<0.000000e+00> : vector<64x512xf32>
    %221 = tpu.matmul %218, %220, %cst_57 {dimension_numbers = #tpu.dot_dimension_numbers<[1], [0], [0], [1], [0, 0, 1, 1], [], []>} : vector<64x128xbf16>, vector<128x512xbf16>, vector<64x512xf32> -> vector<64x512xf32>
    %c0_58 = arith.constant 0 : index
    %c0_59 = arith.constant 0 : index
    %222 = vector.load %arg7[%c0_58, %c0_59] : memref<1x512xf32, #tpu.memory_space<vmem>>, vector<1x512xf32>
    %223 = vector.broadcast %222 : vector<1x512xf32> to vector<64x512xf32>
    %224 = arith.addf %221, %223 : vector<64x512xf32>
    %c0_60 = arith.constant 0 : index
    %c0_61 = arith.constant 0 : index
    %225 = vector.load %arg11[%c0_60, %c0_61] : memref<64x512xf32, #tpu.memory_space<vmem>>, vector<64x512xf32>
    tpu.vector_store %arg11[%c0_60, %c0_61], %224 {strides = array<i32>} : memref<64x512xf32, #tpu.memory_space<vmem>>, vector<64x512xf32>,
    %cst_62 = arith.constant 0.000000e+00 : f32
    %226 = vector.broadcast %cst_62 : f32 to vector<8x128xf32>
    %cst_63 = arith.constant 0.000000e+00 : f32
    %227 = vector.broadcast %cst_63 : f32 to vector<8x128xf32>
    %c0_i32_64 = arith.constant 0 : i32
    %c8_i32_65 = arith.constant 8 : i32
    %228 = arith.muli %c0_i32_64, %c8_i32_65 : i32
    %229 = tpu.assume_multiple %228, 8 : i32
    %230 = arith.index_cast %229 : i32 to index
    %c0_66 = arith.constant 0 : index
    %231 = vector.load %arg11[%230, %c0_66] : memref<64x512xf32, #tpu.memory_space<vmem>>, vector<8x512xf32>
    %232 = arith.truncf %226 : vector<8x128xf32> to vector<8x128xbf16>
    %cst_67 = arith.constant dense<0.000000e+00> : vector<8x512xf32>
    %233 = tpu.matmul %232, %219, %cst_67 {dimension_numbers = #tpu.dot_dimension_numbers<[1], [0], [0], [1], [0, 0, 1, 1], [], []>} : vector<8x128xbf16>, vector<128x512xbf16>, vector<8x512xf32> -> vector<8x512xf32>
    %234 = arith.addf %231, %233 : vector<8x512xf32>
    %235 = vector.extract_strided_slice %234 {offsets = [0, 0], sizes = [8, 384], strides = [1, 1]} : vector<8x512xf32> to vector<8x384xf32>
    %236 = arith.negf %235 : vector<8x384xf32>
    %237 = math.exp %236 : vector<8x384xf32>
    %cst_68 = arith.constant 1.000000e+00 : f32
    %238 = vector.broadcast %cst_68 : f32 to vector<8x384xf32>
    %239 = arith.addf %238, %237 : vector<8x384xf32>
    %240 = arith.divf %238, %239 : vector<8x384xf32>
    %241 = vector.extract_strided_slice %240 {offsets = [0, 0], sizes = [8, 128], strides = [1, 1]} : vector<8x384xf32> to vector<8x128xf32>
    %242 = vector.extract_strided_slice %240 {offsets = [0, 128], sizes = [8, 128], strides = [1, 1]} : vector<8x384xf32> to vector<8x128xf32>
    %243 = vector.extract_strided_slice %240 {offsets = [0, 256], sizes = [8, 128], strides = [1, 1]} : vector<8x384xf32> to vector<8x128xf32>
    %244 = vector.extract_strided_slice %234 {offsets = [0, 384], sizes = [8, 128], strides = [1, 1]} : vector<8x512xf32> to vector<8x128xf32>
    %245 = math.tanh %244 : vector<8x128xf32>
    %246 = arith.mulf %242, %227 : vector<8x128xf32>
    %247 = arith.mulf %241, %245 : vector<8x128xf32>
    %248 = arith.addf %246, %247 : vector<8x128xf32>
    %249 = math.tanh %248 : vector<8x128xf32>
    %250 = arith.mulf %243, %249 : vector<8x128xf32>
    %251 = arith.truncf %250 : vector<8x128xf32> to vector<8x128xbf16>
    %252 = arith.index_cast %229 : i32 to index
    %c0_69 = arith.constant 0 : index
    %253 = vector.load %arg12[%252, %c0_69] : memref<64x128xbf16, #tpu.memory_space<vmem>>, vector<8x128xbf16>
    tpu.vector_store %arg12[%252, %c0_69], %251 {strides = array<i32>} : memref<64x128xbf16, #tpu.memory_space<vmem>>, vector<8x128xbf16>,
    %c1_i32_70 = arith.constant 1 : i32
    %c8_i32_71 = arith.constant 8 : i32
    %254 = arith.muli %c1_i32_70, %c8_i32_71 : i32
    %255 = tpu.assume_multiple %254, 8 : i32
    %256 = arith.index_cast %255 : i32 to index
    %c0_72 = arith.constant 0 : index
    %257 = vector.load %arg11[%256, %c0_72] : memref<64x512xf32, #tpu.memory_space<vmem>>, vector<8x512xf32>
    %258 = arith.truncf %250 : vector<8x128xf32> to vector<8x128xbf16>
    %cst_73 = arith.constant dense<0.000000e+00> : vector<8x512xf32>
    %259 = tpu.matmul %258, %219, %cst_73 {dimension_numbers = #tpu.dot_dimension_numbers<[1], [0], [0], [1], [0, 0, 1, 1], [], []>} : vector<8x128xbf16>, vector<128x512xbf16>, vector<8x512xf32> -> vector<8x512xf32>
    %260 = arith.addf %257, %259 : vector<8x512xf32>
    %261 = vector.extract_strided_slice %260 {offsets = [0, 0], sizes = [8, 384], strides = [1, 1]} : vector<8x512xf32> to vector<8x384xf32>
    %262 = arith.negf %261 : vector<8x384xf32>
    %263 = math.exp %262 : vector<8x384xf32>
    %cst_74 = arith.constant 1.000000e+00 : f32
    %264 = vector.broadcast %cst_74 : f32 to vector<8x384xf32>
    %265 = arith.addf %264, %263 : vector<8x384xf32>
    %266 = arith.divf %264, %265 : vector<8x384xf32>
    %267 = vector.extract_strided_slice %266 {offsets = [0, 0], sizes = [8, 128], strides = [1, 1]} : vector<8x384xf32> to vector<8x128xf32>
    %268 = vector.extract_strided_slice %266 {offsets = [0, 128], sizes = [8, 128], strides = [1, 1]} : vector<8x384xf32> to vector<8x128xf32>
    %269 = vector.extract_strided_slice %266 {offsets = [0, 256], sizes = [8, 128], strides = [1, 1]} : vector<8x384xf32> to vector<8x128xf32>
    %270 = vector.extract_strided_slice %260 {offsets = [0, 384], sizes = [8, 128], strides = [1, 1]} : vector<8x512xf32> to vector<8x128xf32>
    %271 = math.tanh %270 : vector<8x128xf32>
    %272 = arith.mulf %268, %248 : vector<8x128xf32>
    %273 = arith.mulf %267, %271 : vector<8x128xf32>
    %274 = arith.addf %272, %273 : vector<8x128xf32>
    %275 = math.tanh %274 : vector<8x128xf32>
    %276 = arith.mulf %269, %275 : vector<8x128xf32>
    %277 = arith.truncf %276 : vector<8x128xf32> to vector<8x128xbf16>
    %278 = arith.index_cast %255 : i32 to index
    %c0_75 = arith.constant 0 : index
    %279 = vector.load %arg12[%278, %c0_75] : memref<64x128xbf16, #tpu.memory_space<vmem>>, vector<8x128xbf16>
    tpu.vector_store %arg12[%278, %c0_75], %277 {strides = array<i32>} : memref<64x128xbf16, #tpu.memory_space<vmem>>, vector<8x128xbf16>,
    %c2_i32_76 = arith.constant 2 : i32
    %c8_i32_77 = arith.constant 8 : i32
    %280 = arith.muli %c2_i32_76, %c8_i32_77 : i32
    %281 = tpu.assume_multiple %280, 8 : i32
    %282 = arith.index_cast %281 : i32 to index
    %c0_78 = arith.constant 0 : index
    %283 = vector.load %arg11[%282, %c0_78] : memref<64x512xf32, #tpu.memory_space<vmem>>, vector<8x512xf32>
    %284 = arith.truncf %276 : vector<8x128xf32> to vector<8x128xbf16>
    %cst_79 = arith.constant dense<0.000000e+00> : vector<8x512xf32>
    %285 = tpu.matmul %284, %219, %cst_79 {dimension_numbers = #tpu.dot_dimension_numbers<[1], [0], [0], [1], [0, 0, 1, 1], [], []>} : vector<8x128xbf16>, vector<128x512xbf16>, vector<8x512xf32> -> vector<8x512xf32>
    %286 = arith.addf %283, %285 : vector<8x512xf32>
    %287 = vector.extract_strided_slice %286 {offsets = [0, 0], sizes = [8, 384], strides = [1, 1]} : vector<8x512xf32> to vector<8x384xf32>
    %288 = arith.negf %287 : vector<8x384xf32>
    %289 = math.exp %288 : vector<8x384xf32>
    %cst_80 = arith.constant 1.000000e+00 : f32
    %290 = vector.broadcast %cst_80 : f32 to vector<8x384xf32>
    %291 = arith.addf %290, %289 : vector<8x384xf32>
    %292 = arith.divf %290, %291 : vector<8x384xf32>
    %293 = vector.extract_strided_slice %292 {offsets = [0, 0], sizes = [8, 128], strides = [1, 1]} : vector<8x384xf32> to vector<8x128xf32>
    %294 = vector.extract_strided_slice %292 {offsets = [0, 128], sizes = [8, 128], strides = [1, 1]} : vector<8x384xf32> to vector<8x128xf32>
    %295 = vector.extract_strided_slice %292 {offsets = [0, 256], sizes = [8, 128], strides = [1, 1]} : vector<8x384xf32> to vector<8x128xf32>
    %296 = vector.extract_strided_slice %286 {offsets = [0, 384], sizes = [8, 128], strides = [1, 1]} : vector<8x512xf32> to vector<8x128xf32>
    %297 = math.tanh %296 : vector<8x128xf32>
    %298 = arith.mulf %294, %274 : vector<8x128xf32>
    %299 = arith.mulf %293, %297 : vector<8x128xf32>
    %300 = arith.addf %298, %299 : vector<8x128xf32>
    %301 = math.tanh %300 : vector<8x128xf32>
    %302 = arith.mulf %295, %301 : vector<8x128xf32>
    %303 = arith.truncf %302 : vector<8x128xf32> to vector<8x128xbf16>
    %304 = arith.index_cast %281 : i32 to index
    %c0_81 = arith.constant 0 : index
    %305 = vector.load %arg12[%304, %c0_81] : memref<64x128xbf16, #tpu.memory_space<vmem>>, vector<8x128xbf16>
    tpu.vector_store %arg12[%304, %c0_81], %303 {strides = array<i32>} : memref<64x128xbf16, #tpu.memory_space<vmem>>, vector<8x128xbf16>,
    %c3_i32_82 = arith.constant 3 : i32
    %c8_i32_83 = arith.constant 8 : i32
    %306 = arith.muli %c3_i32_82, %c8_i32_83 : i32
    %307 = tpu.assume_multiple %306, 8 : i32
    %308 = arith.index_cast %307 : i32 to index
    %c0_84 = arith.constant 0 : index
    %309 = vector.load %arg11[%308, %c0_84] : memref<64x512xf32, #tpu.memory_space<vmem>>, vector<8x512xf32>
    %310 = arith.truncf %302 : vector<8x128xf32> to vector<8x128xbf16>
    %cst_85 = arith.constant dense<0.000000e+00> : vector<8x512xf32>
    %311 = tpu.matmul %310, %219, %cst_85 {dimension_numbers = #tpu.dot_dimension_numbers<[1], [0], [0], [1], [0, 0, 1, 1], [], []>} : vector<8x128xbf16>, vector<128x512xbf16>, vector<8x512xf32> -> vector<8x512xf32>
    %312 = arith.addf %309, %311 : vector<8x512xf32>
    %313 = vector.extract_strided_slice %312 {offsets = [0, 0], sizes = [8, 384], strides = [1, 1]} : vector<8x512xf32> to vector<8x384xf32>
    %314 = arith.negf %313 : vector<8x384xf32>
    %315 = math.exp %314 : vector<8x384xf32>
    %cst_86 = arith.constant 1.000000e+00 : f32
    %316 = vector.broadcast %cst_86 : f32 to vector<8x384xf32>
    %317 = arith.addf %316, %315 : vector<8x384xf32>
    %318 = arith.divf %316, %317 : vector<8x384xf32>
    %319 = vector.extract_strided_slice %318 {offsets = [0, 0], sizes = [8, 128], strides = [1, 1]} : vector<8x384xf32> to vector<8x128xf32>
    %320 = vector.extract_strided_slice %318 {offsets = [0, 128], sizes = [8, 128], strides = [1, 1]} : vector<8x384xf32> to vector<8x128xf32>
    %321 = vector.extract_strided_slice %318 {offsets = [0, 256], sizes = [8, 128], strides = [1, 1]} : vector<8x384xf32> to vector<8x128xf32>
    %322 = vector.extract_strided_slice %312 {offsets = [0, 384], sizes = [8, 128], strides = [1, 1]} : vector<8x512xf32> to vector<8x128xf32>
    %323 = math.tanh %322 : vector<8x128xf32>
    %324 = arith.mulf %320, %300 : vector<8x128xf32>
    %325 = arith.mulf %319, %323 : vector<8x128xf32>
    %326 = arith.addf %324, %325 : vector<8x128xf32>
    %327 = math.tanh %326 : vector<8x128xf32>
    %328 = arith.mulf %321, %327 : vector<8x128xf32>
    %329 = arith.truncf %328 : vector<8x128xf32> to vector<8x128xbf16>
    %330 = arith.index_cast %307 : i32 to index
    %c0_87 = arith.constant 0 : index
    %331 = vector.load %arg12[%330, %c0_87] : memref<64x128xbf16, #tpu.memory_space<vmem>>, vector<8x128xbf16>
    tpu.vector_store %arg12[%330, %c0_87], %329 {strides = array<i32>} : memref<64x128xbf16, #tpu.memory_space<vmem>>, vector<8x128xbf16>,
    %c4_i32_88 = arith.constant 4 : i32
    %c8_i32_89 = arith.constant 8 : i32
    %332 = arith.muli %c4_i32_88, %c8_i32_89 : i32
    %333 = tpu.assume_multiple %332, 8 : i32
    %334 = arith.index_cast %333 : i32 to index
    %c0_90 = arith.constant 0 : index
    %335 = vector.load %arg11[%334, %c0_90] : memref<64x512xf32, #tpu.memory_space<vmem>>, vector<8x512xf32>
    %336 = arith.truncf %328 : vector<8x128xf32> to vector<8x128xbf16>
    %cst_91 = arith.constant dense<0.000000e+00> : vector<8x512xf32>
    %337 = tpu.matmul %336, %219, %cst_91 {dimension_numbers = #tpu.dot_dimension_numbers<[1], [0], [0], [1], [0, 0, 1, 1], [], []>} : vector<8x128xbf16>, vector<128x512xbf16>, vector<8x512xf32> -> vector<8x512xf32>
    %338 = arith.addf %335, %337 : vector<8x512xf32>
    %339 = vector.extract_strided_slice %338 {offsets = [0, 0], sizes = [8, 384], strides = [1, 1]} : vector<8x512xf32> to vector<8x384xf32>
    %340 = arith.negf %339 : vector<8x384xf32>
    %341 = math.exp %340 : vector<8x384xf32>
    %cst_92 = arith.constant 1.000000e+00 : f32
    %342 = vector.broadcast %cst_92 : f32 to vector<8x384xf32>
    %343 = arith.addf %342, %341 : vector<8x384xf32>
    %344 = arith.divf %342, %343 : vector<8x384xf32>
    %345 = vector.extract_strided_slice %344 {offsets = [0, 0], sizes = [8, 128], strides = [1, 1]} : vector<8x384xf32> to vector<8x128xf32>
    %346 = vector.extract_strided_slice %344 {offsets = [0, 128], sizes = [8, 128], strides = [1, 1]} : vector<8x384xf32> to vector<8x128xf32>
    %347 = vector.extract_strided_slice %344 {offsets = [0, 256], sizes = [8, 128], strides = [1, 1]} : vector<8x384xf32> to vector<8x128xf32>
    %348 = vector.extract_strided_slice %338 {offsets = [0, 384], sizes = [8, 128], strides = [1, 1]} : vector<8x512xf32> to vector<8x128xf32>
    %349 = math.tanh %348 : vector<8x128xf32>
    %350 = arith.mulf %346, %326 : vector<8x128xf32>
    %351 = arith.mulf %345, %349 : vector<8x128xf32>
    %352 = arith.addf %350, %351 : vector<8x128xf32>
    %353 = math.tanh %352 : vector<8x128xf32>
    %354 = arith.mulf %347, %353 : vector<8x128xf32>
    %355 = arith.truncf %354 : vector<8x128xf32> to vector<8x128xbf16>
    %356 = arith.index_cast %333 : i32 to index
    %c0_93 = arith.constant 0 : index
    %357 = vector.load %arg12[%356, %c0_93] : memref<64x128xbf16, #tpu.memory_space<vmem>>, vector<8x128xbf16>
    tpu.vector_store %arg12[%356, %c0_93], %355 {strides = array<i32>} : memref<64x128xbf16, #tpu.memory_space<vmem>>, vector<8x128xbf16>,
    %c5_i32_94 = arith.constant 5 : i32
    %c8_i32_95 = arith.constant 8 : i32
    %358 = arith.muli %c5_i32_94, %c8_i32_95 : i32
    %359 = tpu.assume_multiple %358, 8 : i32
    %360 = arith.index_cast %359 : i32 to index
    %c0_96 = arith.constant 0 : index
    %361 = vector.load %arg11[%360, %c0_96] : memref<64x512xf32, #tpu.memory_space<vmem>>, vector<8x512xf32>
    %362 = arith.truncf %354 : vector<8x128xf32> to vector<8x128xbf16>
    %cst_97 = arith.constant dense<0.000000e+00> : vector<8x512xf32>
    %363 = tpu.matmul %362, %219, %cst_97 {dimension_numbers = #tpu.dot_dimension_numbers<[1], [0], [0], [1], [0, 0, 1, 1], [], []>} : vector<8x128xbf16>, vector<128x512xbf16>, vector<8x512xf32> -> vector<8x512xf32>
    %364 = arith.addf %361, %363 : vector<8x512xf32>
    %365 = vector.extract_strided_slice %364 {offsets = [0, 0], sizes = [8, 384], strides = [1, 1]} : vector<8x512xf32> to vector<8x384xf32>
    %366 = arith.negf %365 : vector<8x384xf32>
    %367 = math.exp %366 : vector<8x384xf32>
    %cst_98 = arith.constant 1.000000e+00 : f32
    %368 = vector.broadcast %cst_98 : f32 to vector<8x384xf32>
    %369 = arith.addf %368, %367 : vector<8x384xf32>
    %370 = arith.divf %368, %369 : vector<8x384xf32>
    %371 = vector.extract_strided_slice %370 {offsets = [0, 0], sizes = [8, 128], strides = [1, 1]} : vector<8x384xf32> to vector<8x128xf32>
    %372 = vector.extract_strided_slice %370 {offsets = [0, 128], sizes = [8, 128], strides = [1, 1]} : vector<8x384xf32> to vector<8x128xf32>
    %373 = vector.extract_strided_slice %370 {offsets = [0, 256], sizes = [8, 128], strides = [1, 1]} : vector<8x384xf32> to vector<8x128xf32>
    %374 = vector.extract_strided_slice %364 {offsets = [0, 384], sizes = [8, 128], strides = [1, 1]} : vector<8x512xf32> to vector<8x128xf32>
    %375 = math.tanh %374 : vector<8x128xf32>
    %376 = arith.mulf %372, %352 : vector<8x128xf32>
    %377 = arith.mulf %371, %375 : vector<8x128xf32>
    %378 = arith.addf %376, %377 : vector<8x128xf32>
    %379 = math.tanh %378 : vector<8x128xf32>
    %380 = arith.mulf %373, %379 : vector<8x128xf32>
    %381 = arith.truncf %380 : vector<8x128xf32> to vector<8x128xbf16>
    %382 = arith.index_cast %359 : i32 to index
    %c0_99 = arith.constant 0 : index
    %383 = vector.load %arg12[%382, %c0_99] : memref<64x128xbf16, #tpu.memory_space<vmem>>, vector<8x128xbf16>
    tpu.vector_store %arg12[%382, %c0_99], %381 {strides = array<i32>} : memref<64x128xbf16, #tpu.memory_space<vmem>>, vector<8x128xbf16>,
    %c6_i32_100 = arith.constant 6 : i32
    %c8_i32_101 = arith.constant 8 : i32
    %384 = arith.muli %c6_i32_100, %c8_i32_101 : i32
    %385 = tpu.assume_multiple %384, 8 : i32
    %386 = arith.index_cast %385 : i32 to index
    %c0_102 = arith.constant 0 : index
    %387 = vector.load %arg11[%386, %c0_102] : memref<64x512xf32, #tpu.memory_space<vmem>>, vector<8x512xf32>
    %388 = arith.truncf %380 : vector<8x128xf32> to vector<8x128xbf16>
    %cst_103 = arith.constant dense<0.000000e+00> : vector<8x512xf32>
    %389 = tpu.matmul %388, %219, %cst_103 {dimension_numbers = #tpu.dot_dimension_numbers<[1], [0], [0], [1], [0, 0, 1, 1], [], []>} : vector<8x128xbf16>, vector<128x512xbf16>, vector<8x512xf32> -> vector<8x512xf32>
    %390 = arith.addf %387, %389 : vector<8x512xf32>
    %391 = vector.extract_strided_slice %390 {offsets = [0, 0], sizes = [8, 384], strides = [1, 1]} : vector<8x512xf32> to vector<8x384xf32>
    %392 = arith.negf %391 : vector<8x384xf32>
    %393 = math.exp %392 : vector<8x384xf32>
    %cst_104 = arith.constant 1.000000e+00 : f32
    %394 = vector.broadcast %cst_104 : f32 to vector<8x384xf32>
    %395 = arith.addf %394, %393 : vector<8x384xf32>
    %396 = arith.divf %394, %395 : vector<8x384xf32>
    %397 = vector.extract_strided_slice %396 {offsets = [0, 0], sizes = [8, 128], strides = [1, 1]} : vector<8x384xf32> to vector<8x128xf32>
    %398 = vector.extract_strided_slice %396 {offsets = [0, 128], sizes = [8, 128], strides = [1, 1]} : vector<8x384xf32> to vector<8x128xf32>
    %399 = vector.extract_strided_slice %396 {offsets = [0, 256], sizes = [8, 128], strides = [1, 1]} : vector<8x384xf32> to vector<8x128xf32>
    %400 = vector.extract_strided_slice %390 {offsets = [0, 384], sizes = [8, 128], strides = [1, 1]} : vector<8x512xf32> to vector<8x128xf32>
    %401 = math.tanh %400 : vector<8x128xf32>
    %402 = arith.mulf %398, %378 : vector<8x128xf32>
    %403 = arith.mulf %397, %401 : vector<8x128xf32>
    %404 = arith.addf %402, %403 : vector<8x128xf32>
    %405 = math.tanh %404 : vector<8x128xf32>
    %406 = arith.mulf %399, %405 : vector<8x128xf32>
    %407 = arith.truncf %406 : vector<8x128xf32> to vector<8x128xbf16>
    %408 = arith.index_cast %385 : i32 to index
    %c0_105 = arith.constant 0 : index
    %409 = vector.load %arg12[%408, %c0_105] : memref<64x128xbf16, #tpu.memory_space<vmem>>, vector<8x128xbf16>
    tpu.vector_store %arg12[%408, %c0_105], %407 {strides = array<i32>} : memref<64x128xbf16, #tpu.memory_space<vmem>>, vector<8x128xbf16>,
    %c7_i32_106 = arith.constant 7 : i32
    %c8_i32_107 = arith.constant 8 : i32
    %410 = arith.muli %c7_i32_106, %c8_i32_107 : i32
    %411 = tpu.assume_multiple %410, 8 : i32
    %412 = arith.index_cast %411 : i32 to index
    %c0_108 = arith.constant 0 : index
    %413 = vector.load %arg11[%412, %c0_108] : memref<64x512xf32, #tpu.memory_space<vmem>>, vector<8x512xf32>
    %414 = arith.truncf %406 : vector<8x128xf32> to vector<8x128xbf16>
    %cst_109 = arith.constant dense<0.000000e+00> : vector<8x512xf32>
    %415 = tpu.matmul %414, %219, %cst_109 {dimension_numbers = #tpu.dot_dimension_numbers<[1], [0], [0], [1], [0, 0, 1, 1], [], []>} : vector<8x128xbf16>, vector<128x512xbf16>, vector<8x512xf32> -> vector<8x512xf32>
    %416 = arith.addf %413, %415 : vector<8x512xf32>
    %417 = vector.extract_strided_slice %416 {offsets = [0, 0], sizes = [8, 384], strides = [1, 1]} : vector<8x512xf32> to vector<8x384xf32>
    %418 = arith.negf %417 : vector<8x384xf32>
    %419 = math.exp %418 : vector<8x384xf32>
    %cst_110 = arith.constant 1.000000e+00 : f32
    %420 = vector.broadcast %cst_110 : f32 to vector<8x384xf32>
    %421 = arith.addf %420, %419 : vector<8x384xf32>
    %422 = arith.divf %420, %421 : vector<8x384xf32>
    %423 = vector.extract_strided_slice %422 {offsets = [0, 0], sizes = [8, 128], strides = [1, 1]} : vector<8x384xf32> to vector<8x128xf32>
    %424 = vector.extract_strided_slice %422 {offsets = [0, 128], sizes = [8, 128], strides = [1, 1]} : vector<8x384xf32> to vector<8x128xf32>
    %425 = vector.extract_strided_slice %422 {offsets = [0, 256], sizes = [8, 128], strides = [1, 1]} : vector<8x384xf32> to vector<8x128xf32>
    %426 = vector.extract_strided_slice %416 {offsets = [0, 384], sizes = [8, 128], strides = [1, 1]} : vector<8x512xf32> to vector<8x128xf32>
    %427 = math.tanh %426 : vector<8x128xf32>
    %428 = arith.mulf %424, %404 : vector<8x128xf32>
    %429 = arith.mulf %423, %427 : vector<8x128xf32>
    %430 = arith.addf %428, %429 : vector<8x128xf32>
    %431 = math.tanh %430 : vector<8x128xf32>
    %432 = arith.mulf %425, %431 : vector<8x128xf32>
    %433 = arith.truncf %432 : vector<8x128xf32> to vector<8x128xbf16>
    %434 = arith.index_cast %411 : i32 to index
    %c0_111 = arith.constant 0 : index
    %435 = vector.load %arg12[%434, %c0_111] : memref<64x128xbf16, #tpu.memory_space<vmem>>, vector<8x128xbf16>
    tpu.vector_store %arg12[%434, %c0_111], %433 {strides = array<i32>} : memref<64x128xbf16, #tpu.memory_space<vmem>>, vector<8x128xbf16>,
    %c8_i32_112 = arith.constant 8 : i32
    %c0_113 = arith.constant 0 : index
    %c0_114 = arith.constant 0 : index
    %436 = vector.load %arg12[%c0_113, %c0_114] : memref<64x128xbf16, #tpu.memory_space<vmem>>, vector<64x128xbf16>
    %c0_115 = arith.constant 0 : index
    %c0_116 = arith.constant 0 : index
    %437 = vector.load %arg8[%c0_115, %c0_116] : memref<128x128xbf16, #tpu.memory_space<vmem>>, vector<128x128xbf16>
    %cst_117 = arith.constant dense<0.000000e+00> : vector<64x128xf32>
    %438 = tpu.matmul %436, %437, %cst_117 {dimension_numbers = #tpu.dot_dimension_numbers<[1], [0], [0], [1], [0, 0, 1, 1], [], []>} : vector<64x128xbf16>, vector<128x128xbf16>, vector<64x128xf32> -> vector<64x128xf32>
    %c0_118 = arith.constant 0 : index
    %c0_119 = arith.constant 0 : index
    %439 = vector.load %arg9[%c0_118, %c0_119] : memref<1x128xf32, #tpu.memory_space<vmem>>, vector<1x128xf32>
    %440 = vector.broadcast %439 : vector<1x128xf32> to vector<64x128xf32>
    %441 = arith.addf %438, %440 : vector<64x128xf32>
    %c0_120 = arith.constant 0 : index
    %c0_121 = arith.constant 0 : index
    %442 = vector.load %arg10[%c0_120, %c0_121] : memref<64x128xf32, #tpu.memory_space<vmem>>, vector<64x128xf32>
    tpu.vector_store %arg10[%c0_120, %c0_121], %441 {strides = array<i32>} : memref<64x128xf32, #tpu.memory_space<vmem>>, vector<64x128xf32>,
    return
  }
  func.func @transform_0(%arg0: i32) -> (i32, i32) {
    %c0_i32 = arith.constant 0 : i32
    %c0_i32_0 = arith.constant 0 : i32
    return %arg0, %c0_i32 : i32, i32
  }
  func.func @transform_1(%arg0: i32) -> (i32, i32) {
    %c0_i32 = arith.constant 0 : i32
    %c0_i32_0 = arith.constant 0 : i32
    %c0_i32_1 = arith.constant 0 : i32
    return %c0_i32, %c0_i32_0 : i32, i32
  }
  func.func @transform_2(%arg0: i32) -> (i32, i32) {
    %c0_i32 = arith.constant 0 : i32
    %c0_i32_0 = arith.constant 0 : i32
    %c0_i32_1 = arith.constant 0 : i32
    return %c0_i32, %c0_i32_0 : i32, i32
  }
  func.func @transform_3(%arg0: i32) -> (i32, i32) {
    %c0_i32 = arith.constant 0 : i32
    %c0_i32_0 = arith.constant 0 : i32
    %c0_i32_1 = arith.constant 0 : i32
    return %c0_i32, %c0_i32_0 : i32, i32
  }
  func.func @transform_4(%arg0: i32) -> (i32, i32) {
    %c0_i32 = arith.constant 0 : i32
    %c0_i32_0 = arith.constant 0 : i32
    %c0_i32_1 = arith.constant 0 : i32
    return %c0_i32, %c0_i32_0 : i32, i32
  }
  func.func @transform_5(%arg0: i32) -> (i32, i32) {
    %c0_i32 = arith.constant 0 : i32
    %c0_i32_0 = arith.constant 0 : i32
    %c0_i32_1 = arith.constant 0 : i32
    return %c0_i32, %c0_i32_0 : i32, i32
  }
  func.func @transform_6(%arg0: i32) -> (i32, i32) {
    %c0_i32 = arith.constant 0 : i32
    %c0_i32_0 = arith.constant 0 : i32
    %c0_i32_1 = arith.constant 0 : i32
    return %c0_i32, %c0_i32_0 : i32, i32
  }
  func.func @transform_7(%arg0: i32) -> (i32, i32) {
    %c0_i32 = arith.constant 0 : i32
    %c0_i32_0 = arith.constant 0 : i32
    %c0_i32_1 = arith.constant 0 : i32
    return %c0_i32, %c0_i32_0 : i32, i32
  }
  func.func @transform_8(%arg0: i32) -> (i32, i32) {
    %c0_i32 = arith.constant 0 : i32
    %c0_i32_0 = arith.constant 0 : i32
    %c0_i32_1 = arith.constant 0 : i32
    return %c0_i32, %c0_i32_0 : i32, i32
  }
  func.func @transform_9(%arg0: i32) -> (i32, i32) {
    %c0_i32 = arith.constant 0 : i32
    %c0_i32_0 = arith.constant 0 : i32
    return %arg0, %c0_i32 : i32, i32
  }
}

</mosaic_0001>

<bundles_post_ra>
// kernel: lstm_model_forward.1
= control target key start
LH: loop header
LB: loop body
LE: loop exit
PB: predicated region body
PF: predicated region fallthrough
CT: control target
= control target key end

     0   :  { %14 = vsyncpa [#allocation5], 0  ;;  %s5334_s0 = inlined_call_operand.vmem [shape: bf16[64,4], index: 0, kind: input, shape index: {}]   ;;  %s5335_s1 = inlined_call_operand.hbm [shape: bf16[4,512], index: 1, kind: input, shape index: {}]   ;;  %s5336_s2 = inlined_call_operand.hbm [shape: bf16[128,512], index: 2, kind: input, shape index: {}]   ;;  %s5337_s3 = inlined_call_operand.vmem [shape: f32[1,512], index: 3, kind: input, shape index: {}]   ;;  %s5338_s4 = inlined_call_operand.hbm [shape: bf16[128,512], index: 4, kind: input, shape index: {}]   ;;  %s5339_s5 = inlined_call_operand.hbm [shape: bf16[128,512], index: 5, kind: input, shape index: {}]   ;;  %s5340_s6 = inlined_call_operand.hbm [shape: f32[1,512], index: 6, kind: input, shape index: {}]   ;;  %s5341_s7 = inlined_call_operand.vmem [shape: bf16[128,128], index: 7, kind: input, shape index: {}]   ;;  %s5342_s8 = inlined_call_operand.vmem [shape: f32[1,128], index: 8, kind: input, shape index: {}]   ;;  %s5343_s9 = inlined_call_operand.vmem [shape: f32[64,128], index: 9, kind: output, shape index: {}]  }
   0x1   :  { %15 = vsyncpa [#allocation7], 0 }
   0x2   :  { %16 = vsyncpa [#allocation10], 0  ;;  %s4066_s30 = smov [#allocation6]  }
   0x3   :  { %s34_s10 = sshll.u32 %s4066_s30, 4  ;;  %s35_s10 = int_to_ptr.vmem [resolvable:$true] %s34_s10 }
   0x4   :  { %s3968_s11 = scalar_lea.vmem %s35_s10, 4096  ;;  %p3973_p1 = scmp.lt.s32.totalorder %s35_s10, %s35_s10 }
   0x5   :  { %p3969_p0 = scmp.ne.s32.totalorder %s35_s10, %s3968_s11  ;;  %p3974_p2 = scmp.lt.s32.totalorder %s3968_s11, %s3968_s11 }
   0x7   :  { %p3975_p3 = por %p3974_p2, %p3973_p1 }
   0x9   :  { %p3976_p4 = pnand %p3975_p3, %p3969_p0 }
   0xb   :  { %3979 = shalt.err (!%p3976_p4)
}
   0xc   :  { %s4067_s12 = smov 256   ;;  %s4068_s13 = smov 16  }
   0xd   :  { %40 = dma.hbm_to_vmem [thread:$0]  %s5336_s2, 4096, %s35_s10, [#allocation7], %s4067_s12, %s4067_s12, %s4068_s13  }
   0xe   :  { %s4069_s16 = smov [#allocation9]   ;;  %s4070_s18 = smov [#allocation4]  }
   0xf   :  { %s60_s17 = sshll.u32 %s4069_s16, 4  ;;  %s25_s19 = sshll.u32 %s4070_s18, 4  ;;  %s61_s17 = int_to_ptr.vmem [resolvable:$true] %s60_s17  ;;  %s26_s19 = int_to_ptr.vmem [resolvable:$true] %s25_s19 }
  0x10   :  { %s3988_s20 = scalar_lea.vmem %s61_s17, 4096  ;;  %p3993_p6 = scmp.lt.s32.totalorder %s61_s17, %s61_s17 }
  0x11   :  { %p3989_p5 = scmp.ne.s32.totalorder %s61_s17, %s3988_s20  ;;  %p3994_p7 = scmp.lt.s32.totalorder %s3988_s20, %s3988_s20 }
  0x13   :  { %p3995_p8 = por %p3994_p7, %p3993_p6 }
  0x15   :  { %p3996_p9 = pnand %p3995_p8, %p3989_p5 }
  0x17   :  { %3999 = shalt.err (!%p3996_p9)
}
  0x18   :  { %66 = dma.hbm_to_vmem [thread:$0]  %s5339_s5, 4096, %s61_s17, [#allocation10], %s4067_s12, %s4067_s12, %s4068_s13  }
  0x19   :  { %s4008_s2 = scalar_lea.vmem %s26_s19, 128  ;;  %p4013_p11 = scmp.lt.s32.totalorder %s26_s19, %s26_s19 }
  0x1a   :  { %p4009_p10 = scmp.ne.s32.totalorder %s26_s19, %s4008_s2  ;;  %p4014_p12 = scmp.lt.s32.totalorder %s4008_s2, %s4008_s2 }
  0x1c   :  { %p4015_p13 = por %p4014_p12, %p4013_p11 }
  0x1e   :  { %p4016_p0 = pnand %p4015_p13, %p4009_p10 }
  0x20   :  { %4019 = shalt.err (!%p4016_p0)
}
  0x21   :  { %28 = dma.hbm_to_vmem [thread:$0]  %s5335_s1, 128, %s26_s19, [#allocation5]  }
  0x22   :  { %s4071_s25 = smov [#allocation8]   ;;  %s4072_s27 = smov [#allocation11]  }
  0x23   :  { %s48_s26 = sshll.u32 %s4071_s25, 4  ;;  %s73_s28 = sshll.u32 %s4072_s27, 4  ;;  %s49_s26 = int_to_ptr.vmem [resolvable:$true] %s48_s26  ;;  %s74_s28 = int_to_ptr.vmem [resolvable:$true] %s73_s28 }
  0x24   :  { %s4028_s29 = scalar_lea.vmem %s49_s26, 4096  ;;  %p4033_p2 = scmp.lt.s32.totalorder %s49_s26, %s49_s26 }
  0x25   :  { %p4029_p1 = scmp.ne.s32.totalorder %s49_s26, %s4028_s29  ;;  %p4034_p3 = scmp.lt.s32.totalorder %s4028_s29, %s4028_s29 }
  0x27   :  { %p4035_p4 = por %p4034_p3, %p4033_p2 }
  0x29   :  { %p4036_p5 = pnand %p4035_p4, %p4029_p1 }
  0x2b   :  { %4039 = shalt.err (!%p4036_p5)
}
  0x2c   :  { %54 = dma.hbm_to_vmem [thread:$0]  %s5338_s4, 4096, %s49_s26, [#allocation7], %s4067_s12, %s4067_s12, %s4068_s13  }
  0x2d   :  { %s4048_s1 = scalar_lea.vmem %s74_s28, 64  ;;  %p4053_p7 = scmp.lt.s32.totalorder %s74_s28, %s74_s28 }
  0x2e   :  { %p4049_p6 = scmp.ne.s32.totalorder %s74_s28, %s4048_s1  ;;  %p4054_p8 = scmp.lt.s32.totalorder %s4048_s1, %s4048_s1 }
  0x30   :  { %p4055_p9 = por %p4054_p8, %p4053_p7 }
  0x32   :  { %p4056_p10 = pnand %p4055_p9, %p4049_p6 }
  0x34   :  { %4059 = shalt.err (!%p4056_p10)
}
  0x35   :  { %76 = dma.hbm_to_vmem [thread:$0]  %s5340_s6, 64, %s74_s28, [#allocation10]  }
  0x36   :  { %4060 = dma.done.wait [#allocation5], 128  }
  0x37   :  { %4061 = vsyncadd [#allocation5], 4294967168 }
  0x38   :  { %4062 = dma.done.wait [#allocation7], 8192  }
  0x39   :  { %4063 = vsyncadd [#allocation7], 4294959104 }
  0x3a   :  { %4064 = dma.done.wait [#allocation10], 4160  }
  0x3b   :  { %4065 = vsyncadd [#allocation10], 4294963136  ;;  %v140_v0 = vlaneseq  ;;  %v4073_v1 = vmov 1983009808   ;;  %v5348_v3 = vmov 0   ;;  %v137_v7 = vld [vmem:[#allocation4] sm:$0xff] }
  0x3c   :  { %v183_v2 = vunpack.c.l.s4 %v4073_v1  ;;  %329 = vmatprep.mubr.bf16.mxu1 %v5348_v3  ;;  %256 = vmatprep.mubr.bf16.mxu0 %v5348_v3  ;;  %v181_v8 = vcombine.high %v137_v7, %v137_v7  ;;  %vm211_vm0 = vcmask 1041408   ;;  %v4154_v15 = vld [vmem:[#allocation6 + $0xe4] ss:$16 sps:$4 sm:$0xff]   ;;  %v3476_v16 = vld [vmem:[%s5334_s0] sm:$0xff]   ;;  %vm198_vm1 = vcmask 31744   ;;  %v3490_v26 = vld [vmem:[%s5334_s0 + $0x10] sm:$0xff]  }
  0x3d   :  { %v4151_v4 = vshrl.u32 %v140_v0, 7  ;;  %v4160_v17 = vld [vmem:[#allocation6 + $0xe0] ss:$16 sps:$4 sm:$0xff]   ;;  %v4163_v18 = vld [vmem:[#allocation6 + $0xc4] ss:$16 sps:$4 sm:$0xff]  }
  0x3e   :  { %v184_v5 = vunpack.c.0.s8 %v183_v2  ;;  %v4171_v19 = vld [vmem:[#allocation6 + $0xc0] ss:$16 sps:$4 sm:$0xff]   ;;  %v4175_v20 = vld [vmem:[#allocation6 + $0xa4] ss:$16 sps:$4 sm:$0xff]   ;;  %v4240_v35 = vld [vmem:[#allocation6 + $0xec] ss:$16 sps:$4 sm:$0xff]  }
  0x3f   :  { %5352 = vst [vmem:[#allocation15_spill] sm:$0xff] %v4151_v4  ;;  %v3483_v21 = vld [vmem:[%s5334_s0 + $0x8] sm:$0xff]   ;;  %v3497_v31 = vld [vmem:[%s5334_s0 + $0x18] sm:$0xff]   ;;  %v4246_v36 = vld [vmem:[#allocation6 + $0xe8] ss:$16 sps:$4 sm:$0xff]   ;;  %v5345_v52 = vsub.s32 2, %v4151_v4 }
  0x40   :  { %v187_v6 = vsub.s32 %v184_v5, %v4151_v4  ;;  %v4183_v22 = vld [vmem:[#allocation6 + $0xa0] ss:$16 sps:$4 sm:$0xff]   ;;  %v4186_v23 = vld [vmem:[#allocation6 + $0x84] ss:$16 sps:$4 sm:$0xff]   ;;  %v4249_v37 = vld [vmem:[#allocation6 + $0xcc] ss:$16 sps:$4 sm:$0xff]  }
  0x41   :  { %v4194_v24 = vld [vmem:[#allocation6 + $0x80] ss:$16 sps:$4 sm:$0xff]   ;;  %v4198_v25 = vld [vmem:[#allocation6 + $0x64] ss:$16 sps:$4 sm:$0xff]   ;;  %v4254_v38 = vld [vmem:[#allocation6 + $0xc8] ss:$16 sps:$4 sm:$0xff]  }
  0x42   :  { %v188_v9 = vrot.slane %v137_v7, %v187_v6  ;;  %v195_v10 = vrot.slane %v181_v8, %v187_v6  ;;  %v4206_v27 = vld [vmem:[#allocation6 + $0x60] ss:$16 sps:$4 sm:$0xff]   ;;  %v4209_v28 = vld [vmem:[#allocation6 + $0x44] ss:$16 sps:$4 sm:$0xff]   ;;  %v4257_v39 = vld [vmem:[#allocation6 + $0xac] ss:$16 sps:$4 sm:$0xff]  }
  0x43   :  { %v4212_v29 = vld [vmem:[#allocation6 + $0x40] ss:$16 sps:$4 sm:$0xff]   ;;  %v4217_v30 = vld [vmem:[#allocation6 + $0x24] ss:$16 sps:$4 sm:$0xff]   ;;  %v4262_v40 = vld [vmem:[#allocation6 + $0xa8] ss:$16 sps:$4 sm:$0xff]  }
  0x44   :  { %v196_v11 = vcombine.high %v188_v9, %v188_v9  ;;  %v213_v12 = vsel %vm211_vm0, %v188_v9, 0  ;;  %v197_v13 = vcombine.high %v195_v10, %v195_v10  ;;  %v219_v14 = vsel %vm211_vm0, %v195_v10, 0  ;;  %v4226_v32 = vld [vmem:[#allocation6 + $0x20] ss:$16 sps:$4 sm:$0xff]   ;;  %v4229_v33 = vld [vmem:[#allocation6 + $0x4] ss:$16 sps:$4 sm:$0xff]  }
  0x45   :  { %v4235_v34 = vld [vmem:[#allocation6] ss:$16 sps:$4 sm:$0xff]   ;;  %v4264_v41 = vld [vmem:[#allocation6 + $0x8c] ss:$16 sps:$4 sm:$0xff]   ;;  %v4269_v42 = vld [vmem:[#allocation6 + $0x88] ss:$16 sps:$4 sm:$0xff]  }
  0x46   :  { %3259 = vmatprep.subr.msk.bf16.mxu0 %vm211_vm0, %v196_v11  ;;  %3264 = vmatprep.subr.msk.bf16.mxu1 %vm211_vm0, %v197_v13  ;;  %v4272_v43 = vld [vmem:[#allocation6 + $0x6c] ss:$16 sps:$4 sm:$0xff]   ;;  %v4275_v44 = vld [vmem:[#allocation6 + $0x68] ss:$16 sps:$4 sm:$0xff]   ;;  %v5347_v56 = vsub.s32 0, %v4151_v4  ;;  %v5344_v57 = vsub.s32 3, %v4151_v4 }
  0x47   :  { %239 = vmatpush1.bf16.msra.mxu0 %v213_v12  ;;  %312 = vmatpush1.bf16.msra.mxu1 %v219_v14  ;;  %v4278_v45 = vld [vmem:[#allocation6 + $0x4c] ss:$16 sps:$4 sm:$0xff]   ;;  %v4281_v46 = vld [vmem:[#allocation6 + $0x48] ss:$16 sps:$4 sm:$0xff]   ;;  %v5346_v60 = vsub.s32 1, %v4151_v4 }
  0x48   :  { %688 = vmatprep.subr.bf16.mxu0 %v4154_v15  ;;  %569 = vmatprep.subr.bf16.mxu1 %v4154_v15  ;;  %v4284_v47 = vld [vmem:[#allocation6 + $0x2c] ss:$16 sps:$4 sm:$0xff]   ;;  %v4287_v48 = vld [vmem:[#allocation6 + $0x28] ss:$16 sps:$4 sm:$0xff]  }
  0x49   :  { %v4290_v49 = vld [vmem:[#allocation6 + $0xc] ss:$16 sps:$4 sm:$0xff]   ;;  %v4293_v50 = vld [vmem:[#allocation6 + $0x8] ss:$16 sps:$4 sm:$0xff]  }
  0x4a   :  { %3260 = vmatmul.mubr.msk.bf16.vlgmr.msra.gmra.mxu0 %vm198_vm1, %v3476_v16  ;;  %3265 = vmatmul.mubr.msk.bf16.vlgmr.msra.gmra.mxu1 %vm198_vm1, %v3476_v16  ;;  %v138_v53 = vld [vmem:[%s5337_s3] sm:$0xf] }
  0x4b   :  { %689 = vmatpush1.bf16.msra.mxu0 %v4160_v17  ;;  %266 = vmatprep.mubr.bf16.mxu0 %v5348_v3  ;;  %v4335_v61 = vrot.slane %v138_v53, %v5345_v52  ;;  %v4341_v0 = vrot.slane %v138_v53, %v5344_v57  ;;  %v4348_v2 = vrot.slane %v138_v53, %v5347_v56 }
  0x4c   :  { %690 = vmatprep.subr.bf16.mxu0 %v4163_v18  ;;  %570 = vmatpush1.bf16.msra.mxu1 %v4160_v17  ;;  %v4355_v8 = vrot.slane %v138_v53, %v5346_v60 }
  0x4d   :  { %339 = vmatprep.mubr.bf16.mxu1 %v5348_v3  ;;  %571 = vmatprep.subr.bf16.mxu1 %v4163_v18 }
  0x4f   :  { %691 = vmatpush1.bf16.msra.mxu0 %v4171_v19 }
  0x50   :  { %692 = vmatprep.subr.bf16.mxu0 %v4175_v20  ;;  %572 = vmatpush1.bf16.msra.mxu1 %v4171_v19 }
  0x51   :  { %573 = vmatprep.subr.bf16.mxu1 %v4175_v20 }
  0x52   :  { %3261 = vmatmul.mubr.msk.bf16.gmra.mxu0 %vm198_vm1, %v3483_v21  ;;  %3266 = vmatmul.mubr.msk.bf16.gmra.mxu1 %vm198_vm1, %v3483_v21 }
  0x53   :  { %693 = vmatpush1.bf16.msra.mxu0 %v4183_v22  ;;  %276 = vmatprep.mubr.bf16.mxu0 %v5348_v3 }
  0x54   :  { %694 = vmatprep.subr.bf16.mxu0 %v4186_v23  ;;  %574 = vmatpush1.bf16.msra.mxu1 %v4183_v22 }
  0x55   :  { %349 = vmatprep.mubr.bf16.mxu1 %v5348_v3  ;;  %575 = vmatprep.subr.bf16.mxu1 %v4186_v23 }
  0x57   :  { %695 = vmatpush1.bf16.msra.mxu0 %v4194_v24 }
  0x58   :  { %696 = vmatprep.subr.bf16.mxu0 %v4198_v25  ;;  %576 = vmatpush1.bf16.msra.mxu1 %v4194_v24 }
  0x59   :  { %577 = vmatprep.subr.bf16.mxu1 %v4198_v25 }
  0x5a   :  { %3262 = vmatmul.mubr.msk.bf16.gmra.mxu0 %vm198_vm1, %v3490_v26  ;;  %3267 = vmatmul.mubr.msk.bf16.gmra.mxu1 %vm198_vm1, %v3490_v26 }
  0x5b   :  { %697 = vmatpush1.bf16.msra.mxu0 %v4206_v27  ;;  %286 = vmatprep.mubr.bf16.mxu0 %v5348_v3 }
  0x5c   :  { %698 = vmatprep.subr.bf16.mxu0 %v4209_v28  ;;  %578 = vmatpush1.bf16.msra.mxu1 %v4206_v27 }
  0x5d   :  { %359 = vmatprep.mubr.bf16.mxu1 %v5348_v3  ;;  %579 = vmatprep.subr.bf16.mxu1 %v4209_v28 }
  0x5f   :  { %699 = vmatpush1.bf16.msra.mxu0 %v4212_v29 }
  0x60   :  { %700 = vmatprep.subr.bf16.mxu0 %v4217_v30  ;;  %580 = vmatpush1.bf16.msra.mxu1 %v4212_v29 }
  0x61   :  { %581 = vmatprep.subr.bf16.mxu1 %v4217_v30 }
  0x62   :  { %3263 = vmatmul.mubr.msk.bf16.gmra.mxu0 %vm198_vm1, %v3497_v31  ;;  %3268 = vmatmul.mubr.msk.bf16.gmra.mxu1 %vm198_vm1, %v3497_v31 }
  0x63   :  { %701 = vmatpush1.bf16.msra.mxu0 %v4226_v32  ;;  %720 = vmatprep.mubr.bf16.mxu0 %v5348_v3 }
  0x64   :  { %702 = vmatprep.subr.bf16.mxu0 %v4229_v33  ;;  %582 = vmatpush1.bf16.msra.mxu1 %v4226_v32 }
  0x65   :  { %601 = vmatprep.mubr.bf16.mxu1 %v5348_v3  ;;  %583 = vmatprep.subr.bf16.mxu1 %v4229_v33 }
  0x67   :  { %703 = vmatpush1.bf16.msra.mxu0 %v4235_v34 }
  0x68   :  { %808 = vmatprep.subr.bf16.mxu0 %v4154_v15  ;;  %584 = vmatpush1.bf16.msra.mxu1 %v4235_v34 }
  0x69   :  { %610 = vmatprep.subr.bf16.mxu1 %v4240_v35 }
  0x6b   :  { %602 = vmatmul.mubr.bf16.vlgmr.msra.gmra.mxu1 %v5348_v3 }
  0x6c   :  { %611 = vmatpush1.bf16.msra.mxu1 %v4246_v36  ;;  %642 = vmatprep.mubr.bf16.mxu1 %v5348_v3 }
  0x6d   :  { %612 = vmatprep.subr.bf16.mxu1 %v4249_v37 }
  0x70   :  { %613 = vmatpush1.bf16.msra.mxu1 %v4254_v38 }
  0x71   :  { %614 = vmatprep.subr.bf16.mxu1 %v4257_v39 }
  0x74   :  { %615 = vmatpush1.bf16.msra.mxu1 %v4262_v40 }
  0x75   :  { %616 = vmatprep.subr.bf16.mxu1 %v4264_v41 }
  0x78   :  { %617 = vmatpush1.bf16.msra.mxu1 %v4269_v42 }
  0x79   :  { %618 = vmatprep.subr.bf16.mxu1 %v4272_v43 }
  0x7c   :  { %619 = vmatpush1.bf16.msra.mxu1 %v4275_v44 }
  0x7d   :  { %620 = vmatprep.subr.bf16.mxu1 %v4278_v45 }
  0x80   :  { %621 = vmatpush1.bf16.msra.mxu1 %v4281_v46 }
  0x81   :  { %622 = vmatprep.subr.bf16.mxu1 %v4284_v47 }
  0x84   :  { %623 = vmatpush1.bf16.msra.mxu1 %v4287_v48 }
  0x85   :  { %624 = vmatprep.subr.bf16.mxu1 %v4290_v49 }
  0x88   :  { %625 = vmatpush1.bf16.msra.mxu1 %v4293_v50 }
  0x89   :  { %729 = vmatprep.subr.bf16.mxu1 %v4240_v35 }
  0x8b   :  { %643 = vmatmul.mubr.bf16.vlgmr.msra.gmra.mxu1 %v5348_v3 }
  0x8c   :  { %730 = vmatpush1.bf16.msra.mxu1 %v4246_v36  ;;  %761 = vmatprep.mubr.bf16.mxu1 %v5348_v3 }
  0x8d   :  { %731 = vmatprep.subr.bf16.mxu1 %v4249_v37 }
  0x90   :  { %732 = vmatpush1.bf16.msra.mxu1 %v4254_v38 }
  0x91   :  { %733 = vmatprep.subr.bf16.mxu1 %v4257_v39 }
  0x94   :  { %734 = vmatpush1.bf16.msra.mxu1 %v4262_v40 }
  0x95   :  { %735 = vmatprep.subr.bf16.mxu1 %v4264_v41 }
  0x98   :  { %736 = vmatpush1.bf16.msra.mxu1 %v4269_v42 }
  0x99   :  { %737 = vmatprep.subr.bf16.mxu1 %v4272_v43 }
  0x9c   :  { %738 = vmatpush1.bf16.msra.mxu1 %v4275_v44 }
  0x9d   :  { %739 = vmatprep.subr.bf16.mxu1 %v4278_v45 }
  0xa0   :  { %740 = vmatpush1.bf16.msra.mxu1 %v4281_v46 }
  0xa1   :  { %741 = vmatprep.subr.bf16.mxu1 %v4284_v47 }
  0xa4   :  { %742 = vmatpush1.bf16.msra.mxu1 %v4287_v48 }
  0xa5   :  { %743 = vmatprep.subr.bf16.mxu1 %v4290_v49 }
  0xa8   :  { %744 = vmatpush1.bf16.msra.mxu1 %v4293_v50 }
  0xa9   :  { %849 = vmatprep.subr.bf16.mxu1 %v4240_v35 }
 0x10a   :  { %v4316_v51 = vpop.f32.mrf.mxu0  ;;  %v4322_v54 = vpop.f32.mrf.mxu1 }
 0x10c   :  { %v4324_v55 = vpop.f32.mrf.mxu0  ;;  %v4328_v58 = vpop.f32.mrf.mxu1 }
 0x10e   :  { %v4330_v59 = vpop.f32.mrf.mxu0  ;;  %v335_v62 = vpop.f32.mrf.mxu1 }
 0x10f   :  { %v4344_v1 = vadd.f32 %v335_v62, %v4335_v61 }
 0x110   :  { %v4337_v63 = vpop.f32.mrf.mxu0  ;;  %v337_v5 = vpop.f32.mrf.mxu1 }
 0x111   :  { %v4351_v7 = vadd.f32 %v337_v5, %v4341_v0 }
 0x112   :  { %v268_v6 = vpop.f32.mrf.mxu0  ;;  %v341_v10 = vpop.f32.mrf.mxu1 }
 0x113   :  { %v4358_v9 = vadd.f32 %v268_v6, %v4348_v2  ;;  %v4361_v12 = vadd.f32 %v341_v10, %v4335_v61 }
 0x114   :  { %v270_v11 = vpop.f32.mrf.mxu0  ;;  %v343_v14 = vpop.f32.mrf.mxu1 }
 0x115   :  { %v4364_v13 = vadd.f32 %v270_v11, %v4355_v8  ;;  %v4367_v21 = vadd.f32 %v343_v14, %v4341_v0 }
 0x116   :  { %v272_v16 = vpop.f32.mrf.mxu0  ;;  %v345_v31 = vpop.f32.mrf.mxu1 }
 0x117   :  { %v4370_v26 = vadd.f32 %v272_v16, %v4348_v2  ;;  %v4373_v62 = vadd.f32 %v345_v31, %v4335_v61 }
 0x118   :  { %v274_v53 = vpop.f32.mrf.mxu0  ;;  %v347_v6 = vpop.f32.mrf.mxu1 }
 0x119   :  { %5353 = vst [vmem:[#allocation16_spill] sm:$0xff] %v4370_v26  ;;  %5354 = vst [vmem:[#allocation17_spill] sm:$0xff] %v4373_v62  ;;  %v4376_v5 = vadd.f32 %v274_v53, %v4355_v8  ;;  %v4379_v11 = vadd.f32 %v347_v6, %v4341_v0 }
 0x11a   :  { %v278_v10 = vpop.f32.mrf.mxu0  ;;  %v351_v14 = vpop.f32.mrf.mxu1 }
 0x11b   :  { %5355 = vst [vmem:[#allocation18_spill] sm:$0xff] %v4376_v5  ;;  %5356 = vst [vmem:[#allocation19_spill] sm:$0xff] %v4379_v11  ;;  %v4382_v57 = vadd.f32 %v278_v10, %v4348_v2  ;;  %v4385_v16 = vadd.f32 %v351_v14, %v4335_v61 }
 0x11c   :  { %v280_v52 = vpop.f32.mrf.mxu0  ;;  %v353_v31 = vpop.f32.mrf.mxu1 }
 0x11d   :  { %5357 = vst [vmem:[#allocation20_spill] sm:$0xff] %v4382_v57  ;;  %5358 = vst [vmem:[#allocation21_spill] sm:$0xff] %v4385_v16  ;;  %v4388_v60 = vadd.f32 %v280_v52, %v4355_v8  ;;  %v4391_v53 = vadd.f32 %v353_v31, %v4341_v0 }
 0x11e   :  { %v282_v56 = vpop.f32.mrf.mxu0  ;;  %v355_v6 = vpop.f32.mrf.mxu1 }
 0x11f   :  { %5359 = vst [vmem:[#allocation22_spill] sm:$0xff] %v4388_v60  ;;  %5360 = vst [vmem:[#allocation23_spill] sm:$0xff] %v4391_v53  ;;  %v4394_v3 = vadd.f32 %v282_v56, %v4348_v2  ;;  %v4397_v10 = vadd.f32 %v355_v6, %v4335_v61 }
 0x120   :  { %v284_v4 = vpop.f32.mrf.mxu0  ;;  %v357_v14 = vpop.f32.mrf.mxu1 }
 0x121   :  { %5361 = vst [vmem:[#allocation24_spill] sm:$0xff] %v4394_v3  ;;  %5362 = vst [vmem:[#allocation25_spill] sm:$0xff] %v4397_v10  ;;  %v4400_v57 = vadd.f32 %v284_v4, %v4355_v8  ;;  %v4403_v52 = vadd.f32 %v357_v14, %v4341_v0 }
 0x122   :  { %v288_v16 = vpop.f32.mrf.mxu0  ;;  %v361_v31 = vpop.f32.mrf.mxu1 }
 0x123   :  { %5363 = vst [vmem:[#allocation26_spill] sm:$0xff] %v4400_v57  ;;  %5364 = vst [vmem:[#allocation27_spill] sm:$0xff] %v4403_v52  ;;  %v4406_v60 = vadd.f32 %v288_v16, %v4348_v2  ;;  %v4409_v56 = vadd.f32 %v361_v31, %v4335_v61 }
 0x124   :  { %v290_v53 = vpop.f32.mrf.mxu0  ;;  %v363_v6 = vpop.f32.mrf.mxu1 }
 0x125   :  { %5365 = vst [vmem:[#allocation28_spill] sm:$0xff] %v4406_v60  ;;  %5366 = vst [vmem:[#allocation29_spill] sm:$0xff] %v4409_v56  ;;  %v4412_v3 = vadd.f32 %v290_v53, %v4355_v8  ;;  %v4415_v4 = vadd.f32 %v363_v6, %v4341_v0  ;;  %v259_v53 = vadd.f32 %v4316_v51, %v4348_v2 }
 0x126   :  { %v292_v10 = vpop.f32.mrf.mxu0  ;;  %v365_v14 = vpop.f32.mrf.mxu1  ;;  %v261_v6 = vadd.f32 %v4324_v55, %v4355_v8  ;;  %v334_v51 = vadd.f32 %v4328_v58, %v4341_v0 }
 0x127   :  { %5367 = vst [vmem:[#allocation30_spill] sm:$0xff] %v4412_v3  ;;  %5368 = vst [vmem:[#allocation31_spill] sm:$0xff] %v4415_v4  ;;  %v4418_v57 = vadd.f32 %v292_v10, %v4348_v2  ;;  %v4421_v16 = vadd.f32 %v365_v14, %v4335_v61 }
 0x128   :  { %v367_v60 = vpop.f32.mrf.mxu1 }
 0x129   :  { %5369 = vst [vmem:[#allocation32_spill] sm:$0xff] %v4418_v57  ;;  %5370 = vst [vmem:[#allocation33_spill] sm:$0xff] %v4421_v16  ;;  %v4424_v52 = vadd.f32 %v367_v60, %v4341_v0  ;;  %v332_v60 = vadd.f32 %v4322_v54, %v4335_v61 }
 0x12b   :  { %5371 = vst [vmem:[#allocation34_spill] sm:$0xff] %v4424_v52  ;;  %v603_v31 = vpop.f32.mrf.mxu1 }
 0x12c   :  { %v651_v10 = vadd.f32 %v603_v31, %v259_v53 }
 0x12d   :  { %v605_v56 = vpop.f32.mrf.mxu1 }
 0x12e   :  { %v652_v57 = vadd.f32 %v605_v56, %v261_v6  ;;  %v3301_v11 = vmul.f32 -1.442695, %v651_v10 }
 0x12f   :  { %v607_v4 = vpop.f32.mrf.mxu1 }
 0x130   :  { %v3302_v62 = vmul.f32 -1.442695, %v652_v57  ;;  %3640 = vpow2.f32 %v3301_v11 }
 0x131   :  { %v608_v3 = vpop.f32.mrf.mxu1 }
 0x132   :  { %3642 = vpow2.f32 %v3302_v62 }
 0x13d   :  { %v3641_v14 = vpop.eup %3640 }
 0x13e   :  { %v664_v52 = vadd.f32 1.0, %v3641_v14  ;;  %v4471_v14 = vpop.f32.mrf.mxu0 }
 0x13f   :  { %v3643_v16 = vpop.eup %3642 }
 0x140   :  { %v665_v5 = vadd.f32 1.0, %v3643_v16  ;;  %3644 = vrcp.f32 %v664_v52  ;;  %v5372_v52 = vmov 0  }
 0x142   :  { %3646 = vrcp.f32 %v665_v5 }
 0x14b   :  { %v644_v26 = vpop.f32.mrf.mxu1 }
 0x14c   :  { %v653_v55 = vadd.f32 %v644_v26, %v332_v60  ;;  %v263_v60 = vadd.f32 %v4330_v59, %v4348_v2 }
 0x14d   :  { %v646_v4 = vpop.f32.mrf.mxu1  ;;  %v3645_v11 = vpop.eup %3644 }
 0x14e   :  { %v3303_v3 = vmul.f32 -1.442695, %v653_v55  ;;  %v654_v56 = vadd.f32 %v646_v4, %v334_v51  ;;  %v265_v4 = vadd.f32 %v4337_v63, %v4355_v8 }
 0x14f   :  { %v648_v57 = vpop.f32.mrf.mxu1  ;;  %v3647_v31 = vpop.eup %3646 }
 0x150   :  { %3648 = vpow2.f32 %v3303_v3  ;;  %v674_v16 = vmul.f32 0.0, %v3647_v31 }
 0x151   :  { %3650 = vtanh.f32 %v654_v56  ;;  %v649_v62 = vpop.f32.mrf.mxu1 }
 0x15d   :  { %v3649_v53 = vpop.eup %3648 }
 0x15e   :  { %v3651_v54 = vpop.eup %3650  ;;  %v666_v61 = vadd.f32 1.0, %v3649_v53 }
 0x15f   :  { %v675_v6 = vmul.f32 %v3651_v54, %v3645_v11 }
 0x160   :  { %3652 = vrcp.f32 %v666_v61 }
 0x161   :  { %v4434_v10 = vadd.f32 %v675_v6, %v674_v16 }
 0x163   :  { %3654 = vtanh.f32 %v4434_v10 }
 0x16d   :  { %v3653_v58 = vpop.eup %3652 }
 0x170   :  { %v3655_v0 = vpop.eup %3654 }
 0x171   :  { %v678_v26 = vmul.f32 %v3655_v0, %v3653_v58 }
 0x173   :  { %v679_v5 = vpack.c.bf16 %v678_v26, %v678_v26 }
 0x175   :  { %680 = vst [vmem:[#allocation3] sm:$0xf] %v679_v5  ;;  %721 = vmatmul.mubr.bf16.vlgmr.msra.gmra.mxu0 %v679_v5  ;;  %762 = vmatmul.mubr.bf16.vlgmr.msra.gmra.mxu1 %v679_v5 }
 0x176   :  { %809 = vmatpush1.bf16.msra.mxu0 %v4160_v17  ;;  %850 = vmatpush1.bf16.msra.mxu1 %v4246_v36 }
 0x177   :  { %810 = vmatprep.subr.bf16.mxu0 %v4163_v18  ;;  %851 = vmatprep.subr.bf16.mxu1 %v4249_v37 }
 0x178   :  { %840 = vmatprep.mubr.bf16.mxu0 %v5372_v52  ;;  %881 = vmatprep.mubr.bf16.mxu1 %v5372_v52 }
 0x17a   :  { %811 = vmatpush1.bf16.msra.mxu0 %v4171_v19  ;;  %852 = vmatpush1.bf16.msra.mxu1 %v4254_v38 }
 0x17b   :  { %812 = vmatprep.subr.bf16.mxu0 %v4175_v20  ;;  %853 = vmatprep.subr.bf16.mxu1 %v4257_v39 }
 0x17e   :  { %813 = vmatpush1.bf16.msra.mxu0 %v4183_v22  ;;  %854 = vmatpush1.bf16.msra.mxu1 %v4262_v40 }
 0x17f   :  { %814 = vmatprep.subr.bf16.mxu0 %v4186_v23  ;;  %855 = vmatprep.subr.bf16.mxu1 %v4264_v41 }
 0x182   :  { %815 = vmatpush1.bf16.msra.mxu0 %v4194_v24  ;;  %856 = vmatpush1.bf16.msra.mxu1 %v4269_v42 }
 0x183   :  { %816 = vmatprep.subr.bf16.mxu0 %v4198_v25  ;;  %857 = vmatprep.subr.bf16.mxu1 %v4272_v43 }
 0x186   :  { %817 = vmatpush1.bf16.msra.mxu0 %v4206_v27  ;;  %858 = vmatpush1.bf16.msra.mxu1 %v4275_v44 }
 0x187   :  { %818 = vmatprep.subr.bf16.mxu0 %v4209_v28  ;;  %859 = vmatprep.subr.bf16.mxu1 %v4278_v45 }
 0x18a   :  { %819 = vmatpush1.bf16.msra.mxu0 %v4212_v29  ;;  %860 = vmatpush1.bf16.msra.mxu1 %v4281_v46 }
 0x18b   :  { %820 = vmatprep.subr.bf16.mxu0 %v4217_v30  ;;  %861 = vmatprep.subr.bf16.mxu1 %v4284_v47 }
 0x18e   :  { %821 = vmatpush1.bf16.msra.mxu0 %v4226_v32  ;;  %862 = vmatpush1.bf16.msra.mxu1 %v4287_v48 }
 0x18f   :  { %822 = vmatprep.subr.bf16.mxu0 %v4229_v33  ;;  %863 = vmatprep.subr.bf16.mxu1 %v4290_v49 }
 0x192   :  { %823 = vmatpush1.bf16.msra.mxu0 %v4235_v34  ;;  %864 = vmatpush1.bf16.msra.mxu1 %v4293_v50 }
 0x193   :  { %928 = vmatprep.subr.bf16.mxu0 %v4154_v15  ;;  %969 = vmatprep.subr.bf16.mxu1 %v4240_v35 }
 0x235   :  { %v722_v51 = vpop.f32.mrf.mxu0  ;;  %v763_v55 = vpop.f32.mrf.mxu1 }
 0x236   :  { %v770_v3 = vadd.f32 %v722_v51, %v263_v60  ;;  %v772_v6 = vadd.f32 %v763_v55, %v4344_v1 }
 0x237   :  { %v724_v56 = vpop.f32.mrf.mxu0  ;;  %v765_v57 = vpop.f32.mrf.mxu1 }
 0x238   :  { %v3304_v62 = vmul.f32 -1.442695, %v770_v3  ;;  %v771_v11 = vadd.f32 %v724_v56, %v265_v4  ;;  %v3306_v59 = vmul.f32 -1.442695, %v772_v6  ;;  %v773_v2 = vadd.f32 %v765_v57, %v4351_v7 }
 0x239   :  { %v726_v31 = vpop.f32.mrf.mxu0  ;;  %v767_v53 = vpop.f32.mrf.mxu1 }
 0x23a   :  { %3656 = vpow2.f32 %v3304_v62  ;;  %v3305_v54 = vmul.f32 -1.442695, %v771_v11 }
 0x23b   :  { %v727_v61 = vpop.f32.mrf.mxu0  ;;  %v768_v16 = vpop.f32.mrf.mxu1 }
 0x23c   :  { %3658 = vpow2.f32 %v3305_v54 }
 0x23d   :  { %3660 = vpow2.f32 %v3306_v59 }
 0x23e   :  { %3662 = vtanh.f32 %v773_v2 }
 0x247   :  { %v3657_v58 = vpop.eup %3656 }
 0x248   :  { %v783_v0 = vadd.f32 1.0, %v3657_v58 }
 0x249   :  { %v3659_v63 = vpop.eup %3658 }
 0x24a   :  { %3664 = vrcp.f32 %v783_v0  ;;  %v784_v26 = vadd.f32 1.0, %v3659_v63  ;;  %v3661_v5 = vpop.eup %3660 }
 0x24b   :  { %v3663_v60 = vpop.eup %3662  ;;  %v785_v56 = vadd.f32 1.0, %v3661_v5 }
 0x24c   :  { %3666 = vrcp.f32 %v784_v26 }
 0x24d   :  { %3668 = vrcp.f32 %v785_v56 }
 0x257   :  { %v3665_v51 = vpop.eup %3664 }
 0x258   :  { %v794_v4 = vmul.f32 %v3665_v51, %v3663_v60 }
 0x259   :  { %v3667_v3 = vpop.eup %3666 }
 0x25a   :  { %v793_v62 = vmul.f32 %v3667_v3, %v4434_v10  ;;  %v3669_v7 = vpop.eup %3668 }
 0x25c   :  { %v4480_v1 = vadd.f32 %v794_v4, %v793_v62 }
 0x25e   :  { %3670 = vtanh.f32 %v4480_v1 }
 0x26b   :  { %v3671_v55 = vpop.eup %3670 }
 0x26c   :  { %v797_v57 = vmul.f32 %v3671_v55, %v3669_v7 }
 0x26e   :  { %v798_v11 = vpack.c.bf16 %v797_v57, %v797_v57 }
 0x270   :  { %800 = vst [vmem:[#allocation3 + $0x4] sm:$0xf] %v798_v11  ;;  %841 = vmatmul.mubr.bf16.vlgmr.msra.gmra.mxu0 %v798_v11  ;;  %882 = vmatmul.mubr.bf16.vlgmr.msra.gmra.mxu1 %v798_v11 }
 0x271   :  { %929 = vmatpush1.bf16.msra.mxu0 %v4160_v17  ;;  %970 = vmatpush1.bf16.msra.mxu1 %v4246_v36 }
 0x272   :  { %930 = vmatprep.subr.bf16.mxu0 %v4163_v18  ;;  %971 = vmatprep.subr.bf16.mxu1 %v4249_v37 }
 0x273   :  { %960 = vmatprep.mubr.bf16.mxu0 %v5372_v52  ;;  %1001 = vmatprep.mubr.bf16.mxu1 %v5372_v52 }
 0x275   :  { %931 = vmatpush1.bf16.msra.mxu0 %v4171_v19  ;;  %972 = vmatpush1.bf16.msra.mxu1 %v4254_v38 }
 0x276   :  { %932 = vmatprep.subr.bf16.mxu0 %v4175_v20  ;;  %973 = vmatprep.subr.bf16.mxu1 %v4257_v39 }
 0x279   :  { %933 = vmatpush1.bf16.msra.mxu0 %v4183_v22  ;;  %974 = vmatpush1.bf16.msra.mxu1 %v4262_v40 }
 0x27a   :  { %934 = vmatprep.subr.bf16.mxu0 %v4186_v23  ;;  %975 = vmatprep.subr.bf16.mxu1 %v4264_v41 }
 0x27d   :  { %935 = vmatpush1.bf16.msra.mxu0 %v4194_v24  ;;  %976 = vmatpush1.bf16.msra.mxu1 %v4269_v42 }
 0x27e   :  { %936 = vmatprep.subr.bf16.mxu0 %v4198_v25  ;;  %977 = vmatprep.subr.bf16.mxu1 %v4272_v43 }
 0x281   :  { %937 = vmatpush1.bf16.msra.mxu0 %v4206_v27  ;;  %978 = vmatpush1.bf16.msra.mxu1 %v4275_v44 }
 0x282   :  { %938 = vmatprep.subr.bf16.mxu0 %v4209_v28  ;;  %979 = vmatprep.subr.bf16.mxu1 %v4278_v45 }
 0x285   :  { %939 = vmatpush1.bf16.msra.mxu0 %v4212_v29  ;;  %980 = vmatpush1.bf16.msra.mxu1 %v4281_v46 }
 0x286   :  { %940 = vmatprep.subr.bf16.mxu0 %v4217_v30  ;;  %981 = vmatprep.subr.bf16.mxu1 %v4284_v47 }
 0x289   :  { %941 = vmatpush1.bf16.msra.mxu0 %v4226_v32  ;;  %982 = vmatpush1.bf16.msra.mxu1 %v4287_v48 }
 0x28a   :  { %942 = vmatprep.subr.bf16.mxu0 %v4229_v33  ;;  %983 = vmatprep.subr.bf16.mxu1 %v4290_v49 }
 0x28d   :  { %943 = vmatpush1.bf16.msra.mxu0 %v4235_v34  ;;  %984 = vmatpush1.bf16.msra.mxu1 %v4293_v50 }
 0x28e   :  { %1048 = vmatprep.subr.bf16.mxu0 %v4154_v15  ;;  %1089 = vmatprep.subr.bf16.mxu1 %v4240_v35 }
 0x330   :  { %v842_v10 = vpop.f32.mrf.mxu0  ;;  %v883_v31 = vpop.f32.mrf.mxu1 }
 0x331   :  { %v890_v53 = vadd.f32 %v842_v10, %v4358_v9  ;;  %v892_v15 = vadd.f32 %v883_v31, %v4361_v12 }
 0x332   :  { %v844_v54 = vpop.f32.mrf.mxu0  ;;  %v885_v61 = vpop.f32.mrf.mxu1 }
 0x333   :  { %v3307_v16 = vmul.f32 -1.442695, %v890_v53  ;;  %v891_v6 = vadd.f32 %v844_v54, %v4364_v13  ;;  %v3309_v26 = vmul.f32 -1.442695, %v892_v15  ;;  %v893_v5 = vadd.f32 %v885_v61, %v4367_v21  ;;  %v5375_v61 = vld [vmem:[#allocation17_spill] sm:$0xff] }
 0x334   :  { %v846_v59 = vpop.f32.mrf.mxu0  ;;  %v887_v2 = vpop.f32.mrf.mxu1 }
 0x335   :  { %3672 = vpow2.f32 %v3307_v16  ;;  %v3308_v58 = vmul.f32 -1.442695, %v891_v6  ;;  %v5376_v59 = vld [vmem:[#allocation19_spill] sm:$0xff] }
 0x336   :  { %v847_v0 = vpop.f32.mrf.mxu0  ;;  %v888_v63 = vpop.f32.mrf.mxu1 }
 0x337   :  { %3674 = vpow2.f32 %v3308_v58 }
 0x338   :  { %3676 = vpow2.f32 %v3309_v26 }
 0x339   :  { %3678 = vtanh.f32 %v893_v5 }
 0x342   :  { %v3673_v60 = vpop.eup %3672 }
 0x343   :  { %v903_v51 = vadd.f32 1.0, %v3673_v60 }
 0x344   :  { %v3675_v9 = vpop.eup %3674 }
 0x345   :  { %3680 = vrcp.f32 %v903_v51  ;;  %v904_v4 = vadd.f32 1.0, %v3675_v9  ;;  %v3677_v13 = vpop.eup %3676 }
 0x346   :  { %v3679_v3 = vpop.eup %3678  ;;  %v905_v55 = vadd.f32 1.0, %v3677_v13 }
 0x347   :  { %3682 = vrcp.f32 %v904_v4 }
 0x348   :  { %3684 = vrcp.f32 %v905_v55 }
 0x352   :  { %v3681_v56 = vpop.eup %3680 }
 0x353   :  { %v914_v62 = vmul.f32 %v3681_v56, %v3679_v3 }
 0x354   :  { %v3683_v7 = vpop.eup %3682 }
 0x355   :  { %v913_v57 = vmul.f32 %v3683_v7, %v4480_v1  ;;  %v3685_v21 = vpop.eup %3684 }
 0x357   :  { %v4522_v12 = vadd.f32 %v914_v62, %v913_v57  ;;  %v4569_v57 = vld [vmem:[#allocation6 + $0xe0] ss:$16 sps:$4 sm:$0xff]  }
 0x359   :  { %3686 = vtanh.f32 %v4522_v12 }
 0x366   :  { %v3687_v11 = vpop.eup %3686 }
 0x367   :  { %v917_v10 = vmul.f32 %v3687_v11, %v3685_v21  ;;  %v4573_v21 = vld [vmem:[#allocation6 + $0xc4] ss:$16 sps:$4 sm:$0xff]  }
 0x368   :  { %v4583_v11 = vld [vmem:[#allocation6 + $0xa4] ss:$16 sps:$4 sm:$0xff]  }
 0x369   :  { %v918_v31 = vpack.c.bf16 %v917_v10, %v917_v10  ;;  %v4595_v10 = vld [vmem:[#allocation6 + $0x80] ss:$16 sps:$4 sm:$0xff]  }
 0x36b   :  { %920 = vst [vmem:[#allocation3 + $0x8] sm:$0xf] %v918_v31  ;;  %961 = vmatmul.mubr.bf16.vlgmr.msra.gmra.mxu0 %v918_v31  ;;  %1002 = vmatmul.mubr.bf16.vlgmr.msra.gmra.mxu1 %v918_v31  ;;  %v4599_v31 = vld [vmem:[#allocation6 + $0x64] ss:$16 sps:$4 sm:$0xff]  }
 0x36c   :  { %1049 = vmatpush1.bf16.msra.mxu0 %v4160_v17  ;;  %1090 = vmatpush1.bf16.msra.mxu1 %v4246_v36  ;;  %v4557_v17 = vld [vmem:[#allocation6 + $0xe4] ss:$16 sps:$4 sm:$0xff]  }
 0x36d   :  { %1050 = vmatprep.subr.bf16.mxu0 %v4163_v18  ;;  %1091 = vmatprep.subr.bf16.mxu1 %v4249_v37 }
 0x36e   :  { %1080 = vmatprep.mubr.bf16.mxu0 %v5372_v52  ;;  %1121 = vmatprep.mubr.bf16.mxu1 %v5372_v52 }
 0x370   :  { %1051 = vmatpush1.bf16.msra.mxu0 %v4171_v19  ;;  %1092 = vmatpush1.bf16.msra.mxu1 %v4254_v38 }
 0x371   :  { %1052 = vmatprep.subr.bf16.mxu0 %v4175_v20  ;;  %1093 = vmatprep.subr.bf16.mxu1 %v4257_v39  ;;  %v5373_v20 = vld [vmem:[#allocation16_spill] sm:$0xff] }
 0x374   :  { %1053 = vmatpush1.bf16.msra.mxu0 %v4183_v22  ;;  %1094 = vmatpush1.bf16.msra.mxu1 %v4262_v40 }
 0x375   :  { %1054 = vmatprep.subr.bf16.mxu0 %v4186_v23  ;;  %1095 = vmatprep.subr.bf16.mxu1 %v4264_v41 }
 0x378   :  { %1055 = vmatpush1.bf16.msra.mxu0 %v4194_v24  ;;  %1096 = vmatpush1.bf16.msra.mxu1 %v4269_v42 }
 0x379   :  { %1056 = vmatprep.subr.bf16.mxu0 %v4198_v25  ;;  %1097 = vmatprep.subr.bf16.mxu1 %v4272_v43 }
 0x37c   :  { %1057 = vmatpush1.bf16.msra.mxu0 %v4206_v27  ;;  %1098 = vmatpush1.bf16.msra.mxu1 %v4275_v44  ;;  %v5374_v27 = vld [vmem:[#allocation18_spill] sm:$0xff] }
 0x37d   :  { %1058 = vmatprep.subr.bf16.mxu0 %v4209_v28  ;;  %1099 = vmatprep.subr.bf16.mxu1 %v4278_v45 }
 0x380   :  { %1059 = vmatpush1.bf16.msra.mxu0 %v4212_v29  ;;  %1100 = vmatpush1.bf16.msra.mxu1 %v4281_v46 }
 0x381   :  { %1060 = vmatprep.subr.bf16.mxu0 %v4217_v30  ;;  %1101 = vmatprep.subr.bf16.mxu1 %v4284_v47 }
 0x384   :  { %1061 = vmatpush1.bf16.msra.mxu0 %v4226_v32  ;;  %1102 = vmatpush1.bf16.msra.mxu1 %v4287_v48 }
 0x385   :  { %1062 = vmatprep.subr.bf16.mxu0 %v4229_v33  ;;  %1103 = vmatprep.subr.bf16.mxu1 %v4290_v49 }
 0x388   :  { %1063 = vmatpush1.bf16.msra.mxu0 %v4235_v34  ;;  %1104 = vmatpush1.bf16.msra.mxu1 %v4293_v50 }
 0x389   :  { %1168 = vmatprep.subr.bf16.mxu0 %v4557_v17  ;;  %1209 = vmatprep.subr.bf16.mxu1 %v4240_v35 }
 0x42b   :  { %v962_v18 = vpop.f32.mrf.mxu0  ;;  %v1003_v19 = vpop.f32.mrf.mxu1 }
 0x42c   :  { %v1010_v22 = vadd.f32 %v962_v18, %v5373_v20  ;;  %v1012_v16 = vadd.f32 %v1003_v19, %v5375_v61  ;;  %v4603_v18 = vld [vmem:[#allocation6 + $0x60] ss:$16 sps:$4 sm:$0xff]   ;;  %v4607_v19 = vld [vmem:[#allocation6 + $0x44] ss:$16 sps:$4 sm:$0xff]  }
 0x42d   :  { %v964_v23 = vpop.f32.mrf.mxu0  ;;  %v1005_v24 = vpop.f32.mrf.mxu1  ;;  %v4611_v20 = vld [vmem:[#allocation6 + $0x40] ss:$16 sps:$4 sm:$0xff]  }
 0x42e   :  { %v3310_v25 = vmul.f32 -1.442695, %v1010_v22  ;;  %v1011_v28 = vadd.f32 %v964_v23, %v5374_v27  ;;  %v3312_v6 = vmul.f32 -1.442695, %v1012_v16  ;;  %v1013_v2 = vadd.f32 %v1005_v24, %v5376_v59  ;;  %v4615_v22 = vld [vmem:[#allocation6 + $0x24] ss:$16 sps:$4 sm:$0xff]  }
 0x42f   :  { %v966_v29 = vpop.f32.mrf.mxu0  ;;  %v1007_v30 = vpop.f32.mrf.mxu1  ;;  %v5379_v16 = vld [vmem:[#allocation21_spill] sm:$0xff] }
 0x430   :  { %3688 = vpow2.f32 %v3310_v25  ;;  %v3311_v1 = vmul.f32 -1.442695, %v1011_v28  ;;  %v5377_v25 = vld [vmem:[#allocation20_spill] sm:$0xff]  ;;  %v5378_v30 = vld [vmem:[#allocation22_spill] sm:$0xff] }
 0x431   :  { %v967_v53 = vpop.f32.mrf.mxu0  ;;  %v1008_v54 = vpop.f32.mrf.mxu1 }
 0x432   :  { %3690 = vpow2.f32 %v3311_v1 }
 0x433   :  { %3692 = vpow2.f32 %v3312_v6 }
 0x434   :  { %3694 = vtanh.f32 %v1013_v2 }
 0x43d   :  { %v3689_v58 = vpop.eup %3688 }
 0x43e   :  { %v1023_v0 = vadd.f32 1.0, %v3689_v58 }
 0x43f   :  { %v3691_v63 = vpop.eup %3690 }
 0x440   :  { %3696 = vrcp.f32 %v1023_v0  ;;  %v1024_v15 = vadd.f32 1.0, %v3691_v63  ;;  %v3693_v26 = vpop.eup %3692 }
 0x441   :  { %v3695_v5 = vpop.eup %3694  ;;  %v1025_v4 = vadd.f32 1.0, %v3693_v26 }
 0x442   :  { %3698 = vrcp.f32 %v1024_v15 }
 0x443   :  { %3700 = vrcp.f32 %v1025_v4 }
 0x44d   :  { %v3697_v60 = vpop.eup %3696 }
 0x44e   :  { %v1034_v51 = vmul.f32 %v3697_v60, %v3695_v5 }
 0x44f   :  { %v3699_v9 = vpop.eup %3698 }
 0x450   :  { %v1033_v13 = vmul.f32 %v3699_v9, %v4522_v12  ;;  %v3701_v56 = vpop.eup %3700  ;;  %v4579_v12 = vld [vmem:[#allocation6 + $0xc0] ss:$16 sps:$4 sm:$0xff]  }
 0x452   :  { %v4566_v3 = vadd.f32 %v1034_v51, %v1033_v13 }
 0x454   :  { %3702 = vtanh.f32 %v4566_v3 }
 0x461   :  { %v3703_v62 = vpop.eup %3702 }
 0x462   :  { %v1037_v7 = vmul.f32 %v3703_v62, %v3701_v56 }
 0x464   :  { %v1038_v55 = vpack.c.bf16 %v1037_v7, %v1037_v7 }
 0x466   :  { %1040 = vst [vmem:[#allocation3 + $0xc] sm:$0xf] %v1038_v55  ;;  %1081 = vmatmul.mubr.bf16.vlgmr.msra.gmra.mxu0 %v1038_v55  ;;  %1122 = vmatmul.mubr.bf16.vlgmr.msra.gmra.mxu1 %v1038_v55 }
 0x467   :  { %1169 = vmatpush1.bf16.msra.mxu0 %v4569_v57  ;;  %1210 = vmatpush1.bf16.msra.mxu1 %v4246_v36  ;;  %v4587_v36 = vld [vmem:[#allocation6 + $0xa0] ss:$16 sps:$4 sm:$0xff]  }
 0x468   :  { %1170 = vmatprep.subr.bf16.mxu0 %v4573_v21  ;;  %1211 = vmatprep.subr.bf16.mxu1 %v4249_v37  ;;  %v4591_v37 = vld [vmem:[#allocation6 + $0x84] ss:$16 sps:$4 sm:$0xff]  }
 0x469   :  { %1200 = vmatprep.mubr.bf16.mxu0 %v5372_v52  ;;  %1241 = vmatprep.mubr.bf16.mxu1 %v5372_v52 }
 0x46b   :  { %1171 = vmatpush1.bf16.msra.mxu0 %v4579_v12  ;;  %1212 = vmatpush1.bf16.msra.mxu1 %v4254_v38 }
 0x46c   :  { %1172 = vmatprep.subr.bf16.mxu0 %v4583_v11  ;;  %1213 = vmatprep.subr.bf16.mxu1 %v4257_v39 }
 0x46f   :  { %1173 = vmatpush1.bf16.msra.mxu0 %v4587_v36  ;;  %1214 = vmatpush1.bf16.msra.mxu1 %v4262_v40 }
 0x470   :  { %1174 = vmatprep.subr.bf16.mxu0 %v4591_v37  ;;  %1215 = vmatprep.subr.bf16.mxu1 %v4264_v41 }
 0x473   :  { %1175 = vmatpush1.bf16.msra.mxu0 %v4595_v10  ;;  %1216 = vmatpush1.bf16.msra.mxu1 %v4269_v42 }
 0x474   :  { %1176 = vmatprep.subr.bf16.mxu0 %v4599_v31  ;;  %1217 = vmatprep.subr.bf16.mxu1 %v4272_v43 }
 0x477   :  { %1177 = vmatpush1.bf16.msra.mxu0 %v4603_v18  ;;  %1218 = vmatpush1.bf16.msra.mxu1 %v4275_v44 }
 0x478   :  { %1178 = vmatprep.subr.bf16.mxu0 %v4607_v19  ;;  %1219 = vmatprep.subr.bf16.mxu1 %v4278_v45 }
 0x47b   :  { %1179 = vmatpush1.bf16.msra.mxu0 %v4611_v20  ;;  %1220 = vmatpush1.bf16.msra.mxu1 %v4281_v46 }
 0x47c   :  { %1180 = vmatprep.subr.bf16.mxu0 %v4615_v22  ;;  %1221 = vmatprep.subr.bf16.mxu1 %v4284_v47 }
 0x47f   :  { %1181 = vmatpush1.bf16.msra.mxu0 %v4226_v32  ;;  %1222 = vmatpush1.bf16.msra.mxu1 %v4287_v48 }
 0x480   :  { %1182 = vmatprep.subr.bf16.mxu0 %v4229_v33  ;;  %1223 = vmatprep.subr.bf16.mxu1 %v4290_v49 }
 0x483   :  { %1183 = vmatpush1.bf16.msra.mxu0 %v4235_v34  ;;  %1224 = vmatpush1.bf16.msra.mxu1 %v4293_v50 }
 0x484   :  { %1288 = vmatprep.subr.bf16.mxu0 %v4557_v17  ;;  %1329 = vmatprep.subr.bf16.mxu1 %v4240_v35  ;;  %v5380_v35 = vld [vmem:[#allocation23_spill] sm:$0xff] }
 0x526   :  { %v1082_v23 = vpop.f32.mrf.mxu0  ;;  %v1123_v24 = vpop.f32.mrf.mxu1 }
 0x527   :  { %v1130_v27 = vadd.f32 %v1082_v23, %v5377_v25  ;;  %v1132_v6 = vadd.f32 %v1123_v24, %v5379_v16  ;;  %v4636_v24 = vld [vmem:[#allocation6 + $0xe8] ss:$16 sps:$4 sm:$0xff]   ;;  %v5382_v25 = vld [vmem:[#allocation26_spill] sm:$0xff] }
 0x528   :  { %v1084_v28 = vpop.f32.mrf.mxu0  ;;  %v1125_v32 = vpop.f32.mrf.mxu1 }
 0x529   :  { %v3313_v29 = vmul.f32 -1.442695, %v1130_v27  ;;  %v1131_v1 = vadd.f32 %v1084_v28, %v5378_v30  ;;  %v3315_v59 = vmul.f32 -1.442695, %v1132_v6  ;;  %v1133_v2 = vadd.f32 %v1125_v32, %v5380_v35 }
 0x52a   :  { %v1086_v33 = vpop.f32.mrf.mxu0  ;;  %v1127_v53 = vpop.f32.mrf.mxu1 }
 0x52b   :  { %3704 = vpow2.f32 %v3313_v29  ;;  %v3314_v54 = vmul.f32 -1.442695, %v1131_v1  ;;  %v5384_v33 = vld [vmem:[#allocation27_spill] sm:$0xff] }
 0x52c   :  { %v1087_v34 = vpop.f32.mrf.mxu0  ;;  %v1128_v61 = vpop.f32.mrf.mxu1 }
 0x52d   :  { %3706 = vpow2.f32 %v3314_v54 }
 0x52e   :  { %3708 = vpow2.f32 %v3315_v59 }
 0x52f   :  { %3710 = vtanh.f32 %v1133_v2 }
 0x538   :  { %v3705_v58 = vpop.eup %3704 }
 0x539   :  { %v1143_v0 = vadd.f32 1.0, %v3705_v58 }
 0x53a   :  { %v3707_v63 = vpop.eup %3706 }
 0x53b   :  { %3712 = vrcp.f32 %v1143_v0  ;;  %v1144_v15 = vadd.f32 1.0, %v3707_v63  ;;  %v3709_v26 = vpop.eup %3708 }
 0x53c   :  { %v3711_v5 = vpop.eup %3710  ;;  %v1145_v4 = vadd.f32 1.0, %v3709_v26 }
 0x53d   :  { %3714 = vrcp.f32 %v1144_v15 }
 0x53e   :  { %3716 = vrcp.f32 %v1145_v4  ;;  %v3916_v4 = vld [vmem:[#allocation6 + $0xac] ss:$16 sps:$4 sm:$0xff]  }
 0x548   :  { %v3713_v60 = vpop.eup %3712 }
 0x549   :  { %v1154_v51 = vmul.f32 %v3713_v60, %v3711_v5 }
 0x54a   :  { %v3715_v9 = vpop.eup %3714 }
 0x54b   :  { %v1153_v13 = vmul.f32 %v3715_v9, %v4566_v3  ;;  %v3717_v62 = vpop.eup %3716  ;;  %v4640_v3 = vld [vmem:[#allocation6 + $0xcc] ss:$16 sps:$4 sm:$0xff]   ;;  %v3915_v9 = vld [vmem:[#allocation6 + $0xc8] ss:$16 sps:$4 sm:$0xff]  }
 0x54d   :  { %v4632_v56 = vadd.f32 %v1154_v51, %v1153_v13  ;;  %v3919_v13 = vld [vmem:[#allocation6 + $0x88] ss:$16 sps:$4 sm:$0xff]  }
 0x54f   :  { %3718 = vtanh.f32 %v4632_v56 }
 0x55c   :  { %v3719_v7 = vpop.eup %3718 }
 0x55d   :  { %v1157_v55 = vmul.f32 %v3719_v7, %v3717_v62  ;;  %v5385_v7 = vld [vmem:[#allocation28_spill] sm:$0xff] }
 0x55f   :  { %v1158_v23 = vpack.c.bf16 %v1157_v55, %v1157_v55 }
 0x561   :  { %1160 = vst [vmem:[#allocation3 + $0x10] sm:$0xf] %v1158_v23  ;;  %1201 = vmatmul.mubr.bf16.vlgmr.msra.gmra.mxu0 %v1158_v23  ;;  %1242 = vmatmul.mubr.bf16.vlgmr.msra.gmra.mxu1 %v1158_v23 }
 0x562   :  { %1289 = vmatpush1.bf16.msra.mxu0 %v4569_v57  ;;  %1330 = vmatpush1.bf16.msra.mxu1 %v4636_v24 }
 0x563   :  { %1290 = vmatprep.subr.bf16.mxu0 %v4573_v21  ;;  %1331 = vmatprep.subr.bf16.mxu1 %v4640_v3 }
 0x564   :  { %1320 = vmatprep.mubr.bf16.mxu0 %v5372_v52  ;;  %1361 = vmatprep.mubr.bf16.mxu1 %v5372_v52 }
 0x566   :  { %1291 = vmatpush1.bf16.msra.mxu0 %v4579_v12  ;;  %1332 = vmatpush1.bf16.msra.mxu1 %v4254_v38  ;;  %v4665_v38 = vld [vmem:[#allocation6 + $0x20] ss:$16 sps:$4 sm:$0xff]  }
 0x567   :  { %1292 = vmatprep.subr.bf16.mxu0 %v4583_v11  ;;  %1333 = vmatprep.subr.bf16.mxu1 %v4257_v39  ;;  %v4669_v39 = vld [vmem:[#allocation6 + $0x4] ss:$16 sps:$4 sm:$0xff]  }
 0x56a   :  { %1293 = vmatpush1.bf16.msra.mxu0 %v4587_v36  ;;  %1334 = vmatpush1.bf16.msra.mxu1 %v4262_v40  ;;  %v4673_v40 = vld [vmem:[#allocation6] ss:$16 sps:$4 sm:$0xff]  }
 0x56b   :  { %1294 = vmatprep.subr.bf16.mxu0 %v4591_v37  ;;  %1335 = vmatprep.subr.bf16.mxu1 %v4264_v41  ;;  %v3914_v41 = vld [vmem:[#allocation6 + $0xec] ss:$16 sps:$4 sm:$0xff]  }
 0x56e   :  { %1295 = vmatpush1.bf16.msra.mxu0 %v4595_v10  ;;  %1336 = vmatpush1.bf16.msra.mxu1 %v4269_v42 }
 0x56f   :  { %1296 = vmatprep.subr.bf16.mxu0 %v4599_v31  ;;  %1337 = vmatprep.subr.bf16.mxu1 %v4272_v43 }
 0x572   :  { %1297 = vmatpush1.bf16.msra.mxu0 %v4603_v18  ;;  %1338 = vmatpush1.bf16.msra.mxu1 %v4275_v44  ;;  %v5381_v44 = vld [vmem:[#allocation24_spill] sm:$0xff] }
 0x573   :  { %1298 = vmatprep.subr.bf16.mxu0 %v4607_v19  ;;  %1339 = vmatprep.subr.bf16.mxu1 %v4278_v45 }
 0x576   :  { %1299 = vmatpush1.bf16.msra.mxu0 %v4611_v20  ;;  %1340 = vmatpush1.bf16.msra.mxu1 %v4281_v46 }
 0x577   :  { %1300 = vmatprep.subr.bf16.mxu0 %v4615_v22  ;;  %1341 = vmatprep.subr.bf16.mxu1 %v4284_v47 }
 0x57a   :  { %1301 = vmatpush1.bf16.msra.mxu0 %v4665_v38  ;;  %1342 = vmatpush1.bf16.msra.mxu1 %v4287_v48 }
 0x57b   :  { %1302 = vmatprep.subr.bf16.mxu0 %v4669_v39  ;;  %1343 = vmatprep.subr.bf16.mxu1 %v4290_v49 }
 0x57e   :  { %1303 = vmatpush1.bf16.msra.mxu0 %v4673_v40  ;;  %1344 = vmatpush1.bf16.msra.mxu1 %v4293_v50  ;;  %v5383_v50 = vld [vmem:[#allocation25_spill] sm:$0xff] }
 0x57f   :  { %1408 = vmatprep.subr.bf16.mxu0 %v4557_v17  ;;  %1449 = vmatprep.subr.bf16.mxu1 %v3914_v41 }
 0x621   :  { %v1202_v42 = vpop.f32.mrf.mxu0  ;;  %v1243_v43 = vpop.f32.mrf.mxu1 }
 0x622   :  { %v1250_v45 = vadd.f32 %v1202_v42, %v5381_v44  ;;  %v1252_v17 = vadd.f32 %v1243_v43, %v5383_v50 }
 0x623   :  { %v1204_v46 = vpop.f32.mrf.mxu0  ;;  %v1245_v47 = vpop.f32.mrf.mxu1 }
 0x624   :  { %v3316_v48 = vmul.f32 -1.442695, %v1250_v45  ;;  %v1251_v27 = vadd.f32 %v1204_v46, %v5382_v25  ;;  %v3318_v1 = vmul.f32 -1.442695, %v1252_v17  ;;  %v1253_v53 = vadd.f32 %v1245_v47, %v5384_v33  ;;  %v5387_v45 = vld [vmem:[#allocation29_spill] sm:$0xff] }
 0x625   :  { %v1206_v49 = vpop.f32.mrf.mxu0  ;;  %v1247_v28 = vpop.f32.mrf.mxu1 }
 0x626   :  { %3720 = vpow2.f32 %v3316_v48  ;;  %v3317_v32 = vmul.f32 -1.442695, %v1251_v27  ;;  %v5388_v48 = vld [vmem:[#allocation31_spill] sm:$0xff] }
 0x627   :  { %v1207_v29 = vpop.f32.mrf.mxu0  ;;  %v1248_v30 = vpop.f32.mrf.mxu1 }
 0x628   :  { %3722 = vpow2.f32 %v3317_v32 }
 0x629   :  { %3724 = vpow2.f32 %v3318_v1 }
 0x62a   :  { %3726 = vtanh.f32 %v1253_v53 }
 0x633   :  { %v3721_v54 = vpop.eup %3720 }
 0x634   :  { %v1263_v34 = vadd.f32 1.0, %v3721_v54 }
 0x635   :  { %v3723_v61 = vpop.eup %3722 }
 0x636   :  { %3728 = vrcp.f32 %v1263_v34  ;;  %v1264_v16 = vadd.f32 1.0, %v3723_v61  ;;  %v3725_v6 = vpop.eup %3724 }
 0x637   :  { %v3727_v59 = vpop.eup %3726  ;;  %v1265_v0 = vadd.f32 1.0, %v3725_v6  ;;  %v3528_v6 = vld [vmem:[#allocation8 + $0xe0] ss:$16 sps:$4 sm:$0xff]  }
 0x638   :  { %3730 = vrcp.f32 %v1264_v16 }
 0x639   :  { %3732 = vrcp.f32 %v1265_v0  ;;  %v3534_v0 = vld [vmem:[#allocation8 + $0xc0] ss:$16 sps:$4 sm:$0xff]  }
 0x643   :  { %v3729_v35 = vpop.eup %3728 }
 0x644   :  { %v1274_v2 = vmul.f32 %v3729_v35, %v3727_v59  ;;  %v3531_v59 = vld [vmem:[#allocation8 + $0xe8] ss:$16 sps:$4 sm:$0xff]  }
 0x645   :  { %v3731_v58 = vpop.eup %3730 }
 0x646   :  { %v1273_v63 = vmul.f32 %v3731_v58, %v4632_v56  ;;  %v3733_v26 = vpop.eup %3732  ;;  %v3530_v56 = vld [vmem:[#allocation8 + $0xe4] ss:$16 sps:$4 sm:$0xff]   ;;  %v3539_v58 = vld [vmem:[#allocation8 + $0xcc] ss:$16 sps:$4 sm:$0xff]  }
 0x648   :  { %v4683_v15 = vadd.f32 %v1274_v2, %v1273_v63  ;;  %v3536_v2 = vld [vmem:[#allocation8 + $0xc4] ss:$16 sps:$4 sm:$0xff]   ;;  %v3537_v63 = vld [vmem:[#allocation8 + $0xc8] ss:$16 sps:$4 sm:$0xff]  }
 0x64a   :  { %3734 = vtanh.f32 %v4683_v15 }
 0x657   :  { %v3735_v5 = vpop.eup %3734 }
 0x658   :  { %v1277_v60 = vmul.f32 %v3735_v5, %v3733_v26  ;;  %v3545_v26 = vld [vmem:[#allocation8 + $0xac] ss:$16 sps:$4 sm:$0xff]   ;;  %v3540_v5 = vld [vmem:[#allocation8 + $0xa0] ss:$16 sps:$4 sm:$0xff]  }
 0x65a   :  { %v1278_v51 = vpack.c.bf16 %v1277_v60, %v1277_v60  ;;  %v3543_v60 = vld [vmem:[#allocation8 + $0xa8] ss:$16 sps:$4 sm:$0xff]  }
 0x65c   :  { %1280 = vst [vmem:[#allocation3 + $0x14] sm:$0xf] %v1278_v51  ;;  %1321 = vmatmul.mubr.bf16.vlgmr.msra.gmra.mxu0 %v1278_v51  ;;  %1362 = vmatmul.mubr.bf16.vlgmr.msra.gmra.mxu1 %v1278_v51  ;;  %v3548_v51 = vld [vmem:[#allocation8 + $0x84] ss:$16 sps:$4 sm:$0xff]  }
 0x65d   :  { %1409 = vmatpush1.bf16.msra.mxu0 %v4569_v57  ;;  %1450 = vmatpush1.bf16.msra.mxu1 %v4636_v24  ;;  %v3917_v57 = vld [vmem:[#allocation6 + $0xa8] ss:$16 sps:$4 sm:$0xff]  }
 0x65e   :  { %1410 = vmatprep.subr.bf16.mxu0 %v4573_v21  ;;  %1451 = vmatprep.subr.bf16.mxu1 %v4640_v3  ;;  %v3918_v21 = vld [vmem:[#allocation6 + $0x8c] ss:$16 sps:$4 sm:$0xff]  }
 0x65f   :  { %1440 = vmatprep.mubr.bf16.mxu0 %v5372_v52  ;;  %1481 = vmatprep.mubr.bf16.mxu1 %v5372_v52 }
 0x661   :  { %1411 = vmatpush1.bf16.msra.mxu0 %v4579_v12  ;;  %1452 = vmatpush1.bf16.msra.mxu1 %v3915_v9  ;;  %v3920_v12 = vld [vmem:[#allocation6 + $0x6c] ss:$16 sps:$4 sm:$0xff]  }
 0x662   :  { %1412 = vmatprep.subr.bf16.mxu0 %v4583_v11  ;;  %1453 = vmatprep.subr.bf16.mxu1 %v3916_v4  ;;  %v3921_v11 = vld [vmem:[#allocation6 + $0x68] ss:$16 sps:$4 sm:$0xff]   ;;  %v3551_v9 = vld [vmem:[#allocation8 + $0x8c] ss:$16 sps:$4 sm:$0xff]   ;;  %v3546_v4 = vld [vmem:[#allocation8 + $0x80] ss:$16 sps:$4 sm:$0xff]  }
 0x665   :  { %1413 = vmatpush1.bf16.msra.mxu0 %v4587_v36  ;;  %1454 = vmatpush1.bf16.msra.mxu1 %v3917_v57  ;;  %v3922_v36 = vld [vmem:[#allocation6 + $0x4c] ss:$16 sps:$4 sm:$0xff]   ;;  %v3549_v57 = vld [vmem:[#allocation8 + $0x88] ss:$16 sps:$4 sm:$0xff]  }
 0x666   :  { %1414 = vmatprep.subr.bf16.mxu0 %v4591_v37  ;;  %1455 = vmatprep.subr.bf16.mxu1 %v3918_v21  ;;  %v3923_v37 = vld [vmem:[#allocation6 + $0x48] ss:$16 sps:$4 sm:$0xff]   ;;  %v3554_v21 = vld [vmem:[#allocation8 + $0x64] ss:$16 sps:$4 sm:$0xff]  }
 0x669   :  { %1415 = vmatpush1.bf16.msra.mxu0 %v4595_v10  ;;  %1456 = vmatpush1.bf16.msra.mxu1 %v3919_v13  ;;  %v3924_v10 = vld [vmem:[#allocation6 + $0x2c] ss:$16 sps:$4 sm:$0xff]  }
 0x66a   :  { %1416 = vmatprep.subr.bf16.mxu0 %v4599_v31  ;;  %1457 = vmatprep.subr.bf16.mxu1 %v3920_v12  ;;  %v3925_v31 = vld [vmem:[#allocation6 + $0x28] ss:$16 sps:$4 sm:$0xff]   ;;  %v3557_v13 = vld [vmem:[#allocation8 + $0x6c] ss:$16 sps:$4 sm:$0xff]   ;;  %v3552_v12 = vld [vmem:[#allocation8 + $0x60] ss:$16 sps:$4 sm:$0xff]  }
 0x66d   :  { %1417 = vmatpush1.bf16.msra.mxu0 %v4603_v18  ;;  %1458 = vmatpush1.bf16.msra.mxu1 %v3921_v11  ;;  %v3926_v18 = vld [vmem:[#allocation6 + $0xc] ss:$16 sps:$4 sm:$0xff]   ;;  %v3555_v11 = vld [vmem:[#allocation8 + $0x68] ss:$16 sps:$4 sm:$0xff]  }
 0x66e   :  { %1418 = vmatprep.subr.bf16.mxu0 %v4607_v19  ;;  %1459 = vmatprep.subr.bf16.mxu1 %v3922_v36  ;;  %v3927_v19 = vld [vmem:[#allocation6 + $0x8] ss:$16 sps:$4 sm:$0xff]   ;;  %v3560_v36 = vld [vmem:[#allocation8 + $0x44] ss:$16 sps:$4 sm:$0xff]  }
 0x671   :  { %1419 = vmatpush1.bf16.msra.mxu0 %v4611_v20  ;;  %1460 = vmatpush1.bf16.msra.mxu1 %v3923_v37  ;;  %v3533_v20 = vld [vmem:[#allocation8 + $0xec] ss:$16 sps:$4 sm:$0xff]  }
 0x672   :  { %1420 = vmatprep.subr.bf16.mxu0 %v4615_v22  ;;  %1461 = vmatprep.subr.bf16.mxu1 %v3924_v10  ;;  %v3563_v37 = vld [vmem:[#allocation8 + $0x4c] ss:$16 sps:$4 sm:$0xff]   ;;  %v3558_v10 = vld [vmem:[#allocation8 + $0x40] ss:$16 sps:$4 sm:$0xff]  }
 0x675   :  { %1421 = vmatpush1.bf16.msra.mxu0 %v4665_v38  ;;  %1462 = vmatpush1.bf16.msra.mxu1 %v3925_v31  ;;  %v5386_v38 = vld [vmem:[#allocation30_spill] sm:$0xff]  ;;  %v3561_v31 = vld [vmem:[#allocation8 + $0x48] ss:$16 sps:$4 sm:$0xff]  }
 0x676   :  { %1422 = vmatprep.subr.bf16.mxu0 %v4669_v39  ;;  %1463 = vmatprep.subr.bf16.mxu1 %v3926_v18  ;;  %v3566_v18 = vld [vmem:[#allocation8 + $0x24] ss:$16 sps:$4 sm:$0xff]  }
 0x679   :  { %1423 = vmatpush1.bf16.msra.mxu0 %v4673_v40  ;;  %1464 = vmatpush1.bf16.msra.mxu1 %v3927_v19  ;;  %v3569_v19 = vld [vmem:[#allocation8 + $0x2c] ss:$16 sps:$4 sm:$0xff]  }
 0x67a   :  { %1799 = vmatprep.subr.bf16.mxu0 %v3530_v56  ;;  %1872 = vmatprep.subr.bf16.mxu1 %v3533_v20  ;;  %v3564_v56 = vld [vmem:[#allocation8 + $0x20] ss:$16 sps:$4 sm:$0xff]   ;;  %v3567_v20 = vld [vmem:[#allocation8 + $0x28] ss:$16 sps:$4 sm:$0xff]  }
 0x71c   :  { %v1322_v62 = vpop.f32.mrf.mxu0  ;;  %v1363_v22 = vpop.f32.mrf.mxu1 }
 0x71d   :  { %v1370_v55 = vadd.f32 %v1322_v62, %v5385_v7  ;;  %v1372_v46 = vadd.f32 %v1363_v22, %v5387_v45  ;;  %v3572_v62 = vld [vmem:[#allocation8 + $0x4] ss:$16 sps:$4 sm:$0xff]   ;;  %v3575_v22 = vld [vmem:[#allocation8 + $0xc] ss:$16 sps:$4 sm:$0xff]   ;;  %v3570_v7 = vld [vmem:[#allocation8] ss:$16 sps:$4 sm:$0xff]  }
 0x71e   :  { %v1324_v23 = vpop.f32.mrf.mxu0  ;;  %v1365_v24 = vpop.f32.mrf.mxu1  ;;  %v4739_v45 = vld [vmem:[#allocation9 + $0xc8] ss:$16 sps:$4 sm:$0xff]  }
 0x71f   :  { %v3319_v3 = vmul.f32 -1.442695, %v1370_v55  ;;  %v1371_v41 = vadd.f32 %v1324_v23, %v5386_v38  ;;  %v3321_v47 = vmul.f32 -1.442695, %v1372_v46  ;;  %v1373_v25 = vadd.f32 %v1365_v24, %v5388_v48  ;;  %v3573_v55 = vld [vmem:[#allocation8 + $0x8] ss:$16 sps:$4 sm:$0xff]  }
 0x720   :  { %v1326_v39 = vpop.f32.mrf.mxu0  ;;  %v1367_v42 = vpop.f32.mrf.mxu1  ;;  %v3576_v23 = vld [vmem:[#allocation3] sm:$0xff]   ;;  %v3577_v24 = vld [vmem:[#allocation3 + $0x8] sm:$0xff]  }
 0x721   :  { %3736 = vpow2.f32 %v3319_v3  ;;  %v3320_v43 = vmul.f32 -1.442695, %v1371_v41  ;;  %v3578_v3 = vld [vmem:[#allocation3 + $0x10] sm:$0xff]   ;;  %v4721_v38 = vld [vmem:[#allocation9 + $0xe4] ss:$16 sps:$4 sm:$0xff]  }
 0x722   :  { %v1327_v40 = vpop.f32.mrf.mxu0  ;;  %v1368_v44 = vpop.f32.mrf.mxu1  ;;  %v4723_v41 = vld [vmem:[#allocation9 + $0xec] ss:$16 sps:$4 sm:$0xff]   ;;  %v4725_v39 = vld [vmem:[#allocation9 + $0xe0] ss:$16 sps:$4 sm:$0xff]   ;;  %v4727_v42 = vld [vmem:[#allocation9 + $0xe8] ss:$16 sps:$4 sm:$0xff]  }
 0x723   :  { %3738 = vpow2.f32 %v3320_v43  ;;  %v4733_v43 = vld [vmem:[#allocation9 + $0xc4] ss:$16 sps:$4 sm:$0xff]   ;;  %v4735_v40 = vld [vmem:[#allocation9 + $0xcc] ss:$16 sps:$4 sm:$0xff]   ;;  %v4737_v44 = vld [vmem:[#allocation9 + $0xc0] ss:$16 sps:$4 sm:$0xff]  }
 0x724   :  { %3740 = vpow2.f32 %v3321_v47  ;;  %v4745_v46 = vld [vmem:[#allocation9 + $0xa4] ss:$16 sps:$4 sm:$0xff]   ;;  %v4747_v47 = vld [vmem:[#allocation9 + $0xac] ss:$16 sps:$4 sm:$0xff]   ;;  %v4749_v48 = vld [vmem:[#allocation9 + $0xa0] ss:$16 sps:$4 sm:$0xff]  }
 0x725   :  { %3742 = vtanh.f32 %v1373_v25  ;;  %v4751_v25 = vld [vmem:[#allocation9 + $0xa8] ss:$16 sps:$4 sm:$0xff]  }
 0x72e   :  { %v3737_v27 = vpop.eup %3736 }
 0x72f   :  { %v1383_v49 = vadd.f32 1.0, %v3737_v27  ;;  %v4757_v27 = vld [vmem:[#allocation9 + $0x84] ss:$16 sps:$4 sm:$0xff]  }
 0x730   :  { %v3739_v28 = vpop.eup %3738 }
 0x731   :  { %3744 = vrcp.f32 %v1383_v49  ;;  %v1384_v32 = vadd.f32 1.0, %v3739_v28  ;;  %v3741_v29 = vpop.eup %3740  ;;  %v4759_v49 = vld [vmem:[#allocation9 + $0x8c] ss:$16 sps:$4 sm:$0xff]   ;;  %v4761_v28 = vld [vmem:[#allocation9 + $0x80] ss:$16 sps:$4 sm:$0xff]  }
 0x732   :  { %v3743_v30 = vpop.eup %3742  ;;  %v1385_v33 = vadd.f32 1.0, %v3741_v29  ;;  %v4767_v29 = vld [vmem:[#allocation9 + $0x64] ss:$16 sps:$4 sm:$0xff]  }
 0x733   :  { %3746 = vrcp.f32 %v1384_v32  ;;  %v4763_v32 = vld [vmem:[#allocation9 + $0x88] ss:$16 sps:$4 sm:$0xff]  }
 0x734   :  { %3748 = vrcp.f32 %v1385_v33  ;;  %v4781_v33 = vld [vmem:[#allocation9 + $0x4c] ss:$16 sps:$4 sm:$0xff]  }
 0x73e   :  { %v3745_v50 = vpop.eup %3744 }
 0x73f   :  { %v1394_v17 = vmul.f32 %v3745_v50, %v3743_v30  ;;  %v4769_v30 = vld [vmem:[#allocation9 + $0x6c] ss:$16 sps:$4 sm:$0xff]   ;;  %v4773_v50 = vld [vmem:[#allocation9 + $0x60] ss:$16 sps:$4 sm:$0xff]  }
 0x740   :  { %v3747_v1 = vpop.eup %3746 }
 0x741   :  { %v1393_v53 = vmul.f32 %v3747_v1, %v4683_v15  ;;  %v3749_v34 = vpop.eup %3748  ;;  %v3542_v15 = vld [vmem:[#allocation8 + $0xa4] ss:$16 sps:$4 sm:$0xff]  }
 0x742   :  { %v4779_v1 = vld [vmem:[#allocation9 + $0x44] ss:$16 sps:$4 sm:$0xff]  }
 0x743   :  { %v4710_v54 = vadd.f32 %v1394_v17, %v1393_v53  ;;  %v4775_v17 = vld [vmem:[#allocation9 + $0x68] ss:$16 sps:$4 sm:$0xff]   ;;  %v4785_v53 = vld [vmem:[#allocation9 + $0x40] ss:$16 sps:$4 sm:$0xff]  }
 0x745   :  { %3750 = vtanh.f32 %v4710_v54 }
 0x752   :  { %v3751_v61 = vpop.eup %3750 }
 0x753   :  { %v1397_v16 = vmul.f32 %v3751_v61, %v3749_v34  ;;  %v4787_v34 = vld [vmem:[#allocation9 + $0x48] ss:$16 sps:$4 sm:$0xff]   ;;  %v4791_v61 = vld [vmem:[#allocation9 + $0x24] ss:$16 sps:$4 sm:$0xff]  }
 0x755   :  { %v1398_v35 = vpack.c.bf16 %v1397_v16, %v1397_v16  ;;  %v4795_v16 = vld [vmem:[#allocation9 + $0x20] ss:$16 sps:$4 sm:$0xff]  }
 0x757   :  { %1400 = vst [vmem:[#allocation3 + $0x18] sm:$0xf] %v1398_v35  ;;  %1441 = vmatmul.mubr.bf16.vlgmr.msra.gmra.mxu0 %v1398_v35  ;;  %1482 = vmatmul.mubr.bf16.vlgmr.msra.gmra.mxu1 %v1398_v35  ;;  %v4802_v35 = vld [vmem:[#allocation9 + $0x4] ss:$16 sps:$4 sm:$0xff]  }
 0x758   :  { %1800 = vmatpush1.bf16.msra.mxu0 %v3528_v6  ;;  %1873 = vmatpush1.bf16.msra.mxu1 %v3531_v59  ;;  %v4797_v6 = vld [vmem:[#allocation9 + $0x2c] ss:$16 sps:$4 sm:$0xff]   ;;  %v4799_v59 = vld [vmem:[#allocation9 + $0x28] ss:$16 sps:$4 sm:$0xff]  }
 0x759   :  { %1801 = vmatprep.subr.bf16.mxu0 %v3536_v2  ;;  %1874 = vmatprep.subr.bf16.mxu1 %v3539_v58  ;;  %v4804_v2 = vld [vmem:[#allocation9 + $0xc] ss:$16 sps:$4 sm:$0xff]   ;;  %v4809_v58 = vld [vmem:[#allocation9] ss:$16 sps:$4 sm:$0xff]  }
 0x75a   :  { %1831 = vmatprep.mubr.bf16.mxu0 %v5372_v52  ;;  %1904 = vmatprep.mubr.bf16.mxu1 %v5372_v52 }
 0x75c   :  { %1802 = vmatpush1.bf16.msra.mxu0 %v3534_v0  ;;  %1875 = vmatpush1.bf16.msra.mxu1 %v3537_v63  ;;  %v4811_v0 = vld [vmem:[#allocation9 + $0x8] ss:$16 sps:$4 sm:$0xff]  }
 0x75d   :  { %1803 = vmatprep.subr.bf16.mxu0 %v3542_v15  ;;  %1876 = vmatprep.subr.bf16.mxu1 %v3545_v26  ;;  %v295_v26 = vadd.f32 %v4471_v14, %v4355_v8 }
 0x760   :  { %1804 = vmatpush1.bf16.msra.mxu0 %v3540_v5  ;;  %1877 = vmatpush1.bf16.msra.mxu1 %v3543_v60  ;;  %v5389_v5 = vld [vmem:[#allocation32_spill] sm:$0xff] }
 0x761   :  { %1805 = vmatprep.subr.bf16.mxu0 %v3548_v51  ;;  %1878 = vmatprep.subr.bf16.mxu1 %v3551_v9 }
 0x764   :  { %1806 = vmatpush1.bf16.msra.mxu0 %v3546_v4  ;;  %1879 = vmatpush1.bf16.msra.mxu1 %v3549_v57 }
 0x765   :  { %1807 = vmatprep.subr.bf16.mxu0 %v3554_v21  ;;  %1880 = vmatprep.subr.bf16.mxu1 %v3557_v13 }
 0x768   :  { %1808 = vmatpush1.bf16.msra.mxu0 %v3552_v12  ;;  %1881 = vmatpush1.bf16.msra.mxu1 %v3555_v11 }
 0x769   :  { %1809 = vmatprep.subr.bf16.mxu0 %v3560_v36  ;;  %1882 = vmatprep.subr.bf16.mxu1 %v3563_v37  ;;  %v5390_v37 = vld [vmem:[#allocation33_spill] sm:$0xff] }
 0x76c   :  { %1810 = vmatpush1.bf16.msra.mxu0 %v3558_v10  ;;  %1883 = vmatpush1.bf16.msra.mxu1 %v3561_v31 }
 0x76d   :  { %1811 = vmatprep.subr.bf16.mxu0 %v3566_v18  ;;  %1884 = vmatprep.subr.bf16.mxu1 %v3569_v19  ;;  %v5391_v18 = vld [vmem:[#allocation34_spill] sm:$0xff] }
 0x770   :  { %1812 = vmatpush1.bf16.msra.mxu0 %v3564_v56  ;;  %1885 = vmatpush1.bf16.msra.mxu1 %v3567_v20 }
 0x771   :  { %1813 = vmatprep.subr.bf16.mxu0 %v3572_v62  ;;  %1886 = vmatprep.subr.bf16.mxu1 %v3575_v22 }
 0x774   :  { %1814 = vmatpush1.bf16.msra.mxu0 %v3570_v7  ;;  %1887 = vmatpush1.bf16.msra.mxu1 %v3573_v55 }
 0x775   :  { %2141 = vmatprep.subr.bf16.mxu0 %v4721_v38  ;;  %2182 = vmatprep.subr.bf16.mxu1 %v4723_v41 }
 0x777   :  { %1832 = vmatmul.mubr.bf16.vlgmr.msra.gmra.mxu0 %v3576_v23  ;;  %1905 = vmatmul.mubr.bf16.vlgmr.msra.gmra.mxu1 %v3576_v23 }
 0x778   :  { %1841 = vmatprep.mubr.bf16.mxu0 %v5372_v52  ;;  %1914 = vmatprep.mubr.bf16.mxu1 %v5372_v52 }
 0x779   :  { %2142 = vmatpush1.bf16.msra.mxu0 %v4725_v39  ;;  %2183 = vmatpush1.bf16.msra.mxu1 %v4727_v42 }
 0x77a   :  { %2143 = vmatprep.subr.bf16.mxu0 %v4733_v43  ;;  %2184 = vmatprep.subr.bf16.mxu1 %v4735_v40 }
 0x77d   :  { %2144 = vmatpush1.bf16.msra.mxu0 %v4737_v44  ;;  %2185 = vmatpush1.bf16.msra.mxu1 %v4739_v45 }
 0x77e   :  { %2145 = vmatprep.subr.bf16.mxu0 %v4745_v46  ;;  %2186 = vmatprep.subr.bf16.mxu1 %v4747_v47 }
 0x77f   :  { %1842 = vmatmul.mubr.bf16.gmra.mxu0 %v3577_v24  ;;  %1915 = vmatmul.mubr.bf16.gmra.mxu1 %v3577_v24 }
 0x780   :  { %1851 = vmatprep.mubr.bf16.mxu0 %v5372_v52  ;;  %1924 = vmatprep.mubr.bf16.mxu1 %v5372_v52 }
 0x781   :  { %2146 = vmatpush1.bf16.msra.mxu0 %v4749_v48  ;;  %2187 = vmatpush1.bf16.msra.mxu1 %v4751_v25 }
 0x782   :  { %2147 = vmatprep.subr.bf16.mxu0 %v4757_v27  ;;  %2188 = vmatprep.subr.bf16.mxu1 %v4759_v49 }
 0x785   :  { %2148 = vmatpush1.bf16.msra.mxu0 %v4761_v28  ;;  %2189 = vmatpush1.bf16.msra.mxu1 %v4763_v32 }
 0x786   :  { %2149 = vmatprep.subr.bf16.mxu0 %v4767_v29  ;;  %2190 = vmatprep.subr.bf16.mxu1 %v4769_v30 }
 0x787   :  { %1852 = vmatmul.mubr.bf16.gmra.mxu0 %v3578_v3  ;;  %1925 = vmatmul.mubr.bf16.gmra.mxu1 %v3578_v3 }
 0x788   :  { %1861 = vmatprep.mubr.bf16.mxu0 %v5372_v52  ;;  %1934 = vmatprep.mubr.bf16.mxu1 %v5372_v52 }
 0x789   :  { %2150 = vmatpush1.bf16.msra.mxu0 %v4773_v50  ;;  %2191 = vmatpush1.bf16.msra.mxu1 %v4775_v17 }
 0x78a   :  { %2151 = vmatprep.subr.bf16.mxu0 %v4779_v1  ;;  %2192 = vmatprep.subr.bf16.mxu1 %v4781_v33 }
 0x78d   :  { %2152 = vmatpush1.bf16.msra.mxu0 %v4785_v53  ;;  %2193 = vmatpush1.bf16.msra.mxu1 %v4787_v34 }
 0x78e   :  { %2153 = vmatprep.subr.bf16.mxu0 %v4791_v61  ;;  %2194 = vmatprep.subr.bf16.mxu1 %v4797_v6 }
 0x791   :  { %2154 = vmatpush1.bf16.msra.mxu0 %v4795_v16  ;;  %2195 = vmatpush1.bf16.msra.mxu1 %v4799_v59 }
 0x792   :  { %2155 = vmatprep.subr.bf16.mxu0 %v4802_v35  ;;  %2196 = vmatprep.subr.bf16.mxu1 %v4804_v2 }
 0x795   :  { %2156 = vmatpush1.bf16.msra.mxu0 %v4809_v58  ;;  %2197 = vmatpush1.bf16.msra.mxu1 %v4811_v0 }
 0x796   :  { %2257 = vmatprep.subr.bf16.mxu0 %v4721_v38  ;;  %2298 = vmatprep.subr.bf16.mxu1 %v4723_v41 }
 0x817   :  { %v1442_v63 = vpop.f32.mrf.mxu0  ;;  %v1483_v15 = vpop.f32.mrf.mxu1 }
 0x818   :  { %v1490_v60 = vadd.f32 %v1442_v63, %v5389_v5  ;;  %v1492_v10 = vadd.f32 %v1483_v15, %v5390_v37 }
 0x819   :  { %v1444_v51 = vpop.f32.mrf.mxu0  ;;  %v1485_v9 = vpop.f32.mrf.mxu1 }
 0x81a   :  { %v3322_v4 = vmul.f32 -1.442695, %v1490_v60  ;;  %v1491_v57 = vadd.f32 %v1444_v51, %v295_v26  ;;  %v3324_v31 = vmul.f32 -1.442695, %v1492_v10  ;;  %v1493_v19 = vadd.f32 %v1485_v9, %v5391_v18 }
 0x81b   :  { %v1446_v21 = vpop.f32.mrf.mxu0  ;;  %v1487_v13 = vpop.f32.mrf.mxu1 }
 0x81c   :  { %3752 = vpow2.f32 %v3322_v4  ;;  %v3323_v12 = vmul.f32 -1.442695, %v1491_v57 }
 0x81d   :  { %v1447_v11 = vpop.f32.mrf.mxu0  ;;  %v1488_v36 = vpop.f32.mrf.mxu1 }
 0x81e   :  { %3754 = vpow2.f32 %v3323_v12 }
 0x81f   :  { %3756 = vpow2.f32 %v3324_v31 }
 0x820   :  { %3758 = vtanh.f32 %v1493_v19 }
 0x829   :  { %v3753_v56 = vpop.eup %3752 }
 0x82a   :  { %v1503_v8 = vadd.f32 1.0, %v3753_v56 }
 0x82b   :  { %v3755_v14 = vpop.eup %3754 }
 0x82c   :  { %3760 = vrcp.f32 %v1503_v8  ;;  %v1504_v20 = vadd.f32 1.0, %v3755_v14  ;;  %v3757_v62 = vpop.eup %3756 }
 0x82d   :  { %v3759_v22 = vpop.eup %3758  ;;  %v1505_v24 = vadd.f32 1.0, %v3757_v62 }
 0x82e   :  { %3762 = vrcp.f32 %v1504_v20 }
 0x82f   :  { %3764 = vrcp.f32 %v1505_v24 }
 0x837   :  { %v1906_v9 = vpop.f32.mrf.mxu1 }
 0x839   :  { %v3761_v7 = vpop.eup %3760  ;;  %v1908_v57 = vpop.f32.mrf.mxu1 }
 0x83a   :  { %v1514_v55 = vmul.f32 %v3761_v7, %v3759_v22 }
 0x83b   :  { %v3763_v23 = vpop.eup %3762  ;;  %v4865_v13 = vpop.f32.mrf.mxu1 }
 0x83c   :  { %v1513_v3 = vmul.f32 %v3763_v23, %v4710_v54  ;;  %v3765_v15 = vpop.eup %3764  ;;  %v1833_v54 = vpop.f32.mrf.mxu0 }
 0x83d   :  { %v4869_v11 = vpop.f32.mrf.mxu1 }
 0x83e   :  { %v1515_v63 = vadd.f32 %v1514_v55, %v1513_v3  ;;  %v1835_v4 = vpop.f32.mrf.mxu0  ;;  %v1593_v3 = vld [vmem:[#allocation11] sm:$0xf] }
 0x83f   :  { %v4873_v37 = vpop.f32.mrf.mxu1 }
 0x840   :  { %3766 = vtanh.f32 %v1515_v63  ;;  %v4863_v21 = vpop.f32.mrf.mxu0 }
 0x841   :  { %v4877_v31 = vpop.f32.mrf.mxu1 }
 0x842   :  { %v4867_v12 = vpop.f32.mrf.mxu0  ;;  %5392 = vst [vmem:[#allocation16_spill] sm:$0xff] %v4877_v31 }
 0x843   :  { %v4881_v19 = vpop.f32.mrf.mxu1 }
 0x844   :  { %v4871_v36 = vpop.f32.mrf.mxu0  ;;  %5394 = vst [vmem:[#allocation17_spill] sm:$0xff] %v4881_v19 }
 0x845   :  { %v4885_v8 = vpop.f32.mrf.mxu1 }
 0x846   :  { %v4875_v10 = vpop.f32.mrf.mxu0  ;;  %5396 = vst [vmem:[#allocation20_spill] sm:$0xff] %v4885_v8 }
 0x847   :  { %v4889_v20 = vpop.f32.mrf.mxu1 }
 0x848   :  { %v4879_v18 = vpop.f32.mrf.mxu0  ;;  %5398 = vst [vmem:[#allocation21_spill] sm:$0xff] %v4889_v20 }
 0x849   :  { %5393 = vst [vmem:[#allocation18_spill] sm:$0xff] %v4879_v18  ;;  %v4893_v22 = vpop.f32.mrf.mxu1 }
 0x84a   :  { %v4883_v56 = vpop.f32.mrf.mxu0  ;;  %5400 = vst [vmem:[#allocation24_spill] sm:$0xff] %v4893_v22 }
 0x84b   :  { %5395 = vst [vmem:[#allocation19_spill] sm:$0xff] %v4883_v56  ;;  %v4897_v55 = vpop.f32.mrf.mxu1 }
 0x84c   :  { %v4887_v14 = vpop.f32.mrf.mxu0  ;;  %5402 = vst [vmem:[#allocation25_spill] sm:$0xff] %v4897_v55 }
 0x84d   :  { %v3767_v26 = vpop.eup %3766  ;;  %5397 = vst [vmem:[#allocation22_spill] sm:$0xff] %v4887_v14  ;;  %v4901_v24 = vpop.f32.mrf.mxu1 }
 0x84e   :  { %v1517_v5 = vmul.f32 %v3767_v26, %v3765_v15  ;;  %v4891_v62 = vpop.f32.mrf.mxu0  ;;  %5404 = vst [vmem:[#allocation28_spill] sm:$0xff] %v4901_v24 }
 0x84f   :  { %5399 = vst [vmem:[#allocation23_spill] sm:$0xff] %v4891_v62 }
 0x850   :  { %v1518_v60 = vpack.c.bf16 %v1517_v5, %v1517_v5  ;;  %v4895_v7 = vpop.f32.mrf.mxu0 }
 0x851   :  { %5401 = vst [vmem:[#allocation26_spill] sm:$0xff] %v4895_v7 }
 0x852   :  { %1520 = vst [vmem:[#allocation3 + $0x1c] sm:$0xf] %v1518_v60  ;;  %v4899_v23 = vpop.f32.mrf.mxu0  ;;  %v5409_v60 = vld [vmem:[#allocation15_spill] sm:$0xff] }
 0x853   :  { %5403 = vst [vmem:[#allocation27_spill] sm:$0xff] %v4899_v23  ;;  %v5413_v23 = vsub.s32 1, %v5409_v60  ;;  %v5416_v18 = vsub.s32 2, %v5409_v60 }
 0x855   :  { %v4921_v24 = vrot.slane %v1593_v3, %v5413_v23 }
 0x857   :  { %v1836_v62 = vadd.f32 %v1835_v4, %v4921_v24  ;;  %v5417_v4 = vsub.s32 3, %v5409_v60 }
 0x859   :  { %v3617_v51 = vld [vmem:[#allocation3 + $0x18] sm:$0xff]  }
 0x85a   :  { %1862 = vmatmul.mubr.bf16.gmra.mxu0 %v3617_v51  ;;  %1935 = vmatmul.mubr.bf16.gmra.mxu1 %v3617_v51  ;;  %v5410_v51 = vsub.s32 0, %v5409_v60 }
 0x85b   :  { %2173 = vmatprep.mubr.bf16.mxu0 %v5372_v52  ;;  %2214 = vmatprep.mubr.bf16.mxu1 %v5372_v52 }
 0x85c   :  { %v4913_v22 = vrot.slane %v1593_v3, %v5410_v51 }
 0x862   :  { %2174 = vmatmul.mubr.bf16.vlgmr.msra.gmra.mxu0 %v5372_v52  ;;  %2215 = vmatmul.mubr.bf16.vlgmr.msra.gmra.mxu1 %v5372_v52 }
 0x863   :  { %2258 = vmatpush1.bf16.msra.mxu0 %v4725_v39  ;;  %2299 = vmatpush1.bf16.msra.mxu1 %v4727_v42 }
 0x864   :  { %2259 = vmatprep.subr.bf16.mxu0 %v4733_v43  ;;  %2300 = vmatprep.subr.bf16.mxu1 %v4735_v40 }
 0x865   :  { %2289 = vmatprep.mubr.bf16.mxu0 %v5372_v52  ;;  %2330 = vmatprep.mubr.bf16.mxu1 %v5372_v52 }
 0x867   :  { %2260 = vmatpush1.bf16.msra.mxu0 %v4737_v44  ;;  %2301 = vmatpush1.bf16.msra.mxu1 %v4739_v45 }
 0x868   :  { %2261 = vmatprep.subr.bf16.mxu0 %v4745_v46  ;;  %2302 = vmatprep.subr.bf16.mxu1 %v4747_v47 }
 0x86b   :  { %2262 = vmatpush1.bf16.msra.mxu0 %v4749_v48  ;;  %2303 = vmatpush1.bf16.msra.mxu1 %v4751_v25 }
 0x86c   :  { %2263 = vmatprep.subr.bf16.mxu0 %v4757_v27  ;;  %2304 = vmatprep.subr.bf16.mxu1 %v4759_v49 }
 0x86f   :  { %2264 = vmatpush1.bf16.msra.mxu0 %v4761_v28  ;;  %2305 = vmatpush1.bf16.msra.mxu1 %v4763_v32 }
 0x870   :  { %2265 = vmatprep.subr.bf16.mxu0 %v4767_v29  ;;  %2306 = vmatprep.subr.bf16.mxu1 %v4769_v30 }
 0x873   :  { %2266 = vmatpush1.bf16.msra.mxu0 %v4773_v50  ;;  %2307 = vmatpush1.bf16.msra.mxu1 %v4775_v17 }
 0x874   :  { %2267 = vmatprep.subr.bf16.mxu0 %v4779_v1  ;;  %2308 = vmatprep.subr.bf16.mxu1 %v4781_v33 }
 0x877   :  { %2268 = vmatpush1.bf16.msra.mxu0 %v4785_v53  ;;  %2309 = vmatpush1.bf16.msra.mxu1 %v4787_v34 }
 0x878   :  { %2269 = vmatprep.subr.bf16.mxu0 %v4791_v61  ;;  %2310 = vmatprep.subr.bf16.mxu1 %v4797_v6 }
 0x87b   :  { %2270 = vmatpush1.bf16.msra.mxu0 %v4795_v16  ;;  %2311 = vmatpush1.bf16.msra.mxu1 %v4799_v59 }
 0x87c   :  { %2271 = vmatprep.subr.bf16.mxu0 %v4802_v35  ;;  %2312 = vmatprep.subr.bf16.mxu1 %v4804_v2 }
 0x87f   :  { %2272 = vmatpush1.bf16.msra.mxu0 %v4809_v58  ;;  %2313 = vmatpush1.bf16.msra.mxu1 %v4811_v0 }
 0x880   :  { %2373 = vmatprep.subr.bf16.mxu0 %v4721_v38  ;;  %2414 = vmatprep.subr.bf16.mxu1 %v4723_v41 }
 0x91a   :  { %v4903_v63 = vpop.f32.mrf.mxu0  ;;  %v4905_v15 = vpop.f32.mrf.mxu1 }
 0x91b   :  { %5405 = vst [vmem:[#allocation30_spill] sm:$0xff] %v4903_v63  ;;  %5406 = vst [vmem:[#allocation29_spill] sm:$0xff] %v4905_v15  ;;  %v1834_v15 = vadd.f32 %v1833_v54, %v4913_v22 }
 0x91c   :  { %v4907_v26 = vpop.f32.mrf.mxu0  ;;  %v4909_v5 = vpop.f32.mrf.mxu1 }
 0x91d   :  { %5407 = vst [vmem:[#allocation31_spill] sm:$0xff] %v4907_v26  ;;  %5408 = vst [vmem:[#allocation32_spill] sm:$0xff] %v4909_v5 }
 0x91e   :  { %v4915_v7 = vpop.f32.mrf.mxu0  ;;  %v4917_v55 = vpop.f32.mrf.mxu1 }
 0x91f   :  { %5411 = vst [vmem:[#allocation33_spill] sm:$0xff] %v4915_v7  ;;  %5412 = vst [vmem:[#allocation34_spill] sm:$0xff] %v4917_v55 }
 0x920   :  { %v4923_v20 = vpop.f32.mrf.mxu0  ;;  %v4925_v63 = vpop.f32.mrf.mxu1 }
 0x921   :  { %5414 = vst [vmem:[#allocation15_spill] sm:$0xff] %v4923_v20  ;;  %5415 = vst [vmem:[#allocation35_spill] sm:$0xff] %v4925_v63  ;;  %v4931_v20 = vrot.slane %v1593_v3, %v5416_v18 }
 0x922   :  { %v2175_v26 = vpop.f32.mrf.mxu0  ;;  %v2216_v5 = vpop.f32.mrf.mxu1 }
 0x923   :  { %v2223_v51 = vadd.f32 %v2175_v26, %v1834_v15  ;;  %v1907_v54 = vadd.f32 %v1906_v9, %v4931_v20  ;;  %v4936_v15 = vrot.slane %v1593_v3, %v5417_v4 }
 0x924   :  { %v2177_v14 = vpop.f32.mrf.mxu0  ;;  %v2218_v8 = vpop.f32.mrf.mxu1 }
 0x925   :  { %v3393_v7 = vmul.f32 -1.442695, %v2223_v51  ;;  %v2224_v19 = vadd.f32 %v2177_v14, %v1836_v62  ;;  %v2225_v26 = vadd.f32 %v2216_v5, %v1907_v54  ;;  %v1909_v14 = vadd.f32 %v1908_v57, %v4936_v15 }
 0x926   :  { %v2179_v55 = vpop.f32.mrf.mxu0  ;;  %v2220_v56 = vpop.f32.mrf.mxu1 }
 0x927   :  { %3768 = vpow2.f32 %v3393_v7  ;;  %v3394_v23 = vmul.f32 -1.442695, %v2224_v19  ;;  %v3395_v62 = vmul.f32 -1.442695, %v2225_v26  ;;  %v2226_v7 = vadd.f32 %v2218_v8, %v1909_v14 }
 0x928   :  { %v2180_v63 = vpop.f32.mrf.mxu0  ;;  %v2221_v31 = vpop.f32.mrf.mxu1  ;;  %v1838_v26 = vadd.f32 %v4863_v21, %v4913_v22  ;;  %v1911_v21 = vadd.f32 %v4865_v13, %v4931_v20 }
 0x929   :  { %3770 = vpow2.f32 %v3394_v23 }
 0x92a   :  { %3772 = vpow2.f32 %v3395_v62 }
 0x934   :  { %v3769_v56 = vpop.eup %3768 }
 0x935   :  { %v2236_v19 = vadd.f32 1.0, %v3769_v56  ;;  %v1840_v56 = vadd.f32 %v4867_v12, %v4921_v24 }
 0x936   :  { %v3771_v55 = vpop.eup %3770 }
 0x937   :  { %3774 = vrcp.f32 %v2236_v19  ;;  %v2237_v18 = vadd.f32 1.0, %v3771_v55  ;;  %v3773_v31 = vpop.eup %3772 }
 0x938   :  { %3776 = vtanh.f32 %v2226_v7  ;;  %v2238_v60 = vadd.f32 1.0, %v3773_v31 }
 0x939   :  { %3778 = vrcp.f32 %v2237_v18 }
 0x93a   :  { %3780 = vrcp.f32 %v2238_v60 }
 0x944   :  { %v3775_v63 = vpop.eup %3774 }
 0x945   :  { %v3777_v9 = vpop.eup %3776 }
 0x946   :  { %v3779_v51 = vpop.eup %3778  ;;  %v2247_v23 = vmul.f32 %v3777_v9, %v3775_v63 }
 0x947   :  { %v2246_v3 = vmul.f32 0.0, %v3779_v51  ;;  %v3781_v57 = vpop.eup %3780 }
 0x949   :  { %v4939_v5 = vadd.f32 %v2247_v23, %v2246_v3 }
 0x94b   :  { %3782 = vtanh.f32 %v4939_v5 }
 0x958   :  { %v3783_v8 = vpop.eup %3782 }
 0x959   :  { %v2250_v54 = vmul.f32 %v3783_v8, %v3781_v57  ;;  %v1913_v57 = vadd.f32 %v4869_v11, %v4936_v15 }
 0x95b   :  { %v2251_v4 = vpack.c.bf16 %v2250_v54, %v2250_v54 }
 0x95d   :  { %2252 = vst [vmem:[#allocation3] sm:$0xf] %v2251_v4  ;;  %2290 = vmatmul.mubr.bf16.vlgmr.msra.gmra.mxu0 %v2251_v4  ;;  %2331 = vmatmul.mubr.bf16.vlgmr.msra.gmra.mxu1 %v2251_v4 }
 0x95e   :  { %2374 = vmatpush1.bf16.msra.mxu0 %v4725_v39  ;;  %2415 = vmatpush1.bf16.msra.mxu1 %v4727_v42 }
 0x95f   :  { %2375 = vmatprep.subr.bf16.mxu0 %v4733_v43  ;;  %2416 = vmatprep.subr.bf16.mxu1 %v4735_v40 }
 0x960   :  { %2405 = vmatprep.mubr.bf16.mxu0 %v5372_v52  ;;  %2446 = vmatprep.mubr.bf16.mxu1 %v5372_v52 }
 0x962   :  { %2376 = vmatpush1.bf16.msra.mxu0 %v4737_v44  ;;  %2417 = vmatpush1.bf16.msra.mxu1 %v4739_v45 }
 0x963   :  { %2377 = vmatprep.subr.bf16.mxu0 %v4745_v46  ;;  %2418 = vmatprep.subr.bf16.mxu1 %v4747_v47 }
 0x966   :  { %2378 = vmatpush1.bf16.msra.mxu0 %v4749_v48  ;;  %2419 = vmatpush1.bf16.msra.mxu1 %v4751_v25 }
 0x967   :  { %2379 = vmatprep.subr.bf16.mxu0 %v4757_v27  ;;  %2420 = vmatprep.subr.bf16.mxu1 %v4759_v49 }
 0x96a   :  { %2380 = vmatpush1.bf16.msra.mxu0 %v4761_v28  ;;  %2421 = vmatpush1.bf16.msra.mxu1 %v4763_v32 }
 0x96b   :  { %2381 = vmatprep.subr.bf16.mxu0 %v4767_v29  ;;  %2422 = vmatprep.subr.bf16.mxu1 %v4769_v30 }
 0x96e   :  { %2382 = vmatpush1.bf16.msra.mxu0 %v4773_v50  ;;  %2423 = vmatpush1.bf16.msra.mxu1 %v4775_v17 }
 0x96f   :  { %2383 = vmatprep.subr.bf16.mxu0 %v4779_v1  ;;  %2424 = vmatprep.subr.bf16.mxu1 %v4781_v33 }
 0x972   :  { %2384 = vmatpush1.bf16.msra.mxu0 %v4785_v53  ;;  %2425 = vmatpush1.bf16.msra.mxu1 %v4787_v34 }
 0x973   :  { %2385 = vmatprep.subr.bf16.mxu0 %v4791_v61  ;;  %2426 = vmatprep.subr.bf16.mxu1 %v4797_v6 }
 0x976   :  { %2386 = vmatpush1.bf16.msra.mxu0 %v4795_v16  ;;  %2427 = vmatpush1.bf16.msra.mxu1 %v4799_v59 }
 0x977   :  { %2387 = vmatprep.subr.bf16.mxu0 %v4802_v35  ;;  %2428 = vmatprep.subr.bf16.mxu1 %v4804_v2 }
 0x97a   :  { %2388 = vmatpush1.bf16.msra.mxu0 %v4809_v58  ;;  %2429 = vmatpush1.bf16.msra.mxu1 %v4811_v0 }
 0x97b   :  { %2489 = vmatprep.subr.bf16.mxu0 %v4721_v38  ;;  %2530 = vmatprep.subr.bf16.mxu1 %v4723_v41 }
 0xa1d   :  { %v2291_v14 = vpop.f32.mrf.mxu0  ;;  %v2332_v62 = vpop.f32.mrf.mxu1 }
 0xa1e   :  { %v2339_v7 = vadd.f32 %v2291_v14, %v1838_v26  ;;  %v2341_v23 = vadd.f32 %v2332_v62, %v1911_v21  ;;  %v1846_v21 = vadd.f32 %v4875_v10, %v4921_v24 }
 0xa1f   :  { %v2293_v19 = vpop.f32.mrf.mxu0  ;;  %v2334_v55 = vpop.f32.mrf.mxu1 }
 0xa20   :  { %v3396_v18 = vmul.f32 -1.442695, %v2339_v7  ;;  %v2340_v31 = vadd.f32 %v2293_v19, %v1840_v56  ;;  %v3398_v12 = vmul.f32 -1.442695, %v2341_v23  ;;  %v2342_v8 = vadd.f32 %v2334_v55, %v1913_v57 }
 0xa21   :  { %v2295_v63 = vpop.f32.mrf.mxu0  ;;  %v2336_v9 = vpop.f32.mrf.mxu1 }
 0xa22   :  { %3784 = vpow2.f32 %v3396_v18  ;;  %v3397_v51 = vmul.f32 -1.442695, %v2340_v31 }
 0xa23   :  { %v2296_v60 = vpop.f32.mrf.mxu0  ;;  %v2337_v3 = vpop.f32.mrf.mxu1 }
 0xa24   :  { %3786 = vpow2.f32 %v3397_v51 }
 0xa25   :  { %3788 = vpow2.f32 %v3398_v12 }
 0xa26   :  { %3790 = vtanh.f32 %v2342_v8 }
 0xa2f   :  { %v3785_v54 = vpop.eup %3784 }
 0xa30   :  { %v2352_v4 = vadd.f32 1.0, %v3785_v54 }
 0xa31   :  { %v3787_v26 = vpop.eup %3786 }
 0xa32   :  { %3792 = vrcp.f32 %v2352_v4  ;;  %v2353_v14 = vadd.f32 1.0, %v3787_v26  ;;  %v3789_v56 = vpop.eup %3788 }
 0xa33   :  { %v3791_v7 = vpop.eup %3790  ;;  %v2354_v13 = vadd.f32 1.0, %v3789_v56 }
 0xa34   :  { %3794 = vrcp.f32 %v2353_v14 }
 0xa35   :  { %3796 = vrcp.f32 %v2354_v13 }
 0xa3f   :  { %v3793_v19 = vpop.eup %3792 }
 0xa40   :  { %v2363_v18 = vmul.f32 %v3793_v19, %v3791_v7 }
 0xa41   :  { %v3795_v31 = vpop.eup %3794 }
 0xa42   :  { %v2362_v62 = vmul.f32 %v3795_v31, %v4939_v5  ;;  %v3797_v11 = vpop.eup %3796  ;;  %v1844_v5 = vadd.f32 %v4871_v36, %v4913_v22  ;;  %v1917_v36 = vadd.f32 %v4873_v37, %v4931_v20 }
 0xa44   :  { %v4985_v63 = vadd.f32 %v2363_v18, %v2362_v62  ;;  %v5418_v18 = vld [vmem:[#allocation16_spill] sm:$0xff] }
 0xa45   :  { %v1919_v31 = vadd.f32 %v5418_v18, %v4936_v15 }
 0xa46   :  { %3798 = vtanh.f32 %v4985_v63 }
 0xa53   :  { %v3799_v55 = vpop.eup %3798 }
 0xa54   :  { %v2366_v9 = vmul.f32 %v3799_v55, %v3797_v11 }
 0xa56   :  { %v2367_v51 = vpack.c.bf16 %v2366_v9, %v2366_v9 }
 0xa58   :  { %2368 = vst [vmem:[#allocation3 + $0x4] sm:$0xf] %v2367_v51  ;;  %2406 = vmatmul.mubr.bf16.vlgmr.msra.gmra.mxu0 %v2367_v51  ;;  %2447 = vmatmul.mubr.bf16.vlgmr.msra.gmra.mxu1 %v2367_v51 }
 0xa59   :  { %2490 = vmatpush1.bf16.msra.mxu0 %v4725_v39  ;;  %2531 = vmatpush1.bf16.msra.mxu1 %v4727_v42 }
 0xa5a   :  { %2491 = vmatprep.subr.bf16.mxu0 %v4733_v43  ;;  %2532 = vmatprep.subr.bf16.mxu1 %v4735_v40 }
 0xa5b   :  { %2521 = vmatprep.mubr.bf16.mxu0 %v5372_v52  ;;  %2562 = vmatprep.mubr.bf16.mxu1 %v5372_v52 }
 0xa5d   :  { %2492 = vmatpush1.bf16.msra.mxu0 %v4737_v44  ;;  %2533 = vmatpush1.bf16.msra.mxu1 %v4739_v45 }
 0xa5e   :  { %2493 = vmatprep.subr.bf16.mxu0 %v4745_v46  ;;  %2534 = vmatprep.subr.bf16.mxu1 %v4747_v47 }
 0xa61   :  { %2494 = vmatpush1.bf16.msra.mxu0 %v4749_v48  ;;  %2535 = vmatpush1.bf16.msra.mxu1 %v4751_v25 }
 0xa62   :  { %2495 = vmatprep.subr.bf16.mxu0 %v4757_v27  ;;  %2536 = vmatprep.subr.bf16.mxu1 %v4759_v49 }
 0xa65   :  { %2496 = vmatpush1.bf16.msra.mxu0 %v4761_v28  ;;  %2537 = vmatpush1.bf16.msra.mxu1 %v4763_v32 }
 0xa66   :  { %2497 = vmatprep.subr.bf16.mxu0 %v4767_v29  ;;  %2538 = vmatprep.subr.bf16.mxu1 %v4769_v30 }
 0xa69   :  { %2498 = vmatpush1.bf16.msra.mxu0 %v4773_v50  ;;  %2539 = vmatpush1.bf16.msra.mxu1 %v4775_v17 }
 0xa6a   :  { %2499 = vmatprep.subr.bf16.mxu0 %v4779_v1  ;;  %2540 = vmatprep.subr.bf16.mxu1 %v4781_v33 }
 0xa6d   :  { %2500 = vmatpush1.bf16.msra.mxu0 %v4785_v53  ;;  %2541 = vmatpush1.bf16.msra.mxu1 %v4787_v34 }
 0xa6e   :  { %2501 = vmatprep.subr.bf16.mxu0 %v4791_v61  ;;  %2542 = vmatprep.subr.bf16.mxu1 %v4797_v6 }
 0xa71   :  { %2502 = vmatpush1.bf16.msra.mxu0 %v4795_v16  ;;  %2543 = vmatpush1.bf16.msra.mxu1 %v4799_v59 }
 0xa72   :  { %2503 = vmatprep.subr.bf16.mxu0 %v4802_v35  ;;  %2544 = vmatprep.subr.bf16.mxu1 %v4804_v2 }
 0xa75   :  { %2504 = vmatpush1.bf16.msra.mxu0 %v4809_v58  ;;  %2545 = vmatpush1.bf16.msra.mxu1 %v4811_v0 }
 0xa76   :  { %2605 = vmatprep.subr.bf16.mxu0 %v4721_v38  ;;  %2646 = vmatprep.subr.bf16.mxu1 %v4723_v41 }
 0xb18   :  { %v2407_v60 = vpop.f32.mrf.mxu0  ;;  %v2448_v3 = vpop.f32.mrf.mxu1 }
 0xb19   :  { %v2455_v23 = vadd.f32 %v2407_v60, %v1844_v5  ;;  %v2457_v19 = vadd.f32 %v2448_v3, %v1917_v36 }
 0xb1a   :  { %v2409_v57 = vpop.f32.mrf.mxu0  ;;  %v2450_v12 = vpop.f32.mrf.mxu1 }
 0xb1b   :  { %v3399_v8 = vmul.f32 -1.442695, %v2455_v23  ;;  %v2456_v54 = vadd.f32 %v2409_v57, %v1846_v21  ;;  %v3401_v10 = vmul.f32 -1.442695, %v2457_v19  ;;  %v2458_v13 = vadd.f32 %v2450_v12, %v1919_v31 }
 0xb1c   :  { %v2411_v4 = vpop.f32.mrf.mxu0  ;;  %v2452_v26 = vpop.f32.mrf.mxu1 }
 0xb1d   :  { %3800 = vpow2.f32 %v3399_v8  ;;  %v3400_v14 = vmul.f32 -1.442695, %v2456_v54 }
 0xb1e   :  { %v2412_v56 = vpop.f32.mrf.mxu0  ;;  %v2453_v7 = vpop.f32.mrf.mxu1 }
 0xb1f   :  { %3802 = vpow2.f32 %v3400_v14  ;;  %v5420_v7 = vld [vmem:[#allocation19_spill] sm:$0xff] }
 0xb20   :  { %3804 = vpow2.f32 %v3401_v10  ;;  %v1850_v36 = vadd.f32 %v5420_v7, %v4921_v24 }
 0xb21   :  { %3806 = vtanh.f32 %v2458_v13 }
 0xb2a   :  { %v3801_v62 = vpop.eup %3800 }
 0xb2b   :  { %v2468_v11 = vadd.f32 1.0, %v3801_v62 }
 0xb2c   :  { %v3803_v55 = vpop.eup %3802 }
 0xb2d   :  { %3808 = vrcp.f32 %v2468_v11  ;;  %v2469_v9 = vadd.f32 1.0, %v3803_v55  ;;  %v3805_v51 = vpop.eup %3804 }
 0xb2e   :  { %v3807_v5 = vpop.eup %3806  ;;  %v2470_v37 = vadd.f32 1.0, %v3805_v51 }
 0xb2f   :  { %3810 = vrcp.f32 %v2469_v9 }
 0xb30   :  { %3812 = vrcp.f32 %v2470_v37 }
 0xb3a   :  { %v3809_v60 = vpop.eup %3808 }
 0xb3b   :  { %v2479_v21 = vmul.f32 %v3809_v60, %v3807_v5  ;;  %v5421_v5 = vld [vmem:[#allocation17_spill] sm:$0xff] }
 0xb3c   :  { %v3811_v23 = vpop.eup %3810  ;;  %v1921_v60 = vadd.f32 %v5421_v5, %v4931_v20 }
 0xb3d   :  { %v2478_v3 = vmul.f32 %v3811_v23, %v4985_v63  ;;  %v3813_v12 = vpop.eup %3812  ;;  %v5419_v63 = vld [vmem:[#allocation18_spill] sm:$0xff]  ;;  %v5422_v23 = vld [vmem:[#allocation20_spill] sm:$0xff] }
 0xb3e   :  { %v1848_v26 = vadd.f32 %v5419_v63, %v4913_v22  ;;  %v1923_v37 = vadd.f32 %v5422_v23, %v4936_v15  ;;  %v5126_v23 = vld [vmem:[#allocation9 + $0xe0] ss:$16 sps:$4 sm:$0xff]  }
 0xb3f   :  { %v5031_v57 = vadd.f32 %v2479_v21, %v2478_v3 }
 0xb41   :  { %3814 = vtanh.f32 %v5031_v57 }
 0xb4e   :  { %v3815_v8 = vpop.eup %3814 }
 0xb4f   :  { %v2482_v54 = vmul.f32 %v3815_v8, %v3813_v12 }
 0xb51   :  { %v2483_v4 = vpack.c.bf16 %v2482_v54, %v2482_v54 }
 0xb53   :  { %2484 = vst [vmem:[#allocation3 + $0x8] sm:$0xf] %v2483_v4  ;;  %2522 = vmatmul.mubr.bf16.vlgmr.msra.gmra.mxu0 %v2483_v4  ;;  %2563 = vmatmul.mubr.bf16.vlgmr.msra.gmra.mxu1 %v2483_v4 }
 0xb54   :  { %2606 = vmatpush1.bf16.msra.mxu0 %v4725_v39  ;;  %2647 = vmatpush1.bf16.msra.mxu1 %v4727_v42 }
 0xb55   :  { %2607 = vmatprep.subr.bf16.mxu0 %v4733_v43  ;;  %2648 = vmatprep.subr.bf16.mxu1 %v4735_v40 }
 0xb56   :  { %2637 = vmatprep.mubr.bf16.mxu0 %v5372_v52  ;;  %2678 = vmatprep.mubr.bf16.mxu1 %v5372_v52 }
 0xb58   :  { %2608 = vmatpush1.bf16.msra.mxu0 %v4737_v44  ;;  %2649 = vmatpush1.bf16.msra.mxu1 %v4739_v45 }
 0xb59   :  { %2609 = vmatprep.subr.bf16.mxu0 %v4745_v46  ;;  %2650 = vmatprep.subr.bf16.mxu1 %v4747_v47 }
 0xb5c   :  { %2610 = vmatpush1.bf16.msra.mxu0 %v4749_v48  ;;  %2651 = vmatpush1.bf16.msra.mxu1 %v4751_v25 }
 0xb5d   :  { %2611 = vmatprep.subr.bf16.mxu0 %v4757_v27  ;;  %2652 = vmatprep.subr.bf16.mxu1 %v4759_v49 }
 0xb60   :  { %2612 = vmatpush1.bf16.msra.mxu0 %v4761_v28  ;;  %2653 = vmatpush1.bf16.msra.mxu1 %v4763_v32 }
 0xb61   :  { %2613 = vmatprep.subr.bf16.mxu0 %v4767_v29  ;;  %2654 = vmatprep.subr.bf16.mxu1 %v4769_v30 }
 0xb64   :  { %2614 = vmatpush1.bf16.msra.mxu0 %v4773_v50  ;;  %2655 = vmatpush1.bf16.msra.mxu1 %v4775_v17 }
 0xb65   :  { %2615 = vmatprep.subr.bf16.mxu0 %v4779_v1  ;;  %2656 = vmatprep.subr.bf16.mxu1 %v4781_v33 }
 0xb68   :  { %2616 = vmatpush1.bf16.msra.mxu0 %v4785_v53  ;;  %2657 = vmatpush1.bf16.msra.mxu1 %v4787_v34 }
 0xb69   :  { %2617 = vmatprep.subr.bf16.mxu0 %v4791_v61  ;;  %2658 = vmatprep.subr.bf16.mxu1 %v4797_v6 }
 0xb6c   :  { %2618 = vmatpush1.bf16.msra.mxu0 %v4795_v16  ;;  %2659 = vmatpush1.bf16.msra.mxu1 %v4799_v59 }
 0xb6d   :  { %2619 = vmatprep.subr.bf16.mxu0 %v4802_v35  ;;  %2660 = vmatprep.subr.bf16.mxu1 %v4804_v2 }
 0xb70   :  { %2620 = vmatpush1.bf16.msra.mxu0 %v4809_v58  ;;  %2661 = vmatpush1.bf16.msra.mxu1 %v4811_v0 }
 0xb71   :  { %2721 = vmatprep.subr.bf16.mxu0 %v4721_v38  ;;  %2762 = vmatprep.subr.bf16.mxu1 %v4723_v41 }
 0xc13   :  { %v2523_v14 = vpop.f32.mrf.mxu0  ;;  %v2564_v56 = vpop.f32.mrf.mxu1 }
 0xc14   :  { %v2571_v19 = vadd.f32 %v2523_v14, %v1848_v26  ;;  %v2573_v21 = vadd.f32 %v2564_v56, %v1921_v60 }
 0xc15   :  { %v2525_v18 = vpop.f32.mrf.mxu0  ;;  %v2566_v31 = vpop.f32.mrf.mxu1 }
 0xc16   :  { %v3402_v10 = vmul.f32 -1.442695, %v2571_v19  ;;  %v2572_v13 = vadd.f32 %v2525_v18, %v1850_v36  ;;  %v3404_v3 = vmul.f32 -1.442695, %v2573_v21  ;;  %v2574_v12 = vadd.f32 %v2566_v31, %v1923_v37  ;;  %v5129_v37 = vld [vmem:[#allocation9 + $0xe8] ss:$16 sps:$4 sm:$0xff]  }
 0xc17   :  { %v2527_v62 = vpop.f32.mrf.mxu0  ;;  %v2568_v11 = vpop.f32.mrf.mxu1 }
 0xc18   :  { %3816 = vpow2.f32 %v3402_v10  ;;  %v3403_v55 = vmul.f32 -1.442695, %v2572_v13 }
 0xc19   :  { %v2528_v9 = vpop.f32.mrf.mxu0  ;;  %v2569_v51 = vpop.f32.mrf.mxu1 }
 0xc1a   :  { %3818 = vpow2.f32 %v3403_v55 }
 0xc1b   :  { %3820 = vpow2.f32 %v3404_v3  ;;  %v5132_v3 = vld [vmem:[#allocation9 + $0xc4] ss:$16 sps:$4 sm:$0xff]  }
 0xc1c   :  { %3822 = vtanh.f32 %v2574_v12  ;;  %v5135_v12 = vld [vmem:[#allocation9 + $0xcc] ss:$16 sps:$4 sm:$0xff]  }
 0xc25   :  { %v3817_v8 = vpop.eup %3816 }
 0xc26   :  { %v2584_v54 = vadd.f32 1.0, %v3817_v8  ;;  %v5140_v8 = vld [vmem:[#allocation9 + $0xc0] ss:$16 sps:$4 sm:$0xff]  }
 0xc27   :  { %v3819_v4 = vpop.eup %3818 }
 0xc28   :  { %3824 = vrcp.f32 %v2584_v54  ;;  %v2585_v63 = vadd.f32 1.0, %v3819_v4  ;;  %v3821_v26 = vpop.eup %3820  ;;  %v5143_v54 = vld [vmem:[#allocation9 + $0xc8] ss:$16 sps:$4 sm:$0xff]   ;;  %v5146_v4 = vld [vmem:[#allocation9 + $0xa4] ss:$16 sps:$4 sm:$0xff]  }
 0xc29   :  { %v3823_v14 = vpop.eup %3822  ;;  %v2586_v18 = vadd.f32 1.0, %v3821_v26  ;;  %v5152_v26 = vld [vmem:[#allocation9 + $0xa0] ss:$16 sps:$4 sm:$0xff]  }
 0xc2a   :  { %3826 = vrcp.f32 %v2585_v63  ;;  %v5149_v63 = vld [vmem:[#allocation9 + $0xac] ss:$16 sps:$4 sm:$0xff]  }
 0xc2b   :  { %3828 = vrcp.f32 %v2586_v18  ;;  %v5167_v18 = vld [vmem:[#allocation9 + $0x88] ss:$16 sps:$4 sm:$0xff]  }
 0xc35   :  { %v3825_v7 = vpop.eup %3824 }
 0xc36   :  { %v2595_v36 = vmul.f32 %v3825_v7, %v3823_v14  ;;  %v5155_v14 = vld [vmem:[#allocation9 + $0xa8] ss:$16 sps:$4 sm:$0xff]   ;;  %v5158_v7 = vld [vmem:[#allocation9 + $0x84] ss:$16 sps:$4 sm:$0xff]  }
 0xc37   :  { %v3827_v19 = vpop.eup %3826 }
 0xc38   :  { %v2594_v56 = vmul.f32 %v3827_v19, %v5031_v57  ;;  %v3829_v31 = vpop.eup %3828  ;;  %v5164_v19 = vld [vmem:[#allocation9 + $0x80] ss:$16 sps:$4 sm:$0xff]  }
 0xc3a   :  { %v5077_v10 = vadd.f32 %v2595_v36, %v2594_v56  ;;  %v5161_v36 = vld [vmem:[#allocation9 + $0x8c] ss:$16 sps:$4 sm:$0xff]   ;;  %v5170_v56 = vld [vmem:[#allocation9 + $0x64] ss:$16 sps:$4 sm:$0xff]  }
 0xc3c   :  { %3830 = vtanh.f32 %v5077_v10 }
 0xc49   :  { %v3831_v13 = vpop.eup %3830 }
 0xc4a   :  { %v2598_v62 = vmul.f32 %v3831_v13, %v3829_v31  ;;  %v5176_v31 = vld [vmem:[#allocation9 + $0x60] ss:$16 sps:$4 sm:$0xff]   ;;  %v5179_v13 = vld [vmem:[#allocation9 + $0x68] ss:$16 sps:$4 sm:$0xff]  }
 0xc4c   :  { %v2599_v11 = vpack.c.bf16 %v2598_v62, %v2598_v62  ;;  %v5182_v62 = vld [vmem:[#allocation9 + $0x44] ss:$16 sps:$4 sm:$0xff]  }
 0xc4e   :  { %2600 = vst [vmem:[#allocation3 + $0xc] sm:$0xf] %v2599_v11  ;;  %2638 = vmatmul.mubr.bf16.vlgmr.msra.gmra.mxu0 %v2599_v11  ;;  %2679 = vmatmul.mubr.bf16.vlgmr.msra.gmra.mxu1 %v2599_v11  ;;  %v5185_v11 = vld [vmem:[#allocation9 + $0x4c] ss:$16 sps:$4 sm:$0xff]  }
 0xc4f   :  { %2722 = vmatpush1.bf16.msra.mxu0 %v4725_v39  ;;  %2763 = vmatpush1.bf16.msra.mxu1 %v4727_v42  ;;  %v5423_v39 = vld [vmem:[#allocation22_spill] sm:$0xff] }
 0xc50   :  { %2723 = vmatprep.subr.bf16.mxu0 %v4733_v43  ;;  %2764 = vmatprep.subr.bf16.mxu1 %v4735_v40  ;;  %v1854_v42 = vadd.f32 %v5423_v39, %v4913_v22  ;;  %v5188_v39 = vld [vmem:[#allocation9 + $0x40] ss:$16 sps:$4 sm:$0xff]  }
 0xc51   :  { %2753 = vmatprep.mubr.bf16.mxu0 %v5372_v52  ;;  %2794 = vmatprep.mubr.bf16.mxu1 %v5372_v52 }
 0xc53   :  { %2724 = vmatpush1.bf16.msra.mxu0 %v4737_v44  ;;  %2765 = vmatpush1.bf16.msra.mxu1 %v4739_v45  ;;  %v5424_v44 = vld [vmem:[#allocation23_spill] sm:$0xff] }
 0xc54   :  { %2725 = vmatprep.subr.bf16.mxu0 %v4745_v46  ;;  %2766 = vmatprep.subr.bf16.mxu1 %v4747_v47  ;;  %v1856_v45 = vadd.f32 %v5424_v44, %v4921_v24  ;;  %v5200_v44 = vld [vmem:[#allocation9 + $0x20] ss:$16 sps:$4 sm:$0xff]  }
 0xc57   :  { %2726 = vmatpush1.bf16.msra.mxu0 %v4749_v48  ;;  %2767 = vmatpush1.bf16.msra.mxu1 %v4751_v25 }
 0xc58   :  { %2727 = vmatprep.subr.bf16.mxu0 %v4757_v27  ;;  %2768 = vmatprep.subr.bf16.mxu1 %v4759_v49 }
 0xc5b   :  { %2728 = vmatpush1.bf16.msra.mxu0 %v4761_v28  ;;  %2769 = vmatpush1.bf16.msra.mxu1 %v4763_v32 }
 0xc5c   :  { %2729 = vmatprep.subr.bf16.mxu0 %v4767_v29  ;;  %2770 = vmatprep.subr.bf16.mxu1 %v4769_v30 }
 0xc5f   :  { %2730 = vmatpush1.bf16.msra.mxu0 %v4773_v50  ;;  %2771 = vmatpush1.bf16.msra.mxu1 %v4775_v17  ;;  %v5426_v17 = vld [vmem:[#allocation24_spill] sm:$0xff] }
 0xc60   :  { %2731 = vmatprep.subr.bf16.mxu0 %v4779_v1  ;;  %2772 = vmatprep.subr.bf16.mxu1 %v4781_v33  ;;  %v1929_v1 = vadd.f32 %v5426_v17, %v4936_v15 }
 0xc63   :  { %2732 = vmatpush1.bf16.msra.mxu0 %v4785_v53  ;;  %2773 = vmatpush1.bf16.msra.mxu1 %v4787_v34 }
 0xc64   :  { %2733 = vmatprep.subr.bf16.mxu0 %v4791_v61  ;;  %2774 = vmatprep.subr.bf16.mxu1 %v4797_v6 }
 0xc67   :  { %2734 = vmatpush1.bf16.msra.mxu0 %v4795_v16  ;;  %2775 = vmatpush1.bf16.msra.mxu1 %v4799_v59 }
 0xc68   :  { %2735 = vmatprep.subr.bf16.mxu0 %v4802_v35  ;;  %2776 = vmatprep.subr.bf16.mxu1 %v4804_v2 }
 0xc6b   :  { %2736 = vmatpush1.bf16.msra.mxu0 %v4809_v58  ;;  %2777 = vmatpush1.bf16.msra.mxu1 %v4811_v0 }
 0xc6c   :  { %2837 = vmatprep.subr.bf16.mxu0 %v4721_v38  ;;  %2878 = vmatprep.subr.bf16.mxu1 %v4723_v41  ;;  %v5425_v41 = vld [vmem:[#allocation21_spill] sm:$0xff] }
 0xc6d   :  { %v1927_v30 = vadd.f32 %v5425_v41, %v4931_v20  ;;  %v5428_v41 = vld [vmem:[#allocation27_spill] sm:$0xff] }
 0xd0e   :  { %v2639_v43 = vpop.f32.mrf.mxu0  ;;  %v2680_v40 = vpop.f32.mrf.mxu1 }
 0xd0f   :  { %v2687_v46 = vadd.f32 %v2639_v43, %v1854_v42  ;;  %v2689_v50 = vadd.f32 %v2680_v40, %v1927_v30  ;;  %v5191_v42 = vld [vmem:[#allocation9 + $0x48] ss:$16 sps:$4 sm:$0xff]   ;;  %v5194_v43 = vld [vmem:[#allocation9 + $0x24] ss:$16 sps:$4 sm:$0xff]   ;;  %v5197_v40 = vld [vmem:[#allocation9 + $0x2c] ss:$16 sps:$4 sm:$0xff]   ;;  %v1860_v30 = vadd.f32 %v5428_v41, %v4921_v24 }
 0xd10   :  { %v2641_v47 = vpop.f32.mrf.mxu0  ;;  %v2682_v48 = vpop.f32.mrf.mxu1 }
 0xd11   :  { %v3405_v25 = vmul.f32 -1.442695, %v2687_v46  ;;  %v2688_v27 = vadd.f32 %v2641_v47, %v1856_v45  ;;  %v3407_v33 = vmul.f32 -1.442695, %v2689_v50  ;;  %v2690_v53 = vadd.f32 %v2682_v48, %v1929_v1  ;;  %v5203_v45 = vld [vmem:[#allocation9 + $0x28] ss:$16 sps:$4 sm:$0xff]  }
 0xd12   :  { %v2643_v49 = vpop.f32.mrf.mxu0  ;;  %v2684_v28 = vpop.f32.mrf.mxu1  ;;  %v5206_v46 = vld [vmem:[#allocation9 + $0x4] ss:$16 sps:$4 sm:$0xff]   ;;  %v5209_v47 = vld [vmem:[#allocation9 + $0xc] ss:$16 sps:$4 sm:$0xff]   ;;  %v5212_v48 = vld [vmem:[#allocation9] ss:$16 sps:$4 sm:$0xff]  }
 0xd13   :  { %3832 = vpow2.f32 %v3405_v25  ;;  %v3406_v32 = vmul.f32 -1.442695, %v2688_v27  ;;  %v5215_v25 = vld [vmem:[#allocation9 + $0x8] ss:$16 sps:$4 sm:$0xff]   ;;  %v3958_v27 = vld [vmem:[#allocation9 + $0xe4] ss:$16 sps:$4 sm:$0xff]  }
 0xd14   :  { %v2644_v38 = vpop.f32.mrf.mxu0  ;;  %v2685_v29 = vpop.f32.mrf.mxu1  ;;  %v3959_v49 = vld [vmem:[#allocation9 + $0xec] ss:$16 sps:$4 sm:$0xff]  }
 0xd15   :  { %3834 = vpow2.f32 %v3406_v32  ;;  %v5427_v28 = vld [vmem:[#allocation26_spill] sm:$0xff] }
 0xd16   :  { %3836 = vpow2.f32 %v3407_v33  ;;  %v1858_v32 = vadd.f32 %v5427_v28, %v4913_v22 }
 0xd17   :  { %3838 = vtanh.f32 %v2690_v53 }
 0xd20   :  { %v3833_v34 = vpop.eup %3832 }
 0xd21   :  { %v2700_v61 = vadd.f32 1.0, %v3833_v34 }
 0xd22   :  { %v3835_v16 = vpop.eup %3834 }
 0xd23   :  { %3840 = vrcp.f32 %v2700_v61  ;;  %v2701_v6 = vadd.f32 1.0, %v3835_v16  ;;  %v3837_v59 = vpop.eup %3836 }
 0xd24   :  { %v3839_v35 = vpop.eup %3838  ;;  %v2702_v57 = vadd.f32 1.0, %v3837_v59 }
 0xd25   :  { %3842 = vrcp.f32 %v2701_v6 }
 0xd26   :  { %3844 = vrcp.f32 %v2702_v57 }
 0xd30   :  { %v3841_v2 = vpop.eup %3840 }
 0xd31   :  { %v2711_v58 = vmul.f32 %v3841_v2, %v3839_v35  ;;  %v5429_v35 = vld [vmem:[#allocation25_spill] sm:$0xff] }
 0xd32   :  { %v3843_v0 = vpop.eup %3842  ;;  %v1931_v2 = vadd.f32 %v5429_v35, %v4931_v20 }
 0xd33   :  { %v2710_v55 = vmul.f32 %v3843_v0, %v5077_v10  ;;  %v3845_v51 = vpop.eup %3844  ;;  %v5173_v10 = vld [vmem:[#allocation9 + $0x6c] ss:$16 sps:$4 sm:$0xff]  }
 0xd34   :  { %v5430_v0 = vld [vmem:[#allocation28_spill] sm:$0xff] }
 0xd35   :  { %v5123_v9 = vadd.f32 %v2711_v58, %v2710_v55  ;;  %v1933_v57 = vadd.f32 %v5430_v0, %v4936_v15  ;;  %v3630_v0 = vld [vmem:[%s5341_s7 + $0x30] sm:$0xff]  }
 0xd37   :  { %3846 = vtanh.f32 %v5123_v9 }
 0xd44   :  { %v3847_v5 = vpop.eup %3846 }
 0xd45   :  { %v2714_v60 = vmul.f32 %v3847_v5, %v3845_v51 }
 0xd47   :  { %v2715_v21 = vpack.c.bf16 %v2714_v60, %v2714_v60 }
 0xd49   :  { %2716 = vst [vmem:[#allocation3 + $0x10] sm:$0xf] %v2715_v21  ;;  %2754 = vmatmul.mubr.bf16.vlgmr.msra.gmra.mxu0 %v2715_v21  ;;  %2795 = vmatmul.mubr.bf16.vlgmr.msra.gmra.mxu1 %v2715_v21 }
 0xd4a   :  { %2838 = vmatpush1.bf16.msra.mxu0 %v5126_v23  ;;  %2879 = vmatpush1.bf16.msra.mxu1 %v5129_v37 }
 0xd4b   :  { %2839 = vmatprep.subr.bf16.mxu0 %v5132_v3  ;;  %2880 = vmatprep.subr.bf16.mxu1 %v5135_v12 }
 0xd4c   :  { %2869 = vmatprep.mubr.bf16.mxu0 %v5372_v52  ;;  %2910 = vmatprep.mubr.bf16.mxu1 %v5372_v52 }
 0xd4e   :  { %2840 = vmatpush1.bf16.msra.mxu0 %v5140_v8  ;;  %2881 = vmatpush1.bf16.msra.mxu1 %v5143_v54 }
 0xd4f   :  { %2841 = vmatprep.subr.bf16.mxu0 %v5146_v4  ;;  %2882 = vmatprep.subr.bf16.mxu1 %v5149_v63 }
 0xd52   :  { %2842 = vmatpush1.bf16.msra.mxu0 %v5152_v26  ;;  %2883 = vmatpush1.bf16.msra.mxu1 %v5155_v14 }
 0xd53   :  { %2843 = vmatprep.subr.bf16.mxu0 %v5158_v7  ;;  %2884 = vmatprep.subr.bf16.mxu1 %v5161_v36 }
 0xd56   :  { %2844 = vmatpush1.bf16.msra.mxu0 %v5164_v19  ;;  %2885 = vmatpush1.bf16.msra.mxu1 %v5167_v18 }
 0xd57   :  { %2845 = vmatprep.subr.bf16.mxu0 %v5170_v56  ;;  %2886 = vmatprep.subr.bf16.mxu1 %v5173_v10 }
 0xd5a   :  { %2846 = vmatpush1.bf16.msra.mxu0 %v5176_v31  ;;  %2887 = vmatpush1.bf16.msra.mxu1 %v5179_v13 }
 0xd5b   :  { %2847 = vmatprep.subr.bf16.mxu0 %v5182_v62  ;;  %2888 = vmatprep.subr.bf16.mxu1 %v5185_v11 }
 0xd5e   :  { %2848 = vmatpush1.bf16.msra.mxu0 %v5188_v39  ;;  %2889 = vmatpush1.bf16.msra.mxu1 %v5191_v42 }
 0xd5f   :  { %2849 = vmatprep.subr.bf16.mxu0 %v5194_v43  ;;  %2890 = vmatprep.subr.bf16.mxu1 %v5197_v40 }
 0xd62   :  { %2850 = vmatpush1.bf16.msra.mxu0 %v5200_v44  ;;  %2891 = vmatpush1.bf16.msra.mxu1 %v5203_v45 }
 0xd63   :  { %2851 = vmatprep.subr.bf16.mxu0 %v5206_v46  ;;  %2892 = vmatprep.subr.bf16.mxu1 %v5209_v47 }
 0xd66   :  { %2852 = vmatpush1.bf16.msra.mxu0 %v5212_v48  ;;  %2893 = vmatpush1.bf16.msra.mxu1 %v5215_v25 }
 0xd67   :  { %2953 = vmatprep.subr.bf16.mxu0 %v3958_v27  ;;  %2994 = vmatprep.subr.bf16.mxu1 %v3959_v49 }
 0xe09   :  { %v2755_v38 = vpop.f32.mrf.mxu0  ;;  %v2796_v29 = vpop.f32.mrf.mxu1 }
 0xe0a   :  { %v2803_v50 = vadd.f32 %v2755_v38, %v1858_v32  ;;  %v2805_v58 = vadd.f32 %v2796_v29, %v1931_v2 }
 0xe0b   :  { %v2757_v17 = vpop.f32.mrf.mxu0  ;;  %v2798_v1 = vpop.f32.mrf.mxu1 }
 0xe0c   :  { %v3408_v33 = vmul.f32 -1.442695, %v2803_v50  ;;  %v2804_v53 = vadd.f32 %v2757_v17, %v1860_v30  ;;  %v3410_v55 = vmul.f32 -1.442695, %v2805_v58  ;;  %v2806_v5 = vadd.f32 %v2798_v1, %v1933_v57  ;;  %v3629_v57 = vld [vmem:[#allocation3] sm:$0xff]  }
 0xe0d   :  { %v2759_v34 = vpop.f32.mrf.mxu0  ;;  %v2800_v61 = vpop.f32.mrf.mxu1 }
 0xe0e   :  { %3848 = vpow2.f32 %v3408_v33  ;;  %v3409_v16 = vmul.f32 -1.442695, %v2804_v53 }
 0xe0f   :  { %v2760_v6 = vpop.f32.mrf.mxu0  ;;  %v2801_v59 = vpop.f32.mrf.mxu1 }
 0xe10   :  { %3850 = vpow2.f32 %v3409_v16 }
 0xe11   :  { %3852 = vpow2.f32 %v3410_v55  ;;  %v3631_v55 = vld [vmem:[%s5341_s7 + $0x28] sm:$0xff]  }
 0xe1b   :  { %v3849_v51 = vpop.eup %3848 }
 0xe1c   :  { %v2816_v60 = vadd.f32 1.0, %v3849_v51  ;;  %v3632_v51 = vld [vmem:[%s5341_s7 + $0x20] sm:$0xff]  }
 0xe1d   :  { %v3851_v21 = vpop.eup %3850 }
 0xe1e   :  { %3854 = vrcp.f32 %v2816_v60  ;;  %v2817_v27 = vadd.f32 1.0, %v3851_v21  ;;  %v3853_v49 = vpop.eup %3852  ;;  %v3634_v60 = vld [vmem:[%s5341_s7 + $0x10] sm:$0xff]   ;;  %v3635_v21 = vld [vmem:[%s5341_s7 + $0x8] sm:$0xff]  }
 0xe1f   :  { %3856 = vtanh.f32 %v2806_v5  ;;  %v2818_v41 = vadd.f32 1.0, %v3853_v49  ;;  %v3633_v5 = vld [vmem:[%s5341_s7 + $0x18] sm:$0xff]   ;;  %v3637_v49 = vld [vmem:[#allocation3 + $0x8] sm:$0xff]  }
 0xe20   :  { %3858 = vrcp.f32 %v2817_v27  ;;  %v3636_v27 = vld [vmem:[%s5341_s7] sm:$0xff]  }
 0xe21   :  { %3860 = vrcp.f32 %v2818_v41 }
 0xe2b   :  { %v3855_v28 = vpop.eup %3854 }
 0xe2c   :  { %v3857_v32 = vpop.eup %3856 }
 0xe2d   :  { %v3859_v38 = vpop.eup %3858  ;;  %v2827_v30 = vmul.f32 %v3857_v32, %v3855_v28  ;;  %v5435_v32 = vld [vmem:[#allocation33_spill] sm:$0xff] }
 0xe2e   :  { %v2826_v29 = vmul.f32 %v3859_v38, %v5123_v9  ;;  %v3861_v17 = vpop.eup %3860  ;;  %v5431_v9 = vld [vmem:[#allocation30_spill] sm:$0xff]  ;;  %v1868_v38 = vadd.f32 %v5435_v32, %v4913_v22 }
 0xe30   :  { %v5227_v50 = vadd.f32 %v2827_v30, %v2826_v29  ;;  %v5436_v30 = vld [vmem:[#allocation15_spill] sm:$0xff] }
 0xe32   :  { %3862 = vtanh.f32 %v5227_v50 }
 0xe3f   :  { %v3863_v1 = vpop.eup %3862 }
 0xe40   :  { %v2830_v33 = vmul.f32 %v3863_v1, %v3861_v17 }
 0xe42   :  { %v2831_v53 = vpack.c.bf16 %v2830_v33, %v2830_v33 }
 0xe44   :  { %2832 = vst [vmem:[#allocation3 + $0x14] sm:$0xf] %v2831_v53  ;;  %2870 = vmatmul.mubr.bf16.vlgmr.msra.gmra.mxu0 %v2831_v53  ;;  %2911 = vmatmul.mubr.bf16.vlgmr.msra.gmra.mxu1 %v2831_v53 }
 0xe45   :  { %2954 = vmatpush1.bf16.msra.mxu0 %v5126_v23  ;;  %2995 = vmatpush1.bf16.msra.mxu1 %v5129_v37  ;;  %v1864_v23 = vadd.f32 %v5431_v9, %v4913_v22 }
 0xe46   :  { %2955 = vmatprep.subr.bf16.mxu0 %v5132_v3  ;;  %2996 = vmatprep.subr.bf16.mxu1 %v5135_v12  ;;  %v5432_v12 = vld [vmem:[#allocation31_spill] sm:$0xff] }
 0xe47   :  { %2985 = vmatprep.mubr.bf16.mxu0 %v5372_v52  ;;  %3026 = vmatprep.mubr.bf16.mxu1 %v5372_v52  ;;  %v3628_v52 = vld [vmem:[%s5341_s7 + $0x38] sm:$0xff]  }
 0xe49   :  { %2956 = vmatpush1.bf16.msra.mxu0 %v5140_v8  ;;  %2997 = vmatpush1.bf16.msra.mxu1 %v5143_v54  ;;  %v1866_v8 = vadd.f32 %v5432_v12, %v4921_v24 }
 0xe4a   :  { %2957 = vmatprep.subr.bf16.mxu0 %v5146_v4  ;;  %2998 = vmatprep.subr.bf16.mxu1 %v5149_v63 }
 0xe4b   :  { %v3638_v28 = vld [vmem:[#allocation3 + $0x10] sm:$0xff]  }
 0xe4d   :  { %2958 = vmatpush1.bf16.msra.mxu0 %v5152_v26  ;;  %2999 = vmatpush1.bf16.msra.mxu1 %v5155_v14 }
 0xe4e   :  { %2959 = vmatprep.subr.bf16.mxu0 %v5158_v7  ;;  %3000 = vmatprep.subr.bf16.mxu1 %v5161_v36 }
 0xe51   :  { %2960 = vmatpush1.bf16.msra.mxu0 %v5164_v19  ;;  %3001 = vmatpush1.bf16.msra.mxu1 %v5167_v18 }
 0xe52   :  { %2961 = vmatprep.subr.bf16.mxu0 %v5170_v56  ;;  %3002 = vmatprep.subr.bf16.mxu1 %v5173_v10  ;;  %v5433_v10 = vld [vmem:[#allocation29_spill] sm:$0xff] }
 0xe55   :  { %2962 = vmatpush1.bf16.msra.mxu0 %v5176_v31  ;;  %3003 = vmatpush1.bf16.msra.mxu1 %v5179_v13  ;;  %v1937_v31 = vadd.f32 %v5433_v10, %v4931_v20 }
 0xe56   :  { %2963 = vmatprep.subr.bf16.mxu0 %v5182_v62  ;;  %3004 = vmatprep.subr.bf16.mxu1 %v5185_v11  ;;  %v5434_v62 = vld [vmem:[#allocation32_spill] sm:$0xff] }
 0xe57   :  { %v1939_v11 = vadd.f32 %v5434_v62, %v4936_v15 }
 0xe59   :  { %2964 = vmatpush1.bf16.msra.mxu0 %v5188_v39  ;;  %3005 = vmatpush1.bf16.msra.mxu1 %v5191_v42 }
 0xe5a   :  { %2965 = vmatprep.subr.bf16.mxu0 %v5194_v43  ;;  %3006 = vmatprep.subr.bf16.mxu1 %v5197_v40 }
 0xe5d   :  { %2966 = vmatpush1.bf16.msra.mxu0 %v5200_v44  ;;  %3007 = vmatpush1.bf16.msra.mxu1 %v5203_v45 }
 0xe5e   :  { %2967 = vmatprep.subr.bf16.mxu0 %v5206_v46  ;;  %3008 = vmatprep.subr.bf16.mxu1 %v5209_v47 }
 0xe61   :  { %2968 = vmatpush1.bf16.msra.mxu0 %v5212_v48  ;;  %3009 = vmatpush1.bf16.msra.mxu1 %v5215_v25 }
 0xe62   :  { %3442 = vmatprep.subr.bf16.mxu0 %v3628_v52 }
 0xf04   :  { %v2871_v37 = vpop.f32.mrf.mxu0  ;;  %v2912_v3 = vpop.f32.mrf.mxu1 }
 0xf05   :  { %v2919_v54 = vadd.f32 %v2871_v37, %v1864_v23  ;;  %v2921_v13 = vadd.f32 %v2912_v3, %v1937_v31 }
 0xf06   :  { %v2873_v4 = vpop.f32.mrf.mxu0  ;;  %v2914_v63 = vpop.f32.mrf.mxu1 }
 0xf07   :  { %v3411_v26 = vmul.f32 -1.442695, %v2919_v54  ;;  %v2920_v14 = vadd.f32 %v2873_v4, %v1866_v8  ;;  %v3413_v39 = vmul.f32 -1.442695, %v2921_v13  ;;  %v2922_v42 = vadd.f32 %v2914_v63, %v1939_v11  ;;  %v5437_v8 = vld [vmem:[#allocation34_spill] sm:$0xff]  ;;  %v5438_v4 = vld [vmem:[#allocation35_spill] sm:$0xff] }
 0xf08   :  { %v2875_v7 = vpop.f32.mrf.mxu0  ;;  %v2916_v36 = vpop.f32.mrf.mxu1  ;;  %v1941_v22 = vadd.f32 %v5437_v8, %v4931_v20  ;;  %v1943_v63 = vadd.f32 %v5438_v4, %v4936_v15 }
 0xf09   :  { %3864 = vpow2.f32 %v3411_v26  ;;  %v3412_v19 = vmul.f32 -1.442695, %v2920_v14 }
 0xf0a   :  { %v2876_v18 = vpop.f32.mrf.mxu0  ;;  %v2917_v56 = vpop.f32.mrf.mxu1 }
 0xf0b   :  { %3866 = vpow2.f32 %v3412_v19  ;;  %v3417_v18 = vld [vmem:[%s5342_s8] ss:$0 sm:$0xff] }
 0xf0c   :  { %3868 = vpow2.f32 %v3413_v39 }
 0xf0d   :  { %3870 = vtanh.f32 %v2922_v42 }
 0xf16   :  { %v3865_v43 = vpop.eup %3864 }
 0xf17   :  { %v2932_v40 = vadd.f32 1.0, %v3865_v43 }
 0xf18   :  { %v3867_v44 = vpop.eup %3866 }
 0xf19   :  { %3872 = vrcp.f32 %v2932_v40  ;;  %v2933_v45 = vadd.f32 1.0, %v3867_v44  ;;  %v3869_v46 = vpop.eup %3868 }
 0xf1a   :  { %v3871_v47 = vpop.eup %3870  ;;  %v2934_v61 = vadd.f32 1.0, %v3869_v46 }
 0xf1b   :  { %3874 = vrcp.f32 %v2933_v45 }
 0xf1c   :  { %3876 = vrcp.f32 %v2934_v61 }
 0xf26   :  { %v3873_v48 = vpop.eup %3872 }
 0xf27   :  { %v2943_v25 = vmul.f32 %v3873_v48, %v3871_v47 }
 0xf28   :  { %v3875_v34 = vpop.eup %3874 }
 0xf29   :  { %v2942_v16 = vmul.f32 %v3875_v34, %v5227_v50  ;;  %v3877_v59 = vpop.eup %3876  ;;  %v1870_v50 = vadd.f32 %v5436_v30, %v4921_v24 }
 0xf2b   :  { %v5274_v6 = vadd.f32 %v2943_v25, %v2942_v16 }
 0xf2d   :  { %3878 = vtanh.f32 %v5274_v6 }
 0xf3a   :  { %v3879_v35 = vpop.eup %3878 }
 0xf3b   :  { %v2946_v2 = vmul.f32 %v3879_v35, %v3877_v59 }
 0xf3d   :  { %v2947_v58 = vpack.c.bf16 %v2946_v2, %v2946_v2 }
 0xf3f   :  { %2948 = vst [vmem:[#allocation3 + $0x18] sm:$0xf] %v2947_v58  ;;  %2986 = vmatmul.mubr.bf16.vlgmr.msra.gmra.mxu0 %v2947_v58  ;;  %3027 = vmatmul.mubr.bf16.vlgmr.msra.gmra.mxu1 %v2947_v58 }
 0xf40   :  { %3443 = vmatpush3.bf16.msra.mxu0 %v3628_v52  ;;  %3458 = vmatprep.mubr.bf16.mxu0 %v3629_v57 }
 0xf41   :  { %3444 = vmatprep.subr.bf16.mxu0 %v3630_v0 }
 0xf44   :  { %3445 = vmatpush3.bf16.msra.mxu0 %v3630_v0 }
 0xf45   :  { %3446 = vmatprep.subr.bf16.mxu0 %v3631_v55 }
 0xf48   :  { %3447 = vmatpush3.bf16.msra.mxu0 %v3631_v55 }
 0xf49   :  { %3448 = vmatprep.subr.bf16.mxu0 %v3632_v51 }
 0xf4c   :  { %3449 = vmatpush3.bf16.msra.mxu0 %v3632_v51 }
 0xf4d   :  { %3450 = vmatprep.subr.bf16.mxu0 %v3633_v5 }
 0xf50   :  { %3451 = vmatpush3.bf16.msra.mxu0 %v3633_v5 }
 0xf51   :  { %3452 = vmatprep.subr.bf16.mxu0 %v3634_v60 }
 0xf54   :  { %3453 = vmatpush3.bf16.msra.mxu0 %v3634_v60 }
 0xf55   :  { %3454 = vmatprep.subr.bf16.mxu0 %v3635_v21 }
 0xf58   :  { %3455 = vmatpush3.bf16.msra.mxu0 %v3635_v21 }
 0xf59   :  { %3456 = vmatprep.subr.bf16.mxu0 %v3636_v27 }
 0xf5c   :  { %3457 = vmatpush3.bf16.msra.mxu0 %v3636_v27 }
 0xf5f   :  { %3459 = vmatmul.mubr.bf16.vlgmr.msra.gmra.mxu0 %v3637_v49 }
 0xf60   :  { %3462 = vmatprep.mubr.bf16.mxu0 %v3638_v28 }
 0xfff   :  { %v2987_v41 = vpop.f32.mrf.mxu0  ;;  %v3028_v29 = vpop.f32.mrf.mxu1 }
0x1000   :  { %v3035_v17 = vadd.f32 %v2987_v41, %v1868_v38  ;;  %v3037_v54 = vadd.f32 %v3028_v29, %v1941_v22 }
0x1001   :  { %v2989_v1 = vpop.f32.mrf.mxu0  ;;  %v3030_v33 = vpop.f32.mrf.mxu1 }
0x1002   :  { %v3414_v53 = vmul.f32 -1.442695, %v3035_v17  ;;  %v3036_v52 = vadd.f32 %v2989_v1, %v1870_v50  ;;  %v3416_v24 = vmul.f32 -1.442695, %v3037_v54  ;;  %v3038_v26 = vadd.f32 %v3030_v33, %v1943_v63 }
0x1003   :  { %v2991_v9 = vpop.f32.mrf.mxu0  ;;  %v3032_v23 = vpop.f32.mrf.mxu1 }
0x1004   :  { %3880 = vpow2.f32 %v3414_v53  ;;  %v3415_v37 = vmul.f32 -1.442695, %v3036_v52 }
0x1005   :  { %v2992_v3 = vpop.f32.mrf.mxu0  ;;  %v3033_v12 = vpop.f32.mrf.mxu1 }
0x1006   :  { %3882 = vpow2.f32 %v3415_v37 }
0x1007   :  { %3884 = vpow2.f32 %v3416_v24 }
0x1008   :  { %3886 = vtanh.f32 %v3038_v26 }
0x1011   :  { %v3881_v14 = vpop.eup %3880 }
0x1012   :  { %v3048_v7 = vadd.f32 1.0, %v3881_v14 }
0x1013   :  { %v3883_v36 = vpop.eup %3882 }
0x1014   :  { %3888 = vrcp.f32 %v3048_v7  ;;  %v3049_v19 = vadd.f32 1.0, %v3883_v36  ;;  %v3885_v56 = vpop.eup %3884 }
0x1015   :  { %v3887_v10 = vpop.eup %3886  ;;  %v3050_v42 = vadd.f32 1.0, %v3885_v56 }
0x1016   :  { %3890 = vrcp.f32 %v3049_v19 }
0x1017   :  { %3892 = vrcp.f32 %v3050_v42 }
0x101f   :  { %v3460_v20 = vpop.f32.mrf.mxu0 }
0x1020   :  { %v3211_v31 = vadd.f32 %v3460_v20, %v3417_v18 }
0x1021   :  { %v3889_v13 = vpop.eup %3888  ;;  %v3202_v15 = vpop.f32.mrf.mxu0 }
0x1022   :  { %v3059_v62 = vmul.f32 %v3889_v13, %v3887_v10  ;;  %3235 = vst [vmem:[%s5343_s9 + $0x10] sm:$0xff] %v3211_v31  ;;  %v3203_v11 = vadd.f32 %v3417_v18, %v3202_v15 }
0x1023   :  { %v3891_v39 = vpop.eup %3890  ;;  %v3461_v43 = vpop.f32.mrf.mxu0 }
0x1024   :  { %v3058_v40 = vmul.f32 %v3891_v39, %v5274_v6  ;;  %3233 = vst [vmem:[%s5343_s9] sm:$0xff] %v3203_v11  ;;  %v3214_v44 = vadd.f32 %v3461_v43, %v3417_v18  ;;  %v3893_v48 = vpop.eup %3892 }
0x1025   :  { %v3205_v45 = vpop.f32.mrf.mxu0 }
0x1026   :  { %v3060_v46 = vadd.f32 %v3059_v62, %v3058_v40  ;;  %3236 = vst [vmem:[%s5343_s9 + $0x18] sm:$0xff] %v3214_v44  ;;  %v3206_v47 = vadd.f32 %v3417_v18, %v3205_v45 }
0x1028   :  { %3894 = vtanh.f32 %v3060_v46  ;;  %3234 = vst [vmem:[%s5343_s9 + $0x8] sm:$0xff] %v3206_v47 }
0x1035   :  { %v3895_v25 = vpop.eup %3894 }
0x1036   :  { %v3062_v34 = vmul.f32 %v3895_v25, %v3893_v48 }
0x1038   :  { %v3063_v61 = vpack.c.bf16 %v3062_v34, %v3062_v34 }
0x103a   :  { %3064 = vst [vmem:[#allocation3 + $0x1c] sm:$0xf] %v3063_v61 }
0x1041   :  { %v3639_v16 = vld [vmem:[#allocation3 + $0x18] sm:$0xff]  }
0x1042   :  { %3463 = vmatmul.mubr.bf16.gmra.mxu0 %v3639_v16 }
0x1102   :  { %v3464_v6 = vpop.f32.mrf.mxu0 }
0x1103   :  { %v3227_v59 = vadd.f32 %v3464_v6, %v3417_v18 }
0x1104   :  { %v3218_v35 = vpop.f32.mrf.mxu0 }
0x1105   :  { %3239 = vst [vmem:[%s5343_s9 + $0x30] sm:$0xff] %v3227_v59  ;;  %v3219_v2 = vadd.f32 %v3417_v18, %v3218_v35 }
0x1106   :  { %v3465_v58 = vpop.f32.mrf.mxu0 }
0x1107   :  { %3237 = vst [vmem:[%s5343_s9 + $0x20] sm:$0xff] %v3219_v2  ;;  %v3230_v0 = vadd.f32 %v3465_v58, %v3417_v18 }
0x1108   :  { %v3221_v57 = vpop.f32.mrf.mxu0 }
0x1109   :  { %3240 = vst [vmem:[%s5343_s9 + $0x38] sm:$0xff] %v3230_v0  ;;  %v3222_v55 = vadd.f32 %v3417_v18, %v3221_v57 }
0x110b   :  { %3238 = vst [vmem:[%s5343_s9 + $0x28] sm:$0xff] %v3222_v55 }
0x110c   :  { %3245 = vsyncpa [#allocation5], 1 }
0x110d   :  { %3246 = vsyncpa [#allocation7], 1 }
0x110e   :  { %3247 = vsyncpa [#allocation10], 1 }

</bundles_post_ra>
